<compile_context>
chip_gen: v7x
topology: tpu7x:2x2x1
jax: 0.10.0
libtpu: 0.0.40
codegen_flags: <defaults>
</compile_context>

<pallas_src>
import functools

import jax
import jax.numpy as jnp
from jax import lax
from jax.experimental import pallas as pl
from jax.experimental.pallas import tpu as pltpu


# ----------------------------------------------------------------------------
# Pallas kernel 1: per-sample conv-as-matmul.
#   out[b] = relu(W (Cout,K) @ patches[b] (K,M) + bias)   (bf16 in, f32 acc)
# Grid is over batch blocks ("parallel" -> shards across v7x's two TCs); the
# weight / bias blocks are constant across steps so they stay VMEM resident.
# ----------------------------------------------------------------------------
def _conv_mm_kernel(p_ref, w_ref, b_ref, o_ref):
    w = w_ref[...]
    b = b_ref[...]
    for i in range(p_ref.shape[0]):          # samples per block (small, unrolled)
        acc = jnp.dot(w, p_ref[i], preferred_element_type=jnp.float32) + b
        o_ref[i] = jnp.maximum(acc, 0.0).astype(o_ref.dtype)


def conv_mm(patches, w, b, *, block_b=1):
    """patches: (B, K, M) bf16, w: (Cout, K) bf16, b: (Cout, 1) f32 -> (B, Cout, M) bf16."""
    B, K, M = patches.shape
    Cout = w.shape[0]
    assert B % block_b == 0
    return pl.pallas_call(
        _conv_mm_kernel,
        out_shape=jax.ShapeDtypeStruct((B, Cout, M), jnp.bfloat16),
        grid_spec=pltpu.PrefetchScalarGridSpec(
            num_scalar_prefetch=0,
            grid=(B // block_b,),
            in_specs=[
                pl.BlockSpec((block_b, K, M), lambda i: (i, 0, 0)),   # streamed
                pl.BlockSpec((Cout, K), lambda i: (0, 0)),            # resident
                pl.BlockSpec((Cout, 1), lambda i: (0, 0)),            # resident
            ],
            out_specs=pl.BlockSpec((block_b, Cout, M), lambda i: (i, 0, 0)),
        ),
        compiler_params=pltpu.CompilerParams(
            dimension_semantics=("parallel",)),
    )(patches, w, b)


# ----------------------------------------------------------------------------
# Pallas kernel 2: fused head, single grid step over the whole contraction.
#   feature = a2_flat (B,6400) @ lin_w (6400,200) + lin_b      (lin_w resident)
#   [logits | value] = feature @ [actor_w | critic_w] + bias   (two outputs)
# ----------------------------------------------------------------------------
def _head_kernel(a_ref, wl_ref, bl_ref, wh_ref, bh_ref, logits_ref, value_ref):
    feat = jnp.dot(a_ref[...], wl_ref[...],
                   preferred_element_type=jnp.float32) + bl_ref[...]
    head = jnp.dot(feat.astype(wh_ref.dtype), wh_ref[...],
                   preferred_element_type=jnp.float32) + bh_ref[...]
    n_act = logits_ref.shape[-1]
    logits_ref[...] = head[:, :n_act]
    value_ref[...] = head[:, n_act:]


def fused_head(a2_flat, wl, bl, wh, bh, num_outputs, *, max_block_b=256):
    """a2_flat: (B, 6400) bf16, wl: (6400, H) bf16, bl: (1, H) f32,
    wh: (H, num_outputs+1) bf16, bh: (1, num_outputs+1) f32."""
    B, Kf = a2_flat.shape
    Hd = wl.shape[1]
    N1 = wh.shape[1]
    bt = min(max_block_b, B)                 # B-tiling only matters for huge batches
    return pl.pallas_call(
        _head_kernel,
        out_shape=(jax.ShapeDtypeStruct((B, num_outputs), jnp.float32),
                   jax.ShapeDtypeStruct((B, 1), jnp.float32)),
        grid_spec=pltpu.PrefetchScalarGridSpec(
            num_scalar_prefetch=0,
            grid=(pl.cdiv(B, bt),),
            in_specs=[
                pl.BlockSpec((bt, Kf), lambda i: (i, 0)),      # activations
                pl.BlockSpec((Kf, Hd), lambda i: (0, 0)),      # lin_w resident (2.56 MB)
                pl.BlockSpec((1, Hd), lambda i: (0, 0)),
                pl.BlockSpec((Hd, N1), lambda i: (0, 0)),      # [actor|critic] weight
                pl.BlockSpec((1, N1), lambda i: (0, 0)),
            ],
            out_specs=(pl.BlockSpec((bt, num_outputs), lambda i: (i, 0)),
                       pl.BlockSpec((bt, 1), lambda i: (i, 0))),
        ),
        compiler_params=pltpu.CompilerParams(
            dimension_semantics=("parallel",)),
    )(a2_flat, wl, bl, wh, bh)


# ----------------------------------------------------------------------------
# im2col glue (JAX, minimal op count).
# Strided taps are grouped by stride phase via a space-to-depth reshape, so
# conv1 needs 12 slices (not 192) and conv2 needs 12 (not 48).  The resulting
# K ordering is matched by the weight pre-permutation in init_params.
# TODO(synk): this glue (and the patches HBM round trip) could be removed
# entirely by doing the im2col from a VMEM-resident input inside the conv
# kernel, but that needs strided in-kernel slicing / relayouts.
# ----------------------------------------------------------------------------
def _im2col_conv1(xpad):
    """xpad: (B, 11, 84, 84) bf16 (H/W already padded by 2) -> (B, 192, 2000)."""
    B = xpad.shape[0]
    xr = xpad.reshape(B, 11, 21, 4, 21, 4)          # space-to-depth on H, W (stride 4)
    taps = []
    for dz in range(3):
        for by in range(2):
            for bx in range(2):
                taps.append(xr[:, dz:dz + 9:2, by:by + 20, :, bx:bx + 20, :])
    t = jnp.stack(taps, axis=0)                     # (12, B, 5, 20, 4, 20, 4)
    t = t.transpose(1, 0, 4, 6, 2, 3, 5)            # (B, tap, sy, sx, od, oh, ow)
    return t.reshape(B, 192, 2000)


def _im2col_conv2(a1):
    """a1: (B, 16, 5, 20, 20) bf16 -> (B, 768, 200)."""
    B = a1.shape[0]
    a1p = jnp.pad(a1, ((0, 0), (0, 0), (0, 0), (1, 1), (1, 1)))
    ar = a1p.reshape(B, 16, 5, 11, 2, 11, 2)        # space-to-depth on H, W (stride 2)
    taps = []
    for dz in range(3):
        for by in range(2):
            for bx in range(2):
                taps.append(ar[:, :, dz:dz + 3:2, by:by + 10, :, bx:bx + 10, :])
    t = jnp.stack(taps, axis=0)                     # (12, B, 16, 2, 10, 2, 10, 2)
    t = t.transpose(1, 0, 2, 5, 7, 3, 4, 6)         # (B, tap, cin, sy, sx, od, oh, ow)
    return t.reshape(B, 768, 200)


# ----------------------------------------------------------------------------
# Parameters: torch-default-style uniform init; the Pallas copies are
# flattened / permuted / bf16-cast ONCE here so the forward has zero weight
# plumbing.  The raw copies are kept for the independent f32 reference.
# ----------------------------------------------------------------------------
def init_params(key, num_outputs, hidden_dim=200):
    def uniform(k, shape, fan_in):
        bound = 1.0 / (fan_in ** 0.5)
        return jax.random.uniform(k, shape, jnp.float32, -bound, bound)

    ks = jax.random.split(key, 10)
    flat_in = 32 * 2 * 10 * 10                      # 6400 (module-defined)
    raw = {
        "conv1_w": uniform(ks[0], (16, 1, 3, 8, 8), 1 * 3 * 8 * 8),
        "conv1_b": uniform(ks[1], (16,), 1 * 3 * 8 * 8),
        "conv2_w": uniform(ks[2], (32, 16, 3, 4, 4), 16 * 3 * 4 * 4),
        "conv2_b": uniform(ks[3], (32,), 16 * 3 * 4 * 4),
        "lin_w": uniform(ks[4], (hidden_dim, flat_in), flat_in),
        "lin_b": uniform(ks[5], (hidden_dim,), flat_in),
        "actor_w": uniform(ks[6], (num_outputs, hidden_dim), hidden_dim),
        "actor_b": uniform(ks[7], (num_outputs,), hidden_dim),
        "critic_w": uniform(ks[8], (1, hidden_dim), hidden_dim),
        "critic_b": uniform(ks[9], (1,), hidden_dim),
    }

    # conv1: kh=8 -> (by=2, sy=4), kw=8 -> (bx=2, sx=4); K order (dz,by,bx,sy,sx).
    w1 = raw["conv1_w"][:, 0].reshape(16, 3, 2, 4, 2, 4)
    w1 = w1.transpose(0, 1, 2, 4, 3, 5).reshape(16, 192)
    # conv2: kh=4 -> (by=2, sy=2), kw=4 -> (bx=2, sx=2); K order (dz,by,bx,cin,sy,sx).
    w2 = raw["conv2_w"].reshape(32, 16, 3, 2, 2, 2, 2)
    w2 = w2.transpose(0, 2, 3, 5, 1, 4, 6).reshape(32, 768)

    params = {
        "conv1_w": w1.astype(jnp.bfloat16),
        "conv1_b": raw["conv1_b"].reshape(16, 1),
        "conv2_w": w2.astype(jnp.bfloat16),
        "conv2_b": raw["conv2_b"].reshape(32, 1),
        "lin_w": raw["lin_w"].T.astype(jnp.bfloat16),                 # (6400, 200)
        "lin_b": raw["lin_b"].reshape(1, hidden_dim),
        "head_w": jnp.concatenate([raw["actor_w"].T, raw["critic_w"].T],
                                  axis=1).astype(jnp.bfloat16),       # (200, n+1)
        "head_b": jnp.concatenate([raw["actor_b"],
                                   raw["critic_b"]]).reshape(1, num_outputs + 1),
    }
    return params, raw


# ----------------------------------------------------------------------------
# Forward pass matching CNN3dModel.forward (logits + value).
# ----------------------------------------------------------------------------
def cnn3d_forward(params, x, *, num_outputs):
    B, D, H, W, C = x.shape
    assert (D, H, W, C) == (11, 80, 80, 1), "shape forced by nn.Linear(6400, ...)"
    # Samples per conv block: 1 for small batches (keeps >=2 parallel blocks for
    # v7x's two TCs); group for large PPO batches to amortise per-step overhead.
    bb = 1 if B < 8 else (4 if B % 4 == 0 else (2 if B % 2 == 0 else 1))

    # torch: x.permute(0,4,1,2,3); Cin == 1 so just drop the channel axis.
    xb = x[..., 0].astype(jnp.bfloat16)                               # (B, 11, 80, 80)

    # conv1: kernel (3,8,8), stride (2,4,4), padding (0,2,2), ReLU
    xp = jnp.pad(xb, ((0, 0), (0, 0), (2, 2), (2, 2)))
    p1 = _im2col_conv1(xp)                                            # (B, 192, 2000)
    a1 = conv_mm(p1, params["conv1_w"], params["conv1_b"], block_b=bb)  # (B,16,2000)

    # conv2: kernel (3,4,4), stride (2,2,2), padding (0,1,1), ReLU
    p2 = _im2col_conv2(a1.reshape(B, 16, 5, 20, 20))                  # (B, 768, 200)
    a2 = conv_mm(p2, params["conv2_w"], params["conv2_b"], block_b=bb)  # (B,32,200)

    # Flatten (B,32,2,10,10) -> (B,6400) in torch order; layout-preserving (free).
    a2_flat = a2.reshape(B, 6400)
    # TODO(synk): fusing conv2 into the head kernel would need an in-kernel
    # (32, B*200) -> (B, 6400) sublane<->lane relayout; kept as two calls with a
    # free reshape in between instead.

    logits, value = fused_head(a2_flat, params["lin_w"], params["lin_b"],
                               params["head_w"], params["head_b"], num_outputs)
    # TODO(synk): torch.distributions.Categorical has no Pallas equivalent; we
    # return the raw logits (dist = Categorical(logits=logits)) plus value.
    return logits, value


# ----------------------------------------------------------------------------
# Independent f32 reference (XLA conv + plain matmuls from the RAW weights):
# validates both the kernels and all the layout / weight-permutation plumbing.
# ----------------------------------------------------------------------------
def reference_forward(raw, x):
    dn = ("NCDHW", "OIDHW", "NCDHW")
    xt = jnp.transpose(x, (0, 4, 1, 2, 3))                            # (B,1,11,80,80)
    y = lax.conv_general_dilated(xt, raw["conv1_w"], (2, 4, 4),
                                 [(0, 0), (2, 2), (2, 2)], dimension_numbers=dn)
    y = jax.nn.relu(y + raw["conv1_b"][None, :, None, None, None])
    y = lax.conv_general_dilated(y, raw["conv2_w"], (2, 2, 2),
                                 [(0, 0), (1, 1), (1, 1)], dimension_numbers=dn)
    y = jax.nn.relu(y + raw["conv2_b"][None, :, None, None, None])
    feat = y.reshape(y.shape[0], -1) @ raw["lin_w"].T + raw["lin_b"]
    logits = feat @ raw["actor_w"].T + raw["actor_b"]
    value = feat @ raw["critic_w"].T + raw["critic_b"]
    return logits, value


if __name__ == "__main__":
    key = jax.random.PRNGKey(0)
    k_param, k_x = jax.random.split(key)

    B, D, H, W, C = 2, 11, 80, 80, 1   # seq_len=11, 80x80 frames (forced by Linear(6400, .))
    num_outputs = 6                    # Pong action space
    hidden_dim = 200

    params, raw = init_params(k_param, num_outputs, hidden_dim)
    x = jax.random.uniform(k_x, (B, D, H, W, C), jnp.float32)

    fwd = jax.jit(functools.partial(cnn3d_forward, num_outputs=num_outputs))
    logits, value = fwd(params, x)
    jax.block_until_ready((logits, value))
    assert logits.shape == (B, num_outputs) and value.shape == (B, 1)

    logits_ref, value_ref = jax.jit(reference_forward)(raw, x)
    jax.block_until_ready((logits_ref, value_ref))
    # bf16 activations/weights vs. the f32 reference -> loose tolerance.
    assert jnp.allclose(logits, logits_ref, rtol=5e-2, atol=3e-2), (
        jnp.max(jnp.abs(logits - logits_ref)))
    assert jnp.allclose(value, value_ref, rtol=5e-2, atol=3e-2), (
        jnp.max(jnp.abs(value - value_ref)))

    print("KERNEL_OK")
</pallas_src>

<mosaic_0001>
module attributes {stable_mosaic.version = 11 : i64} {
  func.func @_conv_mm_kernel(%arg0: i32, %arg1: memref<1x192x2000xbf16, #tpu.memory_space<vmem>>, %arg2: memref<16x192xbf16, #tpu.memory_space<vmem>>, %arg3: memref<16x1xf32, #tpu.memory_space<vmem>>, %arg4: memref<1x16x2000xbf16, #tpu.memory_space<vmem>>) attributes {dimension_semantics = [#tpu.dimension_semantics<parallel>], iteration_bounds = array<i64: 2>, scalar_prefetch = 0 : i64, scratch_operands = 0 : i64, tpu.core_type = #tpu.core_type<tc>, window_params = [{transform_indices = @transform_0, window_bounds = array<i64: 1, 192, 2000>}, {pipeline_mode = #tpu.pipeline_mode<synchronous>, transform_indices = @transform_1, window_bounds = array<i64: 16, 192>}, {pipeline_mode = #tpu.pipeline_mode<synchronous>, transform_indices = @transform_2, window_bounds = array<i64: 16, 1>}, {transform_indices = @transform_3, window_bounds = array<i64: 1, 16, 2000>}]} {
    %c0 = arith.constant 0 : index
    %c0_0 = arith.constant 0 : index
    %0 = vector.load %arg2[%c0, %c0_0] : memref<16x192xbf16, #tpu.memory_space<vmem>>, vector<16x192xbf16>
    %c0_1 = arith.constant 0 : index
    %c0_2 = arith.constant 0 : index
    %1 = vector.load %arg3[%c0_1, %c0_2] : memref<16x1xf32, #tpu.memory_space<vmem>>, vector<16x1xf32>
    %c0_3 = arith.constant 0 : index
    %c0_4 = arith.constant 0 : index
    %c0_5 = arith.constant 0 : index
    %2 = vector.load %arg1[%c0_3, %c0_4, %c0_5] : memref<1x192x2000xbf16, #tpu.memory_space<vmem>>, vector<1x192x2000xbf16>
    %3 = vector.shape_cast %2 : vector<1x192x2000xbf16> to vector<192x2000xbf16>
    %cst = arith.constant dense<0.000000e+00> : vector<16x2000xf32>
    %4 = tpu.matmul %0, %3, %cst {dimension_numbers = #tpu.dot_dimension_numbers<[1], [0], [0], [1], [0, 0, 1, 1], [], []>} : vector<16x192xbf16>, vector<192x2000xbf16>, vector<16x2000xf32> -> vector<16x2000xf32>
    %5 = vector.broadcast %1 : vector<16x1xf32> to vector<16x2000xf32>
    %6 = arith.addf %4, %5 : vector<16x2000xf32>
    %cst_6 = arith.constant 0.000000e+00 : f32
    %7 = vector.broadcast %cst_6 : f32 to vector<16x2000xf32>
    %8 = arith.maximumf %6, %7 : vector<16x2000xf32>
    %9 = arith.truncf %8 : vector<16x2000xf32> to vector<16x2000xbf16>
    %c0_7 = arith.constant 0 : index
    %c0_8 = arith.constant 0 : index
    %c0_9 = arith.constant 0 : index
    %10 = vector.load %arg4[%c0_7, %c0_8, %c0_9] : memref<1x16x2000xbf16, #tpu.memory_space<vmem>>, vector<1x16x2000xbf16>
    %11 = vector.shape_cast %10 : vector<1x16x2000xbf16> to vector<16x2000xbf16>
    %12 = vector.shape_cast %9 : vector<16x2000xbf16> to vector<1x16x2000xbf16>
    tpu.vector_store %arg4[%c0_7, %c0_8, %c0_9], %12 {strides = array<i32>} : memref<1x16x2000xbf16, #tpu.memory_space<vmem>>, vector<1x16x2000xbf16>,
    return
  }
  func.func @transform_0(%arg0: i32) -> (i32, i32, i32) {
    %c0_i32 = arith.constant 0 : i32
    %c0_i32_0 = arith.constant 0 : i32
    %c0_i32_1 = arith.constant 0 : i32
    return %arg0, %c0_i32, %c0_i32_0 : i32, i32, i32
  }
  func.func @transform_1(%arg0: i32) -> (i32, i32) {
    %c0_i32 = arith.constant 0 : i32
    %c0_i32_0 = arith.constant 0 : i32
    %c0_i32_1 = arith.constant 0 : i32
    return %c0_i32, %c0_i32_0 : i32, i32
  }
  func.func @transform_2(%arg0: i32) -> (i32, i32) {
    %c0_i32 = arith.constant 0 : i32
    %c0_i32_0 = arith.constant 0 : i32
    %c0_i32_1 = arith.constant 0 : i32
    return %c0_i32, %c0_i32_0 : i32, i32
  }
  func.func @transform_3(%arg0: i32) -> (i32, i32, i32) {
    %c0_i32 = arith.constant 0 : i32
    %c0_i32_0 = arith.constant 0 : i32
    %c0_i32_1 = arith.constant 0 : i32
    return %arg0, %c0_i32, %c0_i32_0 : i32, i32, i32
  }
}

module attributes {stable_mosaic.version = 11 : i64} {
  func.func @_conv_mm_kernel(%arg0: i32, %arg1: memref<1x768x200xbf16, #tpu.memory_space<vmem>>, %arg2: memref<32x768xbf16, #tpu.memory_space<vmem>>, %arg3: memref<32x1xf32, #tpu.memory_space<vmem>>, %arg4: memref<1x32x200xbf16, #tpu.memory_space<vmem>>) attributes {dimension_semantics = [#tpu.dimension_semantics<parallel>], iteration_bounds = array<i64: 2>, scalar_prefetch = 0 : i64, scratch_operands = 0 : i64, tpu.core_type = #tpu.core_type<tc>, window_params = [{transform_indices = @transform_0, window_bounds = array<i64: 1, 768, 200>}, {pipeline_mode = #tpu.pipeline_mode<synchronous>, transform_indices = @transform_1, window_bounds = array<i64: 32, 768>}, {pipeline_mode = #tpu.pipeline_mode<synchronous>, transform_indices = @transform_2, window_bounds = array<i64: 32, 1>}, {transform_indices = @transform_3, window_bounds = array<i64: 1, 32, 200>}]} {
    %c0 = arith.constant 0 : index
    %c0_0 = arith.constant 0 : index
    %0 = vector.load %arg2[%c0, %c0_0] : memref<32x768xbf16, #tpu.memory_space<vmem>>, vector<32x768xbf16>
    %c0_1 = arith.constant 0 : index
    %c0_2 = arith.constant 0 : index
    %1 = vector.load %arg3[%c0_1, %c0_2] : memref<32x1xf32, #tpu.memory_space<vmem>>, vector<32x1xf32>
    %c0_3 = arith.constant 0 : index
    %c0_4 = arith.constant 0 : index
    %c0_5 = arith.constant 0 : index
    %2 = vector.load %arg1[%c0_3, %c0_4, %c0_5] : memref<1x768x200xbf16, #tpu.memory_space<vmem>>, vector<1x768x200xbf16>
    %3 = vector.shape_cast %2 : vector<1x768x200xbf16> to vector<768x200xbf16>
    %cst = arith.constant dense<0.000000e+00> : vector<32x200xf32>
    %4 = tpu.matmul %0, %3, %cst {dimension_numbers = #tpu.dot_dimension_numbers<[1], [0], [0], [1], [0, 0, 1, 1], [], []>} : vector<32x768xbf16>, vector<768x200xbf16>, vector<32x200xf32> -> vector<32x200xf32>
    %5 = vector.broadcast %1 : vector<32x1xf32> to vector<32x200xf32>
    %6 = arith.addf %4, %5 : vector<32x200xf32>
    %cst_6 = arith.constant 0.000000e+00 : f32
    %7 = vector.broadcast %cst_6 : f32 to vector<32x200xf32>
    %8 = arith.maximumf %6, %7 : vector<32x200xf32>
    %9 = arith.truncf %8 : vector<32x200xf32> to vector<32x200xbf16>
    %c0_7 = arith.constant 0 : index
    %c0_8 = arith.constant 0 : index
    %c0_9 = arith.constant 0 : index
    %10 = vector.load %arg4[%c0_7, %c0_8, %c0_9] : memref<1x32x200xbf16, #tpu.memory_space<vmem>>, vector<1x32x200xbf16>
    %11 = vector.shape_cast %10 : vector<1x32x200xbf16> to vector<32x200xbf16>
    %12 = vector.shape_cast %9 : vector<32x200xbf16> to vector<1x32x200xbf16>
    tpu.vector_store %arg4[%c0_7, %c0_8, %c0_9], %12 {strides = array<i32>} : memref<1x32x200xbf16, #tpu.memory_space<vmem>>, vector<1x32x200xbf16>,
    return
  }
  func.func @transform_0(%arg0: i32) -> (i32, i32, i32) {
    %c0_i32 = arith.constant 0 : i32
    %c0_i32_0 = arith.constant 0 : i32
    %c0_i32_1 = arith.constant 0 : i32
    return %arg0, %c0_i32, %c0_i32_0 : i32, i32, i32
  }
  func.func @transform_1(%arg0: i32) -> (i32, i32) {
    %c0_i32 = arith.constant 0 : i32
    %c0_i32_0 = arith.constant 0 : i32
    %c0_i32_1 = arith.constant 0 : i32
    return %c0_i32, %c0_i32_0 : i32, i32
  }
  func.func @transform_2(%arg0: i32) -> (i32, i32) {
    %c0_i32 = arith.constant 0 : i32
    %c0_i32_0 = arith.constant 0 : i32
    %c0_i32_1 = arith.constant 0 : i32
    return %c0_i32, %c0_i32_0 : i32, i32
  }
  func.func @transform_3(%arg0: i32) -> (i32, i32, i32) {
    %c0_i32 = arith.constant 0 : i32
    %c0_i32_0 = arith.constant 0 : i32
    %c0_i32_1 = arith.constant 0 : i32
    return %arg0, %c0_i32, %c0_i32_0 : i32, i32, i32
  }
}

module attributes {stable_mosaic.version = 11 : i64} {
  func.func @_head_kernel(%arg0: i32, %arg1: memref<2x6400xbf16, #tpu.memory_space<vmem>>, %arg2: memref<6400x200xbf16, #tpu.memory_space<vmem>>, %arg3: memref<1x200xf32, #tpu.memory_space<vmem>>, %arg4: memref<200x7xbf16, #tpu.memory_space<vmem>>, %arg5: memref<1x7xf32, #tpu.memory_space<vmem>>, %arg6: memref<2x6xf32, #tpu.memory_space<vmem>>, %arg7: memref<2x1xf32, #tpu.memory_space<vmem>>) attributes {dimension_semantics = [#tpu.dimension_semantics<parallel>], iteration_bounds = array<i64: 1>, scalar_prefetch = 0 : i64, scratch_operands = 0 : i64, tpu.core_type = #tpu.core_type<tc>, window_params = [{transform_indices = @transform_0, window_bounds = array<i64: 2, 6400>}, {pipeline_mode = #tpu.pipeline_mode<synchronous>, transform_indices = @transform_1, window_bounds = array<i64: 6400, 200>}, {pipeline_mode = #tpu.pipeline_mode<synchronous>, transform_indices = @transform_2, window_bounds = array<i64: 1, 200>}, {pipeline_mode = #tpu.pipeline_mode<synchronous>, transform_indices = @transform_3, window_bounds = array<i64: 200, 7>}, {pipeline_mode = #tpu.pipeline_mode<synchronous>, transform_indices = @transform_4, window_bounds = array<i64: 1, 7>}, {transform_indices = @transform_5, window_bounds = array<i64: 2, 6>}, {transform_indices = @transform_6, window_bounds = array<i64: 2, 1>}]} {
    %c0 = arith.constant 0 : index
    %c0_0 = arith.constant 0 : index
    %0 = vector.load %arg1[%c0, %c0_0] : memref<2x6400xbf16, #tpu.memory_space<vmem>>, vector<2x6400xbf16>
    %c0_1 = arith.constant 0 : index
    %c0_2 = arith.constant 0 : index
    %1 = vector.load %arg2[%c0_1, %c0_2] : memref<6400x200xbf16, #tpu.memory_space<vmem>>, vector<6400x200xbf16>
    %cst = arith.constant dense<0.000000e+00> : vector<2x200xf32>
    %2 = tpu.matmul %0, %1, %cst {dimension_numbers = #tpu.dot_dimension_numbers<[1], [0], [0], [1], [0, 0, 1, 1], [], []>} : vector<2x6400xbf16>, vector<6400x200xbf16>, vector<2x200xf32> -> vector<2x200xf32>
    %c0_3 = arith.constant 0 : index
    %c0_4 = arith.constant 0 : index
    %3 = vector.load %arg3[%c0_3, %c0_4] : memref<1x200xf32, #tpu.memory_space<vmem>>, vector<1x200xf32>
    %4 = vector.broadcast %3 : vector<1x200xf32> to vector<2x200xf32>
    %5 = arith.addf %2, %4 : vector<2x200xf32>
    %6 = arith.truncf %5 : vector<2x200xf32> to vector<2x200xbf16>
    %c0_5 = arith.constant 0 : index
    %c0_6 = arith.constant 0 : index
    %7 = vector.load %arg4[%c0_5, %c0_6] : memref<200x7xbf16, #tpu.memory_space<vmem>>, vector<200x7xbf16>
    %cst_7 = arith.constant dense<0.000000e+00> : vector<2x7xf32>
    %8 = tpu.matmul %6, %7, %cst_7 {dimension_numbers = #tpu.dot_dimension_numbers<[1], [0], [0], [1], [0, 0, 1, 1], [], []>} : vector<2x200xbf16>, vector<200x7xbf16>, vector<2x7xf32> -> vector<2x7xf32>
    %c0_8 = arith.constant 0 : index
    %c0_9 = arith.constant 0 : index
    %9 = vector.load %arg5[%c0_8, %c0_9] : memref<1x7xf32, #tpu.memory_space<vmem>>, vector<1x7xf32>
    %10 = vector.broadcast %9 : vector<1x7xf32> to vector<2x7xf32>
    %11 = arith.addf %8, %10 : vector<2x7xf32>
    %12 = vector.extract_strided_slice %11 {offsets = [0, 0], sizes = [2, 6], strides = [1, 1]} : vector<2x7xf32> to vector<2x6xf32>
    %c0_10 = arith.constant 0 : index
    %c0_11 = arith.constant 0 : index
    %13 = vector.load %arg6[%c0_10, %c0_11] : memref<2x6xf32, #tpu.memory_space<vmem>>, vector<2x6xf32>
    tpu.vector_store %arg6[%c0_10, %c0_11], %12 {strides = array<i32>} : memref<2x6xf32, #tpu.memory_space<vmem>>, vector<2x6xf32>,
    %14 = vector.extract_strided_slice %11 {offsets = [0, 6], sizes = [2, 1], strides = [1, 1]} : vector<2x7xf32> to vector<2x1xf32>
    %c0_12 = arith.constant 0 : index
    %c0_13 = arith.constant 0 : index
    %15 = vector.load %arg7[%c0_12, %c0_13] : memref<2x1xf32, #tpu.memory_space<vmem>>, vector<2x1xf32>
    tpu.vector_store %arg7[%c0_12, %c0_13], %14 {strides = array<i32>} : memref<2x1xf32, #tpu.memory_space<vmem>>, vector<2x1xf32>,
    return
  }
  func.func @transform_0(%arg0: i32) -> (i32, i32) {
    %c0_i32 = arith.constant 0 : i32
    %c0_i32_0 = arith.constant 0 : i32
    return %arg0, %c0_i32 : i32, i32
  }
  func.func @transform_1(%arg0: i32) -> (i32, i32) {
    %c0_i32 = arith.constant 0 : i32
    %c0_i32_0 = arith.constant 0 : i32
    %c0_i32_1 = arith.constant 0 : i32
    return %c0_i32, %c0_i32_0 : i32, i32
  }
  func.func @transform_2(%arg0: i32) -> (i32, i32) {
    %c0_i32 = arith.constant 0 : i32
    %c0_i32_0 = arith.constant 0 : i32
    %c0_i32_1 = arith.constant 0 : i32
    return %c0_i32, %c0_i32_0 : i32, i32
  }
  func.func @transform_3(%arg0: i32) -> (i32, i32) {
    %c0_i32 = arith.constant 0 : i32
    %c0_i32_0 = arith.constant 0 : i32
    %c0_i32_1 = arith.constant 0 : i32
    return %c0_i32, %c0_i32_0 : i32, i32
  }
  func.func @transform_4(%arg0: i32) -> (i32, i32) {
    %c0_i32 = arith.constant 0 : i32
    %c0_i32_0 = arith.constant 0 : i32
    %c0_i32_1 = arith.constant 0 : i32
    return %c0_i32, %c0_i32_0 : i32, i32
  }
  func.func @transform_5(%arg0: i32) -> (i32, i32) {
    %c0_i32 = arith.constant 0 : i32
    %c0_i32_0 = arith.constant 0 : i32
    return %arg0, %c0_i32 : i32, i32
  }
  func.func @transform_6(%arg0: i32) -> (i32, i32) {
    %c0_i32 = arith.constant 0 : i32
    %c0_i32_0 = arith.constant 0 : i32
    return %arg0, %c0_i32 : i32, i32
  }
}

</mosaic_0001>

<bundles_post_ra>
// kernel: cnn3d_forward.3
= control target key start
LH: loop header
LB: loop body
LE: loop exit
PB: predicated region body
PF: predicated region fallthrough
CT: control target
= control target key end

     0   :  { %s2185_s12 = smov 0   ;;  %s2495_s0 = inlined_call_operand.vmem [shape: bf16[2,192,2000], index: 0, kind: input, shape index: {}]   ;;  %s2496_s1 = inlined_call_operand.vmem [shape: bf16[16,192], index: 1, kind: input, shape index: {}]   ;;  %s2497_s2 = inlined_call_operand.vmem [shape: f32[16,1], index: 2, kind: input, shape index: {}]   ;;  %s2498_s3 = inlined_call_operand.vmem [shape: bf16[2,16,2000], index: 3, kind: output, shape index: {}]  }
   0x1 LB: > { %s1897_s13 = sadd.s32 4294967295, %s2162_s12   ;;  %p1901_p0 = scmp.ge.s32.totalorder %s2162_s12, 1  ;;  %s2162_s12 = sphi %s2185_s12, %s13_s12  }
   0x2   : > { %p137_p1 = scmp.lt.s32.totalorder %s2162_s12, 3 }
   0x4   : > { %p138_p2 = pnand %p1901_p0, %p137_p1 }
   0x5   : > { %p161_p3 = scmp.lt.s32.totalorder (!%p138_p2), %s1897_s13, 1  ;;  %v2196_v0 = vld [vmem:[%s2496_s1 + $0x4] ss:$8 sps:$4 sm:$0xff] (!%p138_p2)   ;;  %vm1347_vm0 = vcmask (!%p138_p2), 523264   ;;  %v2164_v27 = vmov (!%p138_p2), 0   ;;  %vm1830_vm1 = vcmask (!%p138_p2), 1043456  }
   0x6   : > { %141 = sbr.rel (%p138_p2) target bundleno = 435 (0x1b3), region = 32  ;;  %2099 = vmatprep.mubr.msk.bf16.mxu0 (!%p138_p2), %vm1347_vm0, %v2196_v0  ;;  %2100 = vmatprep.mubr.msk.bf16.mxu1 (!%p138_p2), %vm1347_vm0, %v2196_v0  ;;  %vm1831_vm2 = vcmask (!%p138_p2), 654340  }
   0x7   : > { %2152 = vset.pattern.permute.xlu0 (!%p138_p2), %v2164_v27  ;;  %vm1832_vm3 = vmor (!%p138_p2), %vm1831_vm2, %vm1830_vm1 }
   0xd   : > { %s2500_s13 = smov (!%p161_p3, %s1897_s13), 1 }
   0xe   : > { %s2142_s16 = smul.u32 1536, %s2500_s13  ;;  %s2125_s26 = sshll.u32 %s2500_s13, 7 }
   0xf   : > { %s2448_s29 = scalar_lea.vmem %s2498_s3, %s2125_s26 }
  0x10   : > { %s2208_s19 = scalar_lea.vmem %s2495_s0, %s2142_s16 }
  0x11   : > { %v176_v1 = vld [vmem:[%s2208_s19] sm:$0xff]  ;;  %v177_v3 = vld [vmem:[%s2208_s19 + $0x8] sm:$0xff] }
  0x12   : > { %v184_v2 = vld [vmem:[%s2208_s19 + $0x40] sm:$0xff]  ;;  %v185_v5 = vld [vmem:[%s2208_s19 + $0x48] sm:$0xff] }
  0x13   : > { %v1908_v4 = vcombine.high %v176_v1, %v184_v2  ;;  %v1907_v6 = vcombine.low %v176_v1, %v184_v2  ;;  %v192_v7 = vld [vmem:[%s2208_s19 + $0x80] sm:$0xff]  ;;  %v1910_v9 = vcombine.high %v177_v3, %v185_v5  ;;  %v1909_v10 = vcombine.low %v177_v3, %v185_v5  ;;  %v193_v12 = vld [vmem:[%s2208_s19 + $0x88] sm:$0xff] }
  0x14   : > { %v200_v8 = vld [vmem:[%s2208_s19 + $0xc0] sm:$0xff]  ;;  %v201_v13 = vld [vmem:[%s2208_s19 + $0xc8] sm:$0xff] }
  0x15   : > { %v1924_v11 = vcombine.high %v192_v7, %v200_v8  ;;  %v208_v14 = vld [vmem:[%s2208_s19 + $0x100] sm:$0xff]  ;;  %1351 = vmatprep.subr.bf16.mxu0 %v1908_v4  ;;  %v1926_v15 = vcombine.high %v193_v12, %v201_v13  ;;  %v209_v17 = vld [vmem:[%s2208_s19 + $0x108] sm:$0xff]  ;;  %1394 = vmatprep.subr.bf16.mxu1 %v1910_v9  ;;  %v1923_v19 = vcombine.low %v192_v7, %v200_v8 }
  0x16   : > { %v216_v16 = vld [vmem:[%s2208_s19 + $0x140] sm:$0xff]  ;;  %v217_v18 = vld [vmem:[%s2208_s19 + $0x148] sm:$0xff]  ;;  %1352 = vmatpush1.bf16.msra.mxu0 %v1907_v6  ;;  %1395 = vmatpush1.bf16.msra.mxu1 %v1909_v10  ;;  %v1925_v20 = vcombine.low %v193_v12, %v201_v13 }
  0x17   : > { %1353 = vmatprep.subr.bf16.mxu0 %v1924_v11  ;;  %v1940_v21 = vcombine.high %v208_v14, %v216_v16  ;;  %1396 = vmatprep.subr.bf16.mxu1 %v1926_v15  ;;  %v1942_v22 = vcombine.high %v209_v17, %v217_v18  ;;  %v224_v23 = vld [vmem:[%s2208_s19 + $0x180] sm:$0xff]  ;;  %v225_v25 = vld [vmem:[%s2208_s19 + $0x188] sm:$0xff]  ;;  %v1939_v28 = vcombine.low %v208_v14, %v216_v16 }
  0x18   : > { %v232_v24 = vld [vmem:[%s2208_s19 + $0x1c0] sm:$0xff]  ;;  %v233_v26 = vld [vmem:[%s2208_s19 + $0x1c8] sm:$0xff]  ;;  %v1941_v29 = vcombine.low %v209_v17, %v217_v18 }
  0x19   : > { %v1956_v30 = vcombine.high %v224_v23, %v232_v24  ;;  %v1958_v31 = vcombine.high %v225_v25, %v233_v26  ;;  %v240_v32 = vld [vmem:[%s2208_s19 + $0x200] sm:$0xff]  ;;  %v241_v34 = vld [vmem:[%s2208_s19 + $0x208] sm:$0xff]  ;;  %v1955_v36 = vcombine.low %v224_v23, %v232_v24  ;;  %v1957_v37 = vcombine.low %v225_v25, %v233_v26 }
  0x1a   : > { %1354 = vmatpush1.bf16.msra.mxu0 %v1923_v19  ;;  %1397 = vmatpush1.bf16.msra.mxu1 %v1925_v20  ;;  %v248_v33 = vld [vmem:[%s2208_s19 + $0x240] sm:$0xff]  ;;  %v249_v35 = vld [vmem:[%s2208_s19 + $0x248] sm:$0xff] }
  0x1b   : > { %1355 = vmatprep.subr.bf16.mxu0 %v1940_v21  ;;  %1398 = vmatprep.subr.bf16.mxu1 %v1942_v22  ;;  %v1972_v38 = vcombine.high %v240_v32, %v248_v33  ;;  %v1974_v39 = vcombine.high %v241_v34, %v249_v35  ;;  %v256_v40 = vld [vmem:[%s2208_s19 + $0x280] sm:$0xff]  ;;  %v257_v42 = vld [vmem:[%s2208_s19 + $0x288] sm:$0xff]  ;;  %v1971_v44 = vcombine.low %v240_v32, %v248_v33  ;;  %v178_v33 = vld [vmem:[%s2208_s19 + $0x10] sm:$0xff] }
  0x1c   : > { %v264_v41 = vld [vmem:[%s2208_s19 + $0x2c0] sm:$0xff]  ;;  %v265_v43 = vld [vmem:[%s2208_s19 + $0x2c8] sm:$0xff]  ;;  %v1973_v45 = vcombine.low %v241_v34, %v249_v35  ;;  %v186_v34 = vld [vmem:[%s2208_s19 + $0x50] sm:$0xff] }
  0x1d   : > { %v1988_v46 = vcombine.high %v256_v40, %v264_v41  ;;  %v1990_v47 = vcombine.high %v257_v42, %v265_v43  ;;  %v272_v48 = vld [vmem:[%s2208_s19 + $0x300] sm:$0xff]  ;;  %v273_v50 = vld [vmem:[%s2208_s19 + $0x308] sm:$0xff]  ;;  %v1987_v52 = vcombine.low %v256_v40, %v264_v41  ;;  %v1989_v53 = vcombine.low %v257_v42, %v265_v43  ;;  %v179_v35 = vld [vmem:[%s2208_s19 + $0x18] sm:$0xff] }
  0x1e   : > { %1356 = vmatpush1.bf16.msra.mxu0 %v1939_v28  ;;  %1399 = vmatpush1.bf16.msra.mxu1 %v1941_v29  ;;  %v280_v49 = vld [vmem:[%s2208_s19 + $0x340] sm:$0xff]  ;;  %v281_v51 = vld [vmem:[%s2208_s19 + $0x348] sm:$0xff]  ;;  %v1912_v40 = vcombine.high %v178_v33, %v186_v34  ;;  %v194_v43 = vld [vmem:[%s2208_s19 + $0x90] sm:$0xff] }
  0x1f   : > { %1357 = vmatprep.subr.bf16.mxu0 %v1956_v30  ;;  %1400 = vmatprep.subr.bf16.mxu1 %v1958_v31  ;;  %v2004_v54 = vcombine.high %v272_v48, %v280_v49  ;;  %v2006_v55 = vcombine.high %v273_v50, %v281_v51  ;;  %v288_v56 = vld [vmem:[%s2208_s19 + $0x380] sm:$0xff]  ;;  %v289_v58 = vld [vmem:[%s2208_s19 + $0x388] sm:$0xff]  ;;  %v2003_v60 = vcombine.low %v272_v48, %v280_v49 }
  0x20   : > { %v296_v57 = vld [vmem:[%s2208_s19 + $0x3c0] sm:$0xff]  ;;  %v297_v59 = vld [vmem:[%s2208_s19 + $0x3c8] sm:$0xff]  ;;  %v2005_v61 = vcombine.low %v273_v50, %v281_v51  ;;  %v1911_v48 = vcombine.low %v178_v33, %v186_v34 }
  0x21   : > { %v2020_v62 = vcombine.high %v288_v56, %v296_v57  ;;  %v2022_v63 = vcombine.high %v289_v58, %v297_v59  ;;  %v304_v1 = vld [vmem:[%s2208_s19 + $0x400] sm:$0xff]  ;;  %v305_v3 = vld [vmem:[%s2208_s19 + $0x408] sm:$0xff]  ;;  %v2019_v5 = vcombine.low %v288_v56, %v296_v57  ;;  %v2021_v6 = vcombine.low %v289_v58, %v297_v59 }
  0x22   : > { %1358 = vmatpush1.bf16.msra.mxu0 %v1955_v36  ;;  %1401 = vmatpush1.bf16.msra.mxu1 %v1957_v37  ;;  %v312_v2 = vld [vmem:[%s2208_s19 + $0x440] sm:$0xff]  ;;  %v313_v4 = vld [vmem:[%s2208_s19 + $0x448] sm:$0xff]  ;;  %v187_v36 = vld [vmem:[%s2208_s19 + $0x58] sm:$0xff] }
  0x23   : > { %1359 = vmatprep.subr.bf16.mxu0 %v1972_v38  ;;  %1402 = vmatprep.subr.bf16.mxu1 %v1974_v39  ;;  %v2036_v7 = vcombine.high %v304_v1, %v312_v2  ;;  %v2038_v8 = vcombine.high %v305_v3, %v313_v4  ;;  %v320_v9 = vld [vmem:[%s2208_s19 + $0x480] sm:$0xff]  ;;  %v321_v11 = vld [vmem:[%s2208_s19 + $0x488] sm:$0xff]  ;;  %v2035_v13 = vcombine.low %v304_v1, %v312_v2 }
  0x24   : > { %v328_v10 = vld [vmem:[%s2208_s19 + $0x4c0] sm:$0xff]  ;;  %v329_v12 = vld [vmem:[%s2208_s19 + $0x4c8] sm:$0xff]  ;;  %v2037_v14 = vcombine.low %v305_v3, %v313_v4  ;;  %v1914_v42 = vcombine.high %v179_v35, %v187_v36  ;;  %v1913_v49 = vcombine.low %v179_v35, %v187_v36 }
  0x25   : > { %v2052_v15 = vcombine.high %v320_v9, %v328_v10  ;;  %v2054_v16 = vcombine.high %v321_v11, %v329_v12  ;;  %v336_v17 = vld [vmem:[%s2208_s19 + $0x500] sm:$0xff]  ;;  %v337_v19 = vld [vmem:[%s2208_s19 + $0x508] sm:$0xff]  ;;  %v2051_v21 = vcombine.low %v320_v9, %v328_v10  ;;  %v2053_v22 = vcombine.low %v321_v11, %v329_v12 }
  0x26   : > { %1360 = vmatpush1.bf16.msra.mxu0 %v1971_v44  ;;  %1403 = vmatpush1.bf16.msra.mxu1 %v1973_v45  ;;  %v344_v18 = vld [vmem:[%s2208_s19 + $0x540] sm:$0xff]  ;;  %v345_v20 = vld [vmem:[%s2208_s19 + $0x548] sm:$0xff]  ;;  %v202_v44 = vld [vmem:[%s2208_s19 + $0xd0] sm:$0xff] }
  0x27   : > { %1361 = vmatprep.subr.bf16.mxu0 %v1988_v46  ;;  %1404 = vmatprep.subr.bf16.mxu1 %v1990_v47  ;;  %v2068_v23 = vcombine.high %v336_v17, %v344_v18  ;;  %v2070_v24 = vcombine.high %v337_v19, %v345_v20  ;;  %v352_v25 = vld [vmem:[%s2208_s19 + $0x580] sm:$0xff]  ;;  %v353_v27 = vld [vmem:[%s2208_s19 + $0x588] sm:$0xff]  ;;  %v2067_v29 = vcombine.low %v336_v17, %v344_v18  ;;  %v195_v45 = vld [vmem:[%s2208_s19 + $0x98] sm:$0xff] }
  0x28   : > { %v360_v26 = vld [vmem:[%s2208_s19 + $0x5c0] sm:$0xff]  ;;  %v361_v28 = vld [vmem:[%s2208_s19 + $0x5c8] sm:$0xff]  ;;  %v2069_v30 = vcombine.low %v337_v19, %v345_v20  ;;  %v203_v46 = vld [vmem:[%s2208_s19 + $0xd8] sm:$0xff]  ;;  %v1928_v50 = vcombine.high %v194_v43, %v202_v44  ;;  %v1927_v56 = vcombine.low %v194_v43, %v202_v44 }
  0x29   : > { %v2084_v31 = vcombine.high %v352_v25, %v360_v26  ;;  %v2086_v32 = vcombine.high %v353_v27, %v361_v28  ;;  %v2083_v37 = vcombine.low %v352_v25, %v360_v26  ;;  %v174_v38 = vld [vmem:[%s2497_s2] sm:$0xff]  ;;  %v2085_v39 = vcombine.low %v353_v27, %v361_v28  ;;  %v175_v47 = vld [vmem:[%s2497_s2 + $0x8] sm:$0xff] }
  0x2a   : > { %1362 = vmatpush1.bf16.msra.mxu0 %v1987_v52  ;;  %1405 = vmatpush1.bf16.msra.mxu1 %v1989_v53  ;;  %v2268_v41 = vld [vmem:[%s2496_s1] ss:$8 sps:$4 sm:$0xff]   ;;  %v1930_v51 = vcombine.high %v195_v45, %v203_v46  ;;  %v210_v52 = vld [vmem:[%s2208_s19 + $0x110] sm:$0xff]  ;;  %v1929_v57 = vcombine.low %v195_v45, %v203_v46 }
  0x2b   : > { %1363 = vmatprep.subr.bf16.mxu0 %v2004_v54  ;;  %1406 = vmatprep.subr.bf16.mxu1 %v2006_v55  ;;  %v218_v53 = vld [vmem:[%s2208_s19 + $0x150] sm:$0xff]  ;;  %v211_v54 = vld [vmem:[%s2208_s19 + $0x118] sm:$0xff] }
  0x2c   : > { %370 = vperm.xlu0 %2152, %v174_v38   ;;  %v219_v55 = vld [vmem:[%s2208_s19 + $0x158] sm:$0xff]  ;;  %v1944_v58 = vcombine.high %v210_v52, %v218_v53  ;;  %v1943_v1 = vcombine.low %v210_v52, %v218_v53  ;;  %v314_v38 = vld [vmem:[%s2208_s19 + $0x450] sm:$0xff] }
  0x2d   : > { %v1946_v59 = vcombine.high %v211_v54, %v219_v55  ;;  %v1945_v2 = vcombine.low %v211_v54, %v219_v55  ;;  %v322_v46 = vld [vmem:[%s2208_s19 + $0x490] sm:$0xff] }
  0x2e   : > { %1364 = vmatpush1.bf16.msra.mxu0 %v2003_v60  ;;  %1407 = vmatpush1.bf16.msra.mxu1 %v2005_v61  ;;  %v226_v60 = vld [vmem:[%s2208_s19 + $0x190] sm:$0xff] }
  0x2f   : > { %1365 = vmatprep.subr.bf16.mxu0 %v2020_v62  ;;  %1408 = vmatprep.subr.bf16.mxu1 %v2022_v63  ;;  %v234_v61 = vld [vmem:[%s2208_s19 + $0x1d0] sm:$0xff]  ;;  %v227_v62 = vld [vmem:[%s2208_s19 + $0x198] sm:$0xff] }
  0x30   : > { %375 = vperm.xlu0 %2152, %v175_v47   ;;  %v235_v63 = vld [vmem:[%s2208_s19 + $0x1d8] sm:$0xff]  ;;  %v1960_v3 = vcombine.high %v226_v60, %v234_v61  ;;  %v1959_v9 = vcombine.low %v226_v60, %v234_v61  ;;  %v330_v47 = vld [vmem:[%s2208_s19 + $0x4d0] sm:$0xff] }
  0x31   : > { %v1962_v4 = vcombine.high %v227_v62, %v235_v63  ;;  %v1961_v10 = vcombine.low %v227_v62, %v235_v63  ;;  %v2056_v52 = vcombine.high %v322_v46, %v330_v47  ;;  %v338_v54 = vld [vmem:[%s2208_s19 + $0x510] sm:$0xff] }
  0x32   : > { %1366 = vmatpush1.bf16.msra.mxu0 %v2019_v5  ;;  %1409 = vmatpush1.bf16.msra.mxu1 %v2021_v6  ;;  %v242_v5 = vld [vmem:[%s2208_s19 + $0x210] sm:$0xff] }
  0x33   : > { %1367 = vmatprep.subr.bf16.mxu0 %v2036_v7  ;;  %1410 = vmatprep.subr.bf16.mxu1 %v2038_v8  ;;  %v250_v6 = vld [vmem:[%s2208_s19 + $0x250] sm:$0xff]  ;;  %v243_v7 = vld [vmem:[%s2208_s19 + $0x218] sm:$0xff] }
  0x34   : > { %v251_v8 = vld [vmem:[%s2208_s19 + $0x258] sm:$0xff]  ;;  %v1976_v11 = vcombine.high %v242_v5, %v250_v6  ;;  %v1975_v17 = vcombine.low %v242_v5, %v250_v6  ;;  %v346_v55 = vld [vmem:[%s2208_s19 + $0x550] sm:$0xff] }
  0x35   : > { %v1978_v12 = vcombine.high %v243_v7, %v251_v8  ;;  %v1977_v18 = vcombine.low %v243_v7, %v251_v8  ;;  %v2072_v60 = vcombine.high %v338_v54, %v346_v55  ;;  %v354_v62 = vld [vmem:[%s2208_s19 + $0x590] sm:$0xff]  ;;  %v180_v7 = vld [vmem:[%s2208_s19 + $0x20] sm:$0xff] }
  0x36   : > { %1368 = vmatpush1.bf16.msra.mxu0 %v2035_v13  ;;  %1411 = vmatpush1.bf16.msra.mxu1 %v2037_v14  ;;  %v258_v13 = vld [vmem:[%s2208_s19 + $0x290] sm:$0xff]  ;;  %v188_v8 = vld [vmem:[%s2208_s19 + $0x60] sm:$0xff] }
  0x37   : > { %1369 = vmatprep.subr.bf16.mxu0 %v2052_v15  ;;  %1412 = vmatprep.subr.bf16.mxu1 %v2054_v16  ;;  %v266_v14 = vld [vmem:[%s2208_s19 + $0x2d0] sm:$0xff]  ;;  %v259_v15 = vld [vmem:[%s2208_s19 + $0x298] sm:$0xff] }
  0x38   : > { %v267_v16 = vld [vmem:[%s2208_s19 + $0x2d8] sm:$0xff]  ;;  %v1992_v19 = vcombine.high %v258_v13, %v266_v14  ;;  %v1991_v25 = vcombine.low %v258_v13, %v266_v14  ;;  %v362_v63 = vld [vmem:[%s2208_s19 + $0x5d0] sm:$0xff]  ;;  %v1916_v13 = vcombine.high %v180_v7, %v188_v8 }
  0x39   : > { %v1994_v20 = vcombine.high %v259_v15, %v267_v16  ;;  %v1993_v26 = vcombine.low %v259_v15, %v267_v16  ;;  %v2088_v5 = vcombine.high %v354_v62, %v362_v63  ;;  %v196_v15 = vld [vmem:[%s2208_s19 + $0xa0] sm:$0xff] }
  0x3a   : > { %1370 = vmatpush1.bf16.msra.mxu0 %v2051_v21  ;;  %1413 = vmatpush1.bf16.msra.mxu1 %v2053_v22  ;;  %v274_v21 = vld [vmem:[%s2208_s19 + $0x310] sm:$0xff]  ;;  %v204_v16 = vld [vmem:[%s2208_s19 + $0xe0] sm:$0xff] }
  0x3b   : > { %1371 = vmatprep.subr.bf16.mxu0 %v2068_v23  ;;  %1414 = vmatprep.subr.bf16.mxu1 %v2070_v24  ;;  %v282_v22 = vld [vmem:[%s2208_s19 + $0x350] sm:$0xff]  ;;  %v275_v23 = vld [vmem:[%s2208_s19 + $0x318] sm:$0xff] }
  0x3c   : > { %v283_v24 = vld [vmem:[%s2208_s19 + $0x358] sm:$0xff]  ;;  %v2008_v27 = vcombine.high %v274_v21, %v282_v22  ;;  %v2007_v33 = vcombine.low %v274_v21, %v282_v22  ;;  %v1932_v21 = vcombine.high %v196_v15, %v204_v16 }
  0x3d   : > { %v2010_v28 = vcombine.high %v275_v23, %v283_v24  ;;  %v2009_v34 = vcombine.low %v275_v23, %v283_v24  ;;  %v212_v23 = vld [vmem:[%s2208_s19 + $0x120] sm:$0xff] }
  0x3e   : > { %1372 = vmatpush1.bf16.msra.mxu0 %v2067_v29  ;;  %1415 = vmatpush1.bf16.msra.mxu1 %v2069_v30  ;;  %v290_v29 = vld [vmem:[%s2208_s19 + $0x390] sm:$0xff]  ;;  %v220_v24 = vld [vmem:[%s2208_s19 + $0x160] sm:$0xff] }
  0x3f   : > { %1373 = vmatprep.subr.bf16.mxu0 %v2084_v31  ;;  %1416 = vmatprep.subr.bf16.mxu1 %v2086_v32  ;;  %v298_v30 = vld [vmem:[%s2208_s19 + $0x3d0] sm:$0xff]  ;;  %v291_v31 = vld [vmem:[%s2208_s19 + $0x398] sm:$0xff] }
  0x40   : > { %v299_v32 = vld [vmem:[%s2208_s19 + $0x3d8] sm:$0xff]  ;;  %v2024_v35 = vcombine.high %v290_v29, %v298_v30 }
  0x41   : > { %v2026_v36 = vcombine.high %v291_v31, %v299_v32  ;;  %v2025_v43 = vcombine.low %v291_v31, %v299_v32  ;;  %v228_v31 = vld [vmem:[%s2208_s19 + $0x1a0] sm:$0xff] }
  0x42   : > { %1374 = vmatpush1.bf16.msra.mxu0 %v2083_v37  ;;  %1417 = vmatpush1.bf16.msra.mxu1 %v2085_v39  ;;  %v306_v37 = vld [vmem:[%s2208_s19 + $0x410] sm:$0xff]  ;;  %v307_v39 = vld [vmem:[%s2208_s19 + $0x418] sm:$0xff]  ;;  %v236_v32 = vld [vmem:[%s2208_s19 + $0x1e0] sm:$0xff] }
  0x43   : > { %1437 = vmatprep.subr.bf16.mxu0 %v1912_v40  ;;  %1480 = vmatprep.subr.bf16.mxu1 %v1914_v42  ;;  %v315_v40 = vld [vmem:[%s2208_s19 + $0x458] sm:$0xff]  ;;  %v2023_v42 = vcombine.low %v290_v29, %v298_v30  ;;  %v2040_v44 = vcombine.high %v306_v37, %v314_v38  ;;  %v1948_v29 = vcombine.high %v212_v23, %v220_v24 }
  0x44   : > { %v2042_v45 = vcombine.high %v307_v39, %v315_v40 }
  0x45   : > { %1384 = vmatmul.mubr.bf16.vlgmr.msra.gmra.mrb[0].mxu0 %v2268_v41  ;;  %1427 = vmatmul.mubr.bf16.vlgmr.msra.gmra.mrb[0].mxu1 %v2268_v41 }
  0x46   : > { %1438 = vmatpush1.bf16.msra.mxu0 %v1911_v48  ;;  %1481 = vmatpush1.bf16.msra.mxu1 %v1913_v49  ;;  %v323_v48 = vld [vmem:[%s2208_s19 + $0x498] sm:$0xff] }
  0x47   : > { %1439 = vmatprep.subr.bf16.mxu0 %v1928_v50  ;;  %1482 = vmatprep.subr.bf16.mxu1 %v1930_v51  ;;  %v331_v49 = vld [vmem:[%s2208_s19 + $0x4d8] sm:$0xff]  ;;  %v2039_v50 = vcombine.low %v306_v37, %v314_v38  ;;  %v2041_v51 = vcombine.low %v307_v39, %v315_v40  ;;  %v1964_v37 = vcombine.high %v228_v31, %v236_v32  ;;  %v244_v39 = vld [vmem:[%s2208_s19 + $0x220] sm:$0xff] }
  0x48   : > { %2101 = vmatprep.mubr.msk.bf16.mxu0 %vm1347_vm0, %v2196_v0  ;;  %2102 = vmatprep.mubr.msk.bf16.mxu1 %vm1347_vm0, %v2196_v0  ;;  %v2058_v53 = vcombine.high %v323_v48, %v331_v49  ;;  %v252_v40 = vld [vmem:[%s2208_s19 + $0x260] sm:$0xff] }
  0x4a   : > { %1440 = vmatpush1.bf16.msra.mxu0 %v1927_v56  ;;  %1483 = vmatpush1.bf16.msra.mxu1 %v1929_v57  ;;  %v339_v56 = vld [vmem:[%s2208_s19 + $0x518] sm:$0xff] }
  0x4b   : > { %1441 = vmatprep.subr.bf16.mxu0 %v1944_v58  ;;  %1484 = vmatprep.subr.bf16.mxu1 %v1946_v59  ;;  %v347_v57 = vld [vmem:[%s2208_s19 + $0x558] sm:$0xff]  ;;  %v2055_v58 = vcombine.low %v322_v46, %v330_v47  ;;  %v2057_v59 = vcombine.low %v323_v48, %v331_v49  ;;  %v1980_v46 = vcombine.high %v244_v39, %v252_v40  ;;  %v260_v48 = vld [vmem:[%s2208_s19 + $0x2a0] sm:$0xff] }
  0x4c   : > { %v2074_v61 = vcombine.high %v339_v56, %v347_v57  ;;  %v268_v49 = vld [vmem:[%s2208_s19 + $0x2e0] sm:$0xff] }
  0x4e   : > { %1442 = vmatpush1.bf16.msra.mxu0 %v1943_v1  ;;  %1485 = vmatpush1.bf16.msra.mxu1 %v1945_v2  ;;  %v355_v1 = vld [vmem:[%s2208_s19 + $0x598] sm:$0xff] }
  0x4f   : > { %1443 = vmatprep.subr.bf16.mxu0 %v1960_v3  ;;  %1486 = vmatprep.subr.bf16.mxu1 %v1962_v4  ;;  %v363_v2 = vld [vmem:[%s2208_s19 + $0x5d8] sm:$0xff]  ;;  %v2071_v3 = vcombine.low %v338_v54, %v346_v55  ;;  %v2073_v4 = vcombine.low %v339_v56, %v347_v57  ;;  %v1996_v54 = vcombine.high %v260_v48, %v268_v49  ;;  %v276_v56 = vld [vmem:[%s2208_s19 + $0x320] sm:$0xff] }
  0x50   : > { %v2090_v6 = vcombine.high %v355_v1, %v363_v2  ;;  %v284_v57 = vld [vmem:[%s2208_s19 + $0x360] sm:$0xff] }
  0x52   : > { %1444 = vmatpush1.bf16.msra.mxu0 %v1959_v9  ;;  %1487 = vmatpush1.bf16.msra.mxu1 %v1961_v10  ;;  %v181_v9 = vld [vmem:[%s2208_s19 + $0x28] sm:$0xff] }
  0x53   : > { %1445 = vmatprep.subr.bf16.mxu0 %v1976_v11  ;;  %1488 = vmatprep.subr.bf16.mxu1 %v1978_v12  ;;  %v189_v10 = vld [vmem:[%s2208_s19 + $0x68] sm:$0xff]  ;;  %v2087_v11 = vcombine.low %v354_v62, %v362_v63  ;;  %v2089_v12 = vcombine.low %v355_v1, %v363_v2  ;;  %v2012_v62 = vcombine.high %v276_v56, %v284_v57  ;;  %v292_v1 = vld [vmem:[%s2208_s19 + $0x3a0] sm:$0xff] }
  0x54   : > { %v1918_v14 = vcombine.high %v181_v9, %v189_v10  ;;  %v300_v2 = vld [vmem:[%s2208_s19 + $0x3e0] sm:$0xff] }
  0x56   : > { %1446 = vmatpush1.bf16.msra.mxu0 %v1975_v17  ;;  %1489 = vmatpush1.bf16.msra.mxu1 %v1977_v18  ;;  %v197_v17 = vld [vmem:[%s2208_s19 + $0xa8] sm:$0xff] }
  0x57   : > { %1447 = vmatprep.subr.bf16.mxu0 %v1992_v19  ;;  %1490 = vmatprep.subr.bf16.mxu1 %v1994_v20  ;;  %v205_v18 = vld [vmem:[%s2208_s19 + $0xe8] sm:$0xff]  ;;  %v1915_v19 = vcombine.low %v180_v7, %v188_v8  ;;  %v1917_v20 = vcombine.low %v181_v9, %v189_v10  ;;  %v2028_v7 = vcombine.high %v292_v1, %v300_v2  ;;  %v308_v9 = vld [vmem:[%s2208_s19 + $0x420] sm:$0xff] }
  0x58   : > { %v1934_v22 = vcombine.high %v197_v17, %v205_v18  ;;  %v316_v10 = vld [vmem:[%s2208_s19 + $0x460] sm:$0xff] }
  0x5a   : > { %1448 = vmatpush1.bf16.msra.mxu0 %v1991_v25  ;;  %1491 = vmatpush1.bf16.msra.mxu1 %v1993_v26  ;;  %v213_v25 = vld [vmem:[%s2208_s19 + $0x128] sm:$0xff] }
  0x5b   : > { %1449 = vmatprep.subr.bf16.mxu0 %v2008_v27  ;;  %1492 = vmatprep.subr.bf16.mxu1 %v2010_v28  ;;  %v221_v26 = vld [vmem:[%s2208_s19 + $0x168] sm:$0xff]  ;;  %v1931_v27 = vcombine.low %v196_v15, %v204_v16  ;;  %v1933_v28 = vcombine.low %v197_v17, %v205_v18  ;;  %v2044_v15 = vcombine.high %v308_v9, %v316_v10  ;;  %v324_v17 = vld [vmem:[%s2208_s19 + $0x4a0] sm:$0xff] }
  0x5c   : > { %v1950_v30 = vcombine.high %v213_v25, %v221_v26  ;;  %v332_v18 = vld [vmem:[%s2208_s19 + $0x4e0] sm:$0xff] }
  0x5e   : > { %1450 = vmatpush1.bf16.msra.mxu0 %v2007_v33  ;;  %1493 = vmatpush1.bf16.msra.mxu1 %v2009_v34  ;;  %v229_v33 = vld [vmem:[%s2208_s19 + $0x1a8] sm:$0xff] }
  0x5f   : > { %1451 = vmatprep.subr.bf16.mxu0 %v2024_v35  ;;  %1494 = vmatprep.subr.bf16.mxu1 %v2026_v36  ;;  %v237_v34 = vld [vmem:[%s2208_s19 + $0x1e8] sm:$0xff]  ;;  %v1947_v35 = vcombine.low %v212_v23, %v220_v24  ;;  %v1949_v36 = vcombine.low %v213_v25, %v221_v26  ;;  %v2060_v23 = vcombine.high %v324_v17, %v332_v18  ;;  %v340_v25 = vld [vmem:[%s2208_s19 + $0x520] sm:$0xff] }
  0x60   : > { %v1966_v38 = vcombine.high %v229_v33, %v237_v34  ;;  %v348_v26 = vld [vmem:[%s2208_s19 + $0x560] sm:$0xff] }
  0x62   : > { %1452 = vmatpush1.bf16.msra.mxu0 %v2023_v42  ;;  %1495 = vmatpush1.bf16.msra.mxu1 %v2025_v43  ;;  %v245_v42 = vld [vmem:[%s2208_s19 + $0x228] sm:$0xff] }
  0x63   : > { %1453 = vmatprep.subr.bf16.mxu0 %v2040_v44  ;;  %1496 = vmatprep.subr.bf16.mxu1 %v2042_v45  ;;  %v253_v43 = vld [vmem:[%s2208_s19 + $0x268] sm:$0xff]  ;;  %v1963_v44 = vcombine.low %v228_v31, %v236_v32  ;;  %v1965_v45 = vcombine.low %v229_v33, %v237_v34  ;;  %v2076_v31 = vcombine.high %v340_v25, %v348_v26  ;;  %v356_v33 = vld [vmem:[%s2208_s19 + $0x5a0] sm:$0xff] }
  0x64   : > { %v1982_v47 = vcombine.high %v245_v42, %v253_v43  ;;  %v364_v34 = vld [vmem:[%s2208_s19 + $0x5e0] sm:$0xff] }
  0x66   : > { %1454 = vmatpush1.bf16.msra.mxu0 %v2039_v50  ;;  %1497 = vmatpush1.bf16.msra.mxu1 %v2041_v51  ;;  %v261_v50 = vld [vmem:[%s2208_s19 + $0x2a8] sm:$0xff] }
  0x67   : > { %1455 = vmatprep.subr.bf16.mxu0 %v2056_v52  ;;  %1498 = vmatprep.subr.bf16.mxu1 %v2058_v53  ;;  %v269_v51 = vld [vmem:[%s2208_s19 + $0x2e8] sm:$0xff]  ;;  %v1979_v52 = vcombine.low %v244_v39, %v252_v40  ;;  %v1981_v53 = vcombine.low %v245_v42, %v253_v43  ;;  %v2092_v39 = vcombine.high %v356_v33, %v364_v34  ;;  %v182_v42 = vld [vmem:[%s2208_s19 + $0x30] sm:$0xff] }
  0x68   : > { %v1998_v55 = vcombine.high %v261_v50, %v269_v51  ;;  %v190_v43 = vld [vmem:[%s2208_s19 + $0x70] sm:$0xff] }
  0x6a   : > { %1456 = vmatpush1.bf16.msra.mxu0 %v2055_v58  ;;  %1499 = vmatpush1.bf16.msra.mxu1 %v2057_v59  ;;  %v277_v58 = vld [vmem:[%s2208_s19 + $0x328] sm:$0xff] }
  0x6b   : > { %1457 = vmatprep.subr.bf16.mxu0 %v2072_v60  ;;  %1500 = vmatprep.subr.bf16.mxu1 %v2074_v61  ;;  %v285_v59 = vld [vmem:[%s2208_s19 + $0x368] sm:$0xff]  ;;  %v1995_v60 = vcombine.low %v260_v48, %v268_v49  ;;  %v1997_v61 = vcombine.low %v261_v50, %v269_v51  ;;  %v1920_v48 = vcombine.high %v182_v42, %v190_v43  ;;  %v198_v50 = vld [vmem:[%s2208_s19 + $0xb0] sm:$0xff] }
  0x6c   : > { %v2014_v63 = vcombine.high %v277_v58, %v285_v59  ;;  %v206_v51 = vld [vmem:[%s2208_s19 + $0xf0] sm:$0xff] }
  0x6e   : > { %1458 = vmatpush1.bf16.msra.mxu0 %v2071_v3  ;;  %1501 = vmatpush1.bf16.msra.mxu1 %v2073_v4  ;;  %v293_v3 = vld [vmem:[%s2208_s19 + $0x3a8] sm:$0xff] }
  0x6f   : > { %1459 = vmatprep.subr.bf16.mxu0 %v2088_v5  ;;  %1502 = vmatprep.subr.bf16.mxu1 %v2090_v6  ;;  %v301_v4 = vld [vmem:[%s2208_s19 + $0x3e8] sm:$0xff]  ;;  %v2011_v5 = vcombine.low %v276_v56, %v284_v57  ;;  %v2013_v6 = vcombine.low %v277_v58, %v285_v59  ;;  %v1936_v56 = vcombine.high %v198_v50, %v206_v51  ;;  %v214_v58 = vld [vmem:[%s2208_s19 + $0x130] sm:$0xff] }
  0x70   : > { %v2030_v8 = vcombine.high %v293_v3, %v301_v4  ;;  %v222_v59 = vld [vmem:[%s2208_s19 + $0x170] sm:$0xff] }
  0x72   : > { %1460 = vmatpush1.bf16.msra.mxu0 %v2087_v11  ;;  %1503 = vmatpush1.bf16.msra.mxu1 %v2089_v12  ;;  %v309_v11 = vld [vmem:[%s2208_s19 + $0x428] sm:$0xff] }
  0x73   : > { %1523 = vmatprep.subr.bf16.mxu0 %v1916_v13  ;;  %1566 = vmatprep.subr.bf16.mxu1 %v1918_v14  ;;  %v317_v12 = vld [vmem:[%s2208_s19 + $0x468] sm:$0xff]  ;;  %v2027_v13 = vcombine.low %v292_v1, %v300_v2  ;;  %v2029_v14 = vcombine.low %v293_v3, %v301_v4  ;;  %v1952_v1 = vcombine.high %v214_v58, %v222_v59  ;;  %v230_v3 = vld [vmem:[%s2208_s19 + $0x1b0] sm:$0xff] }
  0x74   : > { %v2046_v16 = vcombine.high %v309_v11, %v317_v12  ;;  %v238_v4 = vld [vmem:[%s2208_s19 + $0x1f0] sm:$0xff] }
  0x75   : > { %1470 = vmatmul.mubr.bf16.vlgmr.msra.gmra.mrb[4].mxu0 %v2268_v41  ;;  %1513 = vmatmul.mubr.bf16.vlgmr.msra.gmra.mrb[4].mxu1 %v2268_v41 }
  0x76   : > { %1524 = vmatpush1.bf16.msra.mxu0 %v1915_v19  ;;  %1567 = vmatpush1.bf16.msra.mxu1 %v1917_v20  ;;  %v325_v19 = vld [vmem:[%s2208_s19 + $0x4a8] sm:$0xff] }
  0x77   : > { %1525 = vmatprep.subr.bf16.mxu0 %v1932_v21  ;;  %1568 = vmatprep.subr.bf16.mxu1 %v1934_v22  ;;  %v333_v20 = vld [vmem:[%s2208_s19 + $0x4e8] sm:$0xff]  ;;  %v2043_v21 = vcombine.low %v308_v9, %v316_v10  ;;  %v2045_v22 = vcombine.low %v309_v11, %v317_v12  ;;  %v1968_v9 = vcombine.high %v230_v3, %v238_v4  ;;  %v246_v11 = vld [vmem:[%s2208_s19 + $0x230] sm:$0xff] }
  0x78   : > { %2103 = vmatprep.mubr.msk.bf16.mxu0 %vm1347_vm0, %v2196_v0  ;;  %2104 = vmatprep.mubr.msk.bf16.mxu1 %vm1347_vm0, %v2196_v0  ;;  %v2062_v24 = vcombine.high %v325_v19, %v333_v20  ;;  %v254_v12 = vld [vmem:[%s2208_s19 + $0x270] sm:$0xff] }
  0x7a   : > { %1526 = vmatpush1.bf16.msra.mxu0 %v1931_v27  ;;  %1569 = vmatpush1.bf16.msra.mxu1 %v1933_v28  ;;  %v341_v27 = vld [vmem:[%s2208_s19 + $0x528] sm:$0xff] }
  0x7b   : > { %1527 = vmatprep.subr.bf16.mxu0 %v1948_v29  ;;  %1570 = vmatprep.subr.bf16.mxu1 %v1950_v30  ;;  %v349_v28 = vld [vmem:[%s2208_s19 + $0x568] sm:$0xff]  ;;  %v2059_v29 = vcombine.low %v324_v17, %v332_v18  ;;  %v2061_v30 = vcombine.low %v325_v19, %v333_v20  ;;  %v262_v18 = vld [vmem:[%s2208_s19 + $0x2b0] sm:$0xff]  ;;  %v263_v20 = vld [vmem:[%s2208_s19 + $0x2b8] sm:$0xff] }
  0x7c   : > { %v2078_v32 = vcombine.high %v341_v27, %v349_v28  ;;  %v270_v19 = vld [vmem:[%s2208_s19 + $0x2f0] sm:$0xff] }
  0x7e   : > { %1528 = vmatpush1.bf16.msra.mxu0 %v1947_v35  ;;  %1571 = vmatpush1.bf16.msra.mxu1 %v1949_v36  ;;  %v357_v35 = vld [vmem:[%s2208_s19 + $0x5a8] sm:$0xff] }
  0x7f   : > { %1529 = vmatprep.subr.bf16.mxu0 %v1964_v37  ;;  %1572 = vmatprep.subr.bf16.mxu1 %v1966_v38  ;;  %v365_v36 = vld [vmem:[%s2208_s19 + $0x5e8] sm:$0xff]  ;;  %v2075_v37 = vcombine.low %v340_v25, %v348_v26  ;;  %v2077_v38 = vcombine.low %v341_v27, %v349_v28  ;;  %v278_v26 = vld [vmem:[%s2208_s19 + $0x330] sm:$0xff]  ;;  %v279_v28 = vld [vmem:[%s2208_s19 + $0x338] sm:$0xff] }
  0x80   : > { %v2094_v40 = vcombine.high %v357_v35, %v365_v36  ;;  %v286_v27 = vld [vmem:[%s2208_s19 + $0x370] sm:$0xff] }
  0x82   : > { %1530 = vmatpush1.bf16.msra.mxu0 %v1963_v44  ;;  %1573 = vmatpush1.bf16.msra.mxu1 %v1965_v45  ;;  %v183_v44 = vld [vmem:[%s2208_s19 + $0x38] sm:$0xff] }
  0x83   : > { %1531 = vmatprep.subr.bf16.mxu0 %v1980_v46  ;;  %1574 = vmatprep.subr.bf16.mxu1 %v1982_v47  ;;  %v191_v45 = vld [vmem:[%s2208_s19 + $0x78] sm:$0xff]  ;;  %v2091_v46 = vcombine.low %v356_v33, %v364_v34  ;;  %v2093_v47 = vcombine.low %v357_v35, %v365_v36  ;;  %v294_v34 = vld [vmem:[%s2208_s19 + $0x3b0] sm:$0xff] }
  0x84   : > { %v1922_v49 = vcombine.high %v183_v44, %v191_v45  ;;  %v302_v35 = vld [vmem:[%s2208_s19 + $0x3f0] sm:$0xff]  ;;  %v295_v36 = vld [vmem:[%s2208_s19 + $0x3b8] sm:$0xff] }
  0x86   : > { %1532 = vmatpush1.bf16.msra.mxu0 %v1979_v52  ;;  %1575 = vmatpush1.bf16.msra.mxu1 %v1981_v53  ;;  %v199_v52 = vld [vmem:[%s2208_s19 + $0xb8] sm:$0xff] }
  0x87   : > { %1533 = vmatprep.subr.bf16.mxu0 %v1996_v54  ;;  %1576 = vmatprep.subr.bf16.mxu1 %v1998_v55  ;;  %v207_v53 = vld [vmem:[%s2208_s19 + $0xf8] sm:$0xff]  ;;  %v1919_v54 = vcombine.low %v182_v42, %v190_v43  ;;  %v1921_v55 = vcombine.low %v183_v44, %v191_v45  ;;  %v310_v43 = vld [vmem:[%s2208_s19 + $0x430] sm:$0xff] }
  0x88   : > { %v1938_v57 = vcombine.high %v199_v52, %v207_v53  ;;  %v318_v44 = vld [vmem:[%s2208_s19 + $0x470] sm:$0xff]  ;;  %v311_v45 = vld [vmem:[%s2208_s19 + $0x438] sm:$0xff] }
  0x8a   : > { %1534 = vmatpush1.bf16.msra.mxu0 %v1995_v60  ;;  %1577 = vmatpush1.bf16.msra.mxu1 %v1997_v61  ;;  %v215_v60 = vld [vmem:[%s2208_s19 + $0x138] sm:$0xff] }
  0x8b   : > { %1535 = vmatprep.subr.bf16.mxu0 %v2012_v62  ;;  %1578 = vmatprep.subr.bf16.mxu1 %v2014_v63  ;;  %v223_v61 = vld [vmem:[%s2208_s19 + $0x178] sm:$0xff]  ;;  %v1935_v62 = vcombine.low %v198_v50, %v206_v51  ;;  %v1937_v63 = vcombine.low %v199_v52, %v207_v53  ;;  %v326_v51 = vld [vmem:[%s2208_s19 + $0x4b0] sm:$0xff] }
  0x8c   : > { %v1954_v2 = vcombine.high %v215_v60, %v223_v61  ;;  %v334_v52 = vld [vmem:[%s2208_s19 + $0x4f0] sm:$0xff]  ;;  %v327_v53 = vld [vmem:[%s2208_s19 + $0x4b8] sm:$0xff] }
  0x8e   : > { %1536 = vmatpush1.bf16.msra.mxu0 %v2011_v5  ;;  %1579 = vmatpush1.bf16.msra.mxu1 %v2013_v6  ;;  %v231_v5 = vld [vmem:[%s2208_s19 + $0x1b8] sm:$0xff] }
  0x8f   : > { %1537 = vmatprep.subr.bf16.mxu0 %v2028_v7  ;;  %1580 = vmatprep.subr.bf16.mxu1 %v2030_v8  ;;  %v239_v6 = vld [vmem:[%s2208_s19 + $0x1f8] sm:$0xff]  ;;  %v1951_v7 = vcombine.low %v214_v58, %v222_v59  ;;  %v1953_v8 = vcombine.low %v215_v60, %v223_v61  ;;  %v342_v59 = vld [vmem:[%s2208_s19 + $0x530] sm:$0xff] }
  0x90   : > { %v1970_v10 = vcombine.high %v231_v5, %v239_v6  ;;  %v350_v60 = vld [vmem:[%s2208_s19 + $0x570] sm:$0xff]  ;;  %v343_v61 = vld [vmem:[%s2208_s19 + $0x538] sm:$0xff] }
  0x92   : > { %1538 = vmatpush1.bf16.msra.mxu0 %v2027_v13  ;;  %1581 = vmatpush1.bf16.msra.mxu1 %v2029_v14  ;;  %v247_v13 = vld [vmem:[%s2208_s19 + $0x238] sm:$0xff] }
  0x93   : > { %1539 = vmatprep.subr.bf16.mxu0 %v2044_v15  ;;  %1582 = vmatprep.subr.bf16.mxu1 %v2046_v16  ;;  %v255_v14 = vld [vmem:[%s2208_s19 + $0x278] sm:$0xff]  ;;  %v1967_v15 = vcombine.low %v230_v3, %v238_v4  ;;  %v1984_v16 = vcombine.high %v246_v11, %v254_v12  ;;  %v358_v4 = vld [vmem:[%s2208_s19 + $0x5b0] sm:$0xff] }
  0x94   : > { %v1986_v17 = vcombine.high %v247_v13, %v255_v14 }
  0x96   : > { %1540 = vmatpush1.bf16.msra.mxu0 %v2043_v21  ;;  %1583 = vmatpush1.bf16.msra.mxu1 %v2045_v22  ;;  %v271_v21 = vld [vmem:[%s2208_s19 + $0x2f8] sm:$0xff]  ;;  %v1983_v22 = vcombine.low %v246_v11, %v254_v12 }
  0x97   : > { %1541 = vmatprep.subr.bf16.mxu0 %v2060_v23  ;;  %1584 = vmatprep.subr.bf16.mxu1 %v2062_v24  ;;  %v1985_v23 = vcombine.low %v247_v13, %v255_v14  ;;  %v2000_v24 = vcombine.high %v262_v18, %v270_v19  ;;  %v2002_v25 = vcombine.high %v263_v20, %v271_v21 }
  0x9a   : > { %1542 = vmatpush1.bf16.msra.mxu0 %v2059_v29  ;;  %1585 = vmatpush1.bf16.msra.mxu1 %v2061_v30  ;;  %v287_v29 = vld [vmem:[%s2208_s19 + $0x378] sm:$0xff]  ;;  %v1999_v30 = vcombine.low %v262_v18, %v270_v19 }
  0x9b   : > { %1543 = vmatprep.subr.bf16.mxu0 %v2076_v31  ;;  %1586 = vmatprep.subr.bf16.mxu1 %v2078_v32  ;;  %v2001_v31 = vcombine.low %v263_v20, %v271_v21  ;;  %v2016_v32 = vcombine.high %v278_v26, %v286_v27  ;;  %v2018_v33 = vcombine.high %v279_v28, %v287_v29 }
  0x9e   : > { %1544 = vmatpush1.bf16.msra.mxu0 %v2075_v37  ;;  %1587 = vmatpush1.bf16.msra.mxu1 %v2077_v38  ;;  %v303_v37 = vld [vmem:[%s2208_s19 + $0x3f8] sm:$0xff]  ;;  %v2015_v38 = vcombine.low %v278_v26, %v286_v27 }
  0x9f   : > { %1545 = vmatprep.subr.bf16.mxu0 %v2092_v39  ;;  %1588 = vmatprep.subr.bf16.mxu1 %v2094_v40  ;;  %v2017_v39 = vcombine.low %v279_v28, %v287_v29  ;;  %v2032_v40 = vcombine.high %v294_v34, %v302_v35  ;;  %v2034_v42 = vcombine.high %v295_v36, %v303_v37 }
  0xa2   : > { %1546 = vmatpush1.bf16.msra.mxu0 %v2091_v46  ;;  %1589 = vmatpush1.bf16.msra.mxu1 %v2093_v47  ;;  %v319_v46 = vld [vmem:[%s2208_s19 + $0x478] sm:$0xff]  ;;  %v2031_v47 = vcombine.low %v294_v34, %v302_v35 }
  0xa3   : > { %1609 = vmatprep.subr.bf16.mxu0 %v1920_v48  ;;  %1652 = vmatprep.subr.bf16.mxu1 %v1922_v49  ;;  %v2033_v48 = vcombine.low %v295_v36, %v303_v37  ;;  %v2048_v49 = vcombine.high %v310_v43, %v318_v44  ;;  %v2050_v50 = vcombine.high %v311_v45, %v319_v46 }
  0xa5   : > { %1556 = vmatmul.mubr.bf16.vlgmr.msra.gmra.mrb[8].mxu0 %v2268_v41  ;;  %1599 = vmatmul.mubr.bf16.vlgmr.msra.gmra.mrb[8].mxu1 %v2268_v41 }
  0xa6   : > { %1610 = vmatpush1.bf16.msra.mxu0 %v1919_v54  ;;  %1653 = vmatpush1.bf16.msra.mxu1 %v1921_v55  ;;  %v335_v54 = vld [vmem:[%s2208_s19 + $0x4f8] sm:$0xff]  ;;  %v2047_v55 = vcombine.low %v310_v43, %v318_v44 }
  0xa7   : > { %1611 = vmatprep.subr.bf16.mxu0 %v1936_v56  ;;  %1654 = vmatprep.subr.bf16.mxu1 %v1938_v57  ;;  %v2049_v56 = vcombine.low %v311_v45, %v319_v46  ;;  %v2064_v57 = vcombine.high %v326_v51, %v334_v52  ;;  %v2066_v58 = vcombine.high %v327_v53, %v335_v54 }
  0xa8   : > { %2105 = vmatprep.mubr.msk.bf16.mxu0 %vm1347_vm0, %v2196_v0  ;;  %2106 = vmatprep.mubr.msk.bf16.mxu1 %vm1347_vm0, %v2196_v0  ;;  %v1969_v0 = vcombine.low %v231_v5, %v239_v6  ;;  %v366_v5 = vld [vmem:[%s2208_s19 + $0x5f0] sm:$0xff]  ;;  %v359_v6 = vld [vmem:[%s2208_s19 + $0x5b8] sm:$0xff] }
  0xa9   : > { %v2095_v12 = vcombine.low %v358_v4, %v366_v5 }
  0xaa   : > { %1612 = vmatpush1.bf16.msra.mxu0 %v1935_v62  ;;  %1655 = vmatpush1.bf16.msra.mxu1 %v1937_v63  ;;  %v351_v62 = vld [vmem:[%s2208_s19 + $0x578] sm:$0xff]  ;;  %v2063_v63 = vcombine.low %v326_v51, %v334_v52 }
  0xab   : > { %1613 = vmatprep.subr.bf16.mxu0 %v1952_v1  ;;  %1656 = vmatprep.subr.bf16.mxu1 %v1954_v2  ;;  %v2065_v1 = vcombine.low %v327_v53, %v335_v54  ;;  %v2080_v2 = vcombine.high %v342_v59, %v350_v60  ;;  %v2082_v3 = vcombine.high %v343_v61, %v351_v62  ;;  %v2433_v14 = vpop.permute.xlu0 %370 }
  0xae   : > { %1614 = vmatpush1.bf16.msra.mxu0 %v1951_v7  ;;  %1657 = vmatpush1.bf16.msra.mxu1 %v1953_v8  ;;  %v367_v7 = vld [vmem:[%s2208_s19 + $0x5f8] sm:$0xff]  ;;  %v2079_v8 = vcombine.low %v342_v59, %v350_v60 }
  0xaf   : > { %1615 = vmatprep.subr.bf16.mxu0 %v1968_v9  ;;  %1658 = vmatprep.subr.bf16.mxu1 %v1970_v10  ;;  %v2081_v9 = vcombine.low %v343_v61, %v351_v62  ;;  %v2096_v10 = vcombine.high %v358_v4, %v366_v5  ;;  %v2098_v11 = vcombine.high %v359_v6, %v367_v7 }
  0xb0   : > { %v2097_v13 = vcombine.low %v359_v6, %v367_v7 }
  0xb2   : > { %1616 = vmatpush1.bf16.msra.mxu0 %v1967_v15  ;;  %1659 = vmatpush1.bf16.msra.mxu1 %v1969_v0  ;;  %v2435_v0 = vpop.permute.xlu0 %375 }
  0xb3   : > { %1617 = vmatprep.subr.bf16.mxu0 %v1984_v16  ;;  %1660 = vmatprep.subr.bf16.mxu1 %v1986_v17 }
  0xb6   : > { %1618 = vmatpush1.bf16.msra.mxu0 %v1983_v22  ;;  %1661 = vmatpush1.bf16.msra.mxu1 %v1985_v23 }
  0xb7   : > { %1619 = vmatprep.subr.bf16.mxu0 %v2000_v24  ;;  %1662 = vmatprep.subr.bf16.mxu1 %v2002_v25 }
  0xba   : > { %1620 = vmatpush1.bf16.msra.mxu0 %v1999_v30  ;;  %1663 = vmatpush1.bf16.msra.mxu1 %v2001_v31 }
  0xbb   : > { %1621 = vmatprep.subr.bf16.mxu0 %v2016_v32  ;;  %1664 = vmatprep.subr.bf16.mxu1 %v2018_v33 }
  0xbe   : > { %1622 = vmatpush1.bf16.msra.mxu0 %v2015_v38  ;;  %1665 = vmatpush1.bf16.msra.mxu1 %v2017_v39 }
  0xbf   : > { %1623 = vmatprep.subr.bf16.mxu0 %v2032_v40  ;;  %1666 = vmatprep.subr.bf16.mxu1 %v2034_v42 }
  0xc2   : > { %1624 = vmatpush1.bf16.msra.mxu0 %v2031_v47  ;;  %1667 = vmatpush1.bf16.msra.mxu1 %v2033_v48 }
  0xc3   : > { %1625 = vmatprep.subr.bf16.mxu0 %v2048_v49  ;;  %1668 = vmatprep.subr.bf16.mxu1 %v2050_v50 }
  0xc6   : > { %1626 = vmatpush1.bf16.msra.mxu0 %v2047_v55  ;;  %1669 = vmatpush1.bf16.msra.mxu1 %v2049_v56 }
  0xc7   : > { %1627 = vmatprep.subr.bf16.mxu0 %v2064_v57  ;;  %1670 = vmatprep.subr.bf16.mxu1 %v2066_v58 }
  0xca   : > { %1628 = vmatpush1.bf16.msra.mxu0 %v2063_v63  ;;  %1671 = vmatpush1.bf16.msra.mxu1 %v2065_v1 }
  0xcb   : > { %1629 = vmatprep.subr.bf16.mxu0 %v2080_v2  ;;  %1672 = vmatprep.subr.bf16.mxu1 %v2082_v3 }
  0xce   : > { %1630 = vmatpush1.bf16.msra.mxu0 %v2079_v8  ;;  %1673 = vmatpush1.bf16.msra.mxu1 %v2081_v9 }
  0xcf   : > { %1631 = vmatprep.subr.bf16.mxu0 %v2096_v10  ;;  %1674 = vmatprep.subr.bf16.mxu1 %v2098_v11 }
  0xd2   : > { %1632 = vmatpush1.bf16.msra.mxu0 %v2095_v12  ;;  %1675 = vmatpush1.bf16.msra.mxu1 %v2097_v13 }
  0xd5   : > { %1642 = vmatmul.mubr.bf16.vlgmr.msra.gmra.mrb[12].mxu0 %v2268_v41  ;;  %1685 = vmatmul.mubr.bf16.vlgmr.msra.gmra.mrb[12].mxu1 %v2268_v41 }
 0x118   : > { %v1385_v15 = vpop.f32.mrb[0].mxu0  ;;  %v1428_v17 = vpop.f32.mrb[0].mxu1 }
 0x119   : > { %v1386_v16 = vadd.f32 %v1385_v15, %v2433_v14  ;;  %v1387_v18 = vpop.f32.mrb[1].mxu0  ;;  %v1429_v19 = vadd.f32 %v1428_v17, %v2433_v14  ;;  %v1430_v21 = vpop.f32.mrb[1].mxu1 }
 0x11a   : > { %v1388_v20 = vadd.f32 %v1387_v18, %v2433_v14  ;;  %v1389_v22 = vpop.f32.mrb[2].mxu0  ;;  %v1431_v24 = vadd.f32 %v1430_v21, %v2433_v14  ;;  %v1432_v25 = vpop.f32.mrb[2].mxu1 }
 0x11b   : > { %v1695_v23 = vmax.f32 %v1386_v16, 0.0  ;;  %v1390_v41 = vadd.f32 %v1389_v22, %v2435_v0  ;;  %v1391_v26 = vpop.f32.mrb[3].mxu0  ;;  %v1697_v27 = vmax.f32 %v1429_v19, 0.0  ;;  %v1433_v29 = vadd.f32 %v1432_v25, %v2435_v0  ;;  %v1434_v31 = vpop.f32.mrb[3].mxu1 }
 0x11c   : > { %v1696_v28 = vmax.f32 %v1388_v20, 0.0  ;;  %v1392_v30 = vadd.f32 %v1391_v26, %v2435_v0  ;;  %v1698_v32 = vmax.f32 %v1431_v24, 0.0  ;;  %v1435_v34 = vadd.f32 %v1434_v31, %v2435_v0 }
 0x11d   : > { %v1711_v33 = vmax.f32 %v1390_v41, 0.0  ;;  %v1713_v36 = vmax.f32 %v1433_v29, 0.0 }
 0x11e   : > { %v2126_v35 = vpack.c.bf16 %v1696_v28, %v1695_v23  ;;  %v1712_v37 = vmax.f32 %v1392_v30, 0.0  ;;  %v2127_v38 = vpack.c.bf16 %v1698_v32, %v1697_v27  ;;  %v1714_v39 = vmax.f32 %v1435_v34, 0.0 }
 0x120   : > { %1823 = vst [vmem:[%s2448_s29] sm:$0xff] %v2126_v35  ;;  %v2134_v40 = vpack.c.bf16 %v1712_v37, %v1711_v33  ;;  %1824 = vst [vmem:[%s2448_s29 + $0x8] sm:$0xff] %v2127_v38  ;;  %v2135_v42 = vpack.c.bf16 %v1714_v39, %v1713_v36 }
 0x122   : > { %1834 = vst [vmem:[%s2448_s29 + $0x40] sm:$0xff] %v2134_v40  ;;  %1835 = vst [vmem:[%s2448_s29 + $0x48] sm:$0xff] %v2135_v42 }
 0x148   : > { %v1471_v43 = vpop.f32.mrb[4].mxu0  ;;  %v1514_v45 = vpop.f32.mrb[4].mxu1 }
 0x149   : > { %v1472_v44 = vadd.f32 %v1471_v43, %v2433_v14  ;;  %v1473_v46 = vpop.f32.mrb[5].mxu0  ;;  %v1515_v47 = vadd.f32 %v1514_v45, %v2433_v14  ;;  %v1516_v49 = vpop.f32.mrb[5].mxu1 }
 0x14a   : > { %v1474_v48 = vadd.f32 %v1473_v46, %v2433_v14  ;;  %v1475_v50 = vpop.f32.mrb[6].mxu0  ;;  %v1517_v52 = vadd.f32 %v1516_v49, %v2433_v14  ;;  %v1518_v54 = vpop.f32.mrb[6].mxu1 }
 0x14b   : > { %v1699_v51 = vmax.f32 %v1472_v44, 0.0  ;;  %v1476_v53 = vadd.f32 %v1475_v50, %v2435_v0  ;;  %v1477_v55 = vpop.f32.mrb[7].mxu0  ;;  %v1701_v56 = vmax.f32 %v1515_v47, 0.0  ;;  %v1519_v58 = vadd.f32 %v1518_v54, %v2435_v0  ;;  %v1520_v60 = vpop.f32.mrb[7].mxu1 }
 0x14c   : > { %v1700_v57 = vmax.f32 %v1474_v48, 0.0  ;;  %v1478_v59 = vadd.f32 %v1477_v55, %v2435_v0  ;;  %v1702_v61 = vmax.f32 %v1517_v52, 0.0  ;;  %v1521_v63 = vadd.f32 %v1520_v60, %v2435_v0 }
 0x14d   : > { %v1715_v62 = vmax.f32 %v1476_v53, 0.0  ;;  %v1717_v2 = vmax.f32 %v1519_v58, 0.0 }
 0x14e   : > { %v2128_v1 = vpack.c.bf16 %v1700_v57, %v1699_v51  ;;  %v1716_v3 = vmax.f32 %v1478_v59, 0.0  ;;  %v2129_v4 = vpack.c.bf16 %v1702_v61, %v1701_v56  ;;  %v1718_v5 = vmax.f32 %v1521_v63, 0.0 }
 0x150   : > { %1825 = vst [vmem:[%s2448_s29 + $0x10] sm:$0xff] %v2128_v1  ;;  %v2136_v6 = vpack.c.bf16 %v1716_v3, %v1715_v62  ;;  %1826 = vst [vmem:[%s2448_s29 + $0x18] sm:$0xff] %v2129_v4  ;;  %v2137_v7 = vpack.c.bf16 %v1718_v5, %v1717_v2 }
 0x152   : > { %1836 = vst [vmem:[%s2448_s29 + $0x50] sm:$0xff] %v2136_v6  ;;  %1837 = vst [vmem:[%s2448_s29 + $0x58] sm:$0xff] %v2137_v7 }
 0x178   : > { %v1557_v8 = vpop.f32.mrb[8].mxu0  ;;  %v1600_v10 = vpop.f32.mrb[8].mxu1 }
 0x179   : > { %v1558_v9 = vadd.f32 %v1557_v8, %v2433_v14  ;;  %v1559_v11 = vpop.f32.mrb[9].mxu0  ;;  %v1601_v12 = vadd.f32 %v1600_v10, %v2433_v14  ;;  %v1602_v15 = vpop.f32.mrb[9].mxu1 }
 0x17a   : > { %v1560_v13 = vadd.f32 %v1559_v11, %v2433_v14  ;;  %v1561_v16 = vpop.f32.mrb[10].mxu0  ;;  %v1603_v18 = vadd.f32 %v1602_v15, %v2433_v14  ;;  %v1604_v20 = vpop.f32.mrb[10].mxu1 }
 0x17b   : > { %v1703_v17 = vmax.f32 %v1558_v9, 0.0  ;;  %v1562_v19 = vadd.f32 %v1561_v16, %v2435_v0  ;;  %v1563_v21 = vpop.f32.mrb[11].mxu0  ;;  %v1705_v22 = vmax.f32 %v1601_v12, 0.0  ;;  %v1605_v24 = vadd.f32 %v1604_v20, %v2435_v0  ;;  %v1606_v25 = vpop.f32.mrb[11].mxu1 }
 0x17c   : > { %v1704_v23 = vmax.f32 %v1560_v13, 0.0  ;;  %v1564_v41 = vadd.f32 %v1563_v21, %v2435_v0  ;;  %v1706_v26 = vmax.f32 %v1603_v18, 0.0  ;;  %v1607_v28 = vadd.f32 %v1606_v25, %v2435_v0 }
 0x17d   : > { %v1719_v27 = vmax.f32 %v1562_v19, 0.0  ;;  %v1721_v30 = vmax.f32 %v1605_v24, 0.0 }
 0x17e   : > { %v2130_v29 = vpack.c.bf16 %v1704_v23, %v1703_v17  ;;  %v1720_v31 = vmax.f32 %v1564_v41, 0.0  ;;  %v2131_v32 = vpack.c.bf16 %v1706_v26, %v1705_v22  ;;  %v1722_v33 = vmax.f32 %v1607_v28, 0.0 }
 0x180   : > { %1827 = vst [vmem:[%s2448_s29 + $0x20] sm:$0xff] %v2130_v29  ;;  %v2138_v34 = vpack.c.bf16 %v1720_v31, %v1719_v27  ;;  %1828 = vst [vmem:[%s2448_s29 + $0x28] sm:$0xff] %v2131_v32  ;;  %v2139_v35 = vpack.c.bf16 %v1722_v33, %v1721_v30 }
 0x182   : > { %1838 = vst [vmem:[%s2448_s29 + $0x60] sm:$0xff] %v2138_v34  ;;  %1839 = vst [vmem:[%s2448_s29 + $0x68] sm:$0xff] %v2139_v35 }
 0x1a8   : > { %v1643_v36 = vpop.f32.mrb[12].mxu0  ;;  %v1686_v38 = vpop.f32.mrb[12].mxu1 }
 0x1a9   : > { %v1644_v37 = vadd.f32 %v1643_v36, %v2433_v14  ;;  %v1645_v39 = vpop.f32.mrb[13].mxu0  ;;  %v1687_v40 = vadd.f32 %v1686_v38, %v2433_v14  ;;  %v1688_v43 = vpop.f32.mrb[13].mxu1 }
 0x1aa   : > { %v1646_v42 = vadd.f32 %v1645_v39, %v2433_v14  ;;  %v1647_v44 = vpop.f32.mrb[14].mxu0  ;;  %v1689_v46 = vadd.f32 %v1688_v43, %v2433_v14  ;;  %v1690_v48 = vpop.f32.mrb[14].mxu1 }
 0x1ab   : > { %v1707_v45 = vmax.f32 %v1644_v37, 0.0  ;;  %v1648_v47 = vadd.f32 %v1647_v44, %v2435_v0  ;;  %v1649_v49 = vpop.f32.mrb[15].mxu0  ;;  %v1709_v50 = vmax.f32 %v1687_v40, 0.0  ;;  %v1691_v52 = vadd.f32 %v1690_v48, %v2435_v0  ;;  %v1692_v54 = vpop.f32.mrb[15].mxu1 }
 0x1ac   : > { %v1708_v51 = vmax.f32 %v1646_v42, 0.0  ;;  %v1650_v53 = vadd.f32 %v1649_v49, %v2435_v0  ;;  %v1710_v55 = vmax.f32 %v1689_v46, 0.0  ;;  %v1693_v14 = vadd.f32 %v1692_v54, %v2435_v0 }
 0x1ad   : > { %v1723_v56 = vmax.f32 %v1648_v47, 0.0  ;;  %v1725_v58 = vmax.f32 %v1691_v52, 0.0 }
 0x1ae   : > { %v2132_v57 = vpack.c.bf16 %v1708_v51, %v1707_v45  ;;  %v1724_v59 = vmax.f32 %v1650_v53, 0.0  ;;  %v2133_v60 = vpack.c.bf16 %v1710_v55, %v1709_v50  ;;  %v1726_v61 = vmax.f32 %v1693_v14, 0.0 }
 0x1b0   : > { %1829 = vst [vmem:[%s2448_s29 + $0x30] sm:$0xff] %v2132_v57  ;;  %v2140_v62 = vpack.c.bf16 %v1724_v59, %v1723_v56  ;;  %1833 = vst.msk [vmem:[%s2448_s29 + $0x38] sm:$0xff] %vm1832_vm3, %v2133_v60  ;;  %v2141_v63 = vpack.c.bf16 %v1726_v61, %v1725_v58 }
 0x1b2   : > { %1840 = vst [vmem:[%s2448_s29 + $0x70] sm:$0xff] %v2140_v62  ;;  %1841 = vst.msk [vmem:[%s2448_s29 + $0x78] sm:$0xff] %vm1832_vm3, %v2141_v63 }
 0x1b3 PF: > { %s13_s12 = sadd.s32 1, %s2162_s12  }
 0x1b4   : > { %p10_p4 = scmp.ge.s32.totalorder %s13_s12, 4  }
 0x1b6   :  { %12 = sbr.rel (!%p10_p4) target bundleno = 1 (0x1), region = 62 }

// kernel: cnn3d_forward.4
= control target key start
LH: loop header
LB: loop body
LE: loop exit
PB: predicated region body
PF: predicated region fallthrough
CT: control target
= control target key end

     0   :  { %s1482_s12 = smov 0   ;;  %s1651_s0 = inlined_call_operand.vmem [shape: bf16[2,768,200], index: 0, kind: input, shape index: {}]   ;;  %s1652_s1 = inlined_call_operand.vmem [shape: bf16[32,768], index: 1, kind: input, shape index: {}]   ;;  %s1653_s2 = inlined_call_operand.vmem [shape: f32[32,1], index: 2, kind: input, shape index: {}]   ;;  %s1654_s3 = inlined_call_operand.vmem [shape: bf16[2,32,200], index: 3, kind: output, shape index: {}]  }
   0x1 LB: > { %s1096_s13 = sadd.s32 4294967295, %s1459_s12   ;;  %p1100_p0 = scmp.ge.s32.totalorder %s1459_s12, 1  ;;  %s1459_s12 = sphi %s1482_s12, %s13_s12  }
   0x2   : > { %p137_p1 = scmp.lt.s32.totalorder %s1459_s12, 3 }
   0x4   : > { %p138_p2 = pnand %p1100_p0, %p137_p1 }
   0x5   : > { %p161_p3 = scmp.lt.s32.totalorder (!%p138_p2), %s1096_s13, 1  ;;  %v1389_v0 = vld [vmem:[%s1652_s1 + $0x4] ss:$24 sps:$4 sm:$0xff] (!%p138_p2)   ;;  %v1461_v10 = vmov (!%p138_p2), 0   ;;  %vm1034_vm0 = vcmask (!%p138_p2), 1043456   ;;  %vm1035_vm1 = vcmask (!%p138_p2), 588804  }
   0x6   : > { %141 = sbr.rel (%p138_p2) target bundleno = 369 (0x171), region = 32  ;;  %v1392_v1 = vld [vmem:[%s1652_s1 + $0xc] ss:$24 sps:$4 sm:$0xff] (!%p138_p2)   ;;  %875 = vmatprep.mubr.bf16.mxu1 (!%p138_p2), %v1389_v0  ;;  %1290 = vset.pattern.permute.xlu1 (!%p138_p2), %v1461_v10  ;;  %vm1036_vm2 = vmor (!%p138_p2), %vm1035_vm1, %vm1034_vm0 }
   0x7   : > { %928 = vmatprep.mubr.bf16.mxu0 (!%p138_p2), %v1392_v1  ;;  %1289 = vset.pattern.permute.xlu0 (!%p138_p2), %v1461_v10  ;;  %v1435_v10 = vld [vmem:[%s1652_s1 + $0x3c] ss:$24 sps:$4 sm:$0xff] (!%p138_p2)  }
   0xd   : > { %s1656_s13 = smov (!%p161_p3, %s1096_s13), 1 }
   0xe   : > { %s1279_s18 = smul.u32 768, %s1656_s13 }
  0x10   : > { %s1502_s21 = scalar_lea.vmem %s1651_s0, %s1279_s18 }
  0x11   : > { %v1291_v2 = vld [vmem:[%s1502_s21 + $0x4] ss:$8 sps:$4 sm:$0xff]   ;;  %v1295_v4 = vld [vmem:[%s1502_s21] ss:$8 sps:$4 sm:$0xff]   ;;  %v1297_v6 = vld [vmem:[%s1502_s21 + $0x14] ss:$8 sps:$4 sm:$0xff]  }
  0x12   : > { %v1293_v3 = vld [vmem:[%s1502_s21 + $0x104] ss:$8 sps:$4 sm:$0xff]   ;;  %843 = vmatprep.subr.bf16.mxu1 %v1291_v2  ;;  %v1296_v5 = vld [vmem:[%s1502_s21 + $0x100] ss:$8 sps:$4 sm:$0xff]   ;;  %v1299_v7 = vld [vmem:[%s1502_s21 + $0x114] ss:$8 sps:$4 sm:$0xff]  }
  0x13   : > { %896 = vmatprep.subr.bf16.mxu0 %v1293_v3  ;;  %844 = vmatpush1.bf16.msra.mxu1 %v1295_v4  ;;  %v1301_v8 = vld [vmem:[%s1502_s21 + $0x10] ss:$8 sps:$4 sm:$0xff]   ;;  %v1303_v11 = vld [vmem:[%s1502_s21 + $0x24] ss:$8 sps:$4 sm:$0xff]   ;;  %v1307_v13 = vld [vmem:[%s1502_s21 + $0x20] ss:$8 sps:$4 sm:$0xff]  }
  0x14   : > { %897 = vmatpush1.bf16.msra.mxu0 %v1296_v5  ;;  %845 = vmatprep.subr.bf16.mxu1 %v1297_v6  ;;  %v1302_v9 = vld [vmem:[%s1502_s21 + $0x110] ss:$8 sps:$4 sm:$0xff]   ;;  %v1305_v12 = vld [vmem:[%s1502_s21 + $0x124] ss:$8 sps:$4 sm:$0xff]   ;;  %v1308_v14 = vld [vmem:[%s1502_s21 + $0x120] ss:$8 sps:$4 sm:$0xff]  }
  0x15   : > { %898 = vmatprep.subr.bf16.mxu0 %v1299_v7  ;;  %v1309_v15 = vld [vmem:[%s1502_s21 + $0x34] ss:$8 sps:$4 sm:$0xff]   ;;  %v1313_v17 = vld [vmem:[%s1502_s21 + $0x30] ss:$8 sps:$4 sm:$0xff]   ;;  %v1315_v19 = vld [vmem:[%s1502_s21 + $0x44] ss:$8 sps:$4 sm:$0xff]  }
  0x16   : > { %v1311_v16 = vld [vmem:[%s1502_s21 + $0x134] ss:$8 sps:$4 sm:$0xff]   ;;  %v1314_v18 = vld [vmem:[%s1502_s21 + $0x130] ss:$8 sps:$4 sm:$0xff]   ;;  %v1317_v20 = vld [vmem:[%s1502_s21 + $0x144] ss:$8 sps:$4 sm:$0xff]  }
  0x17   : > { %846 = vmatpush1.bf16.msra.mxu1 %v1301_v8  ;;  %v1319_v21 = vld [vmem:[%s1502_s21 + $0x40] ss:$8 sps:$4 sm:$0xff]   ;;  %v1321_v23 = vld [vmem:[%s1502_s21 + $0x54] ss:$8 sps:$4 sm:$0xff]   ;;  %v1325_v25 = vld [vmem:[%s1502_s21 + $0x50] ss:$8 sps:$4 sm:$0xff]  }
  0x18   : > { %899 = vmatpush1.bf16.msra.mxu0 %v1302_v9  ;;  %847 = vmatprep.subr.bf16.mxu1 %v1303_v11  ;;  %v1320_v22 = vld [vmem:[%s1502_s21 + $0x140] ss:$8 sps:$4 sm:$0xff]   ;;  %v1323_v24 = vld [vmem:[%s1502_s21 + $0x154] ss:$8 sps:$4 sm:$0xff]   ;;  %v1326_v26 = vld [vmem:[%s1502_s21 + $0x150] ss:$8 sps:$4 sm:$0xff]  }
  0x19   : > { %900 = vmatprep.subr.bf16.mxu0 %v1305_v12  ;;  %v1327_v27 = vld [vmem:[%s1502_s21 + $0x64] ss:$8 sps:$4 sm:$0xff]   ;;  %v1331_v29 = vld [vmem:[%s1502_s21 + $0x60] ss:$8 sps:$4 sm:$0xff]   ;;  %v1333_v31 = vld [vmem:[%s1502_s21 + $0x74] ss:$8 sps:$4 sm:$0xff]  }
  0x1a   : > { %v1329_v28 = vld [vmem:[%s1502_s21 + $0x164] ss:$8 sps:$4 sm:$0xff]   ;;  %v1332_v30 = vld [vmem:[%s1502_s21 + $0x160] ss:$8 sps:$4 sm:$0xff]   ;;  %v1335_v32 = vld [vmem:[%s1502_s21 + $0x174] ss:$8 sps:$4 sm:$0xff]  }
  0x1b   : > { %848 = vmatpush1.bf16.msra.mxu1 %v1307_v13  ;;  %v1337_v33 = vld [vmem:[%s1502_s21 + $0x70] ss:$8 sps:$4 sm:$0xff]   ;;  %v1339_v35 = vld [vmem:[%s1502_s21 + $0x84] ss:$8 sps:$4 sm:$0xff]   ;;  %v1343_v37 = vld [vmem:[%s1502_s21 + $0x80] ss:$8 sps:$4 sm:$0xff]  }
  0x1c   : > { %901 = vmatpush1.bf16.msra.mxu0 %v1308_v14  ;;  %849 = vmatprep.subr.bf16.mxu1 %v1309_v15  ;;  %v1338_v34 = vld [vmem:[%s1502_s21 + $0x170] ss:$8 sps:$4 sm:$0xff]   ;;  %v1341_v36 = vld [vmem:[%s1502_s21 + $0x184] ss:$8 sps:$4 sm:$0xff]   ;;  %v1344_v38 = vld [vmem:[%s1502_s21 + $0x180] ss:$8 sps:$4 sm:$0xff]  }
  0x1d   : > { %902 = vmatprep.subr.bf16.mxu0 %v1311_v16  ;;  %v1345_v39 = vld [vmem:[%s1502_s21 + $0x94] ss:$8 sps:$4 sm:$0xff]   ;;  %v1349_v41 = vld [vmem:[%s1502_s21 + $0x90] ss:$8 sps:$4 sm:$0xff]   ;;  %v1351_v43 = vld [vmem:[%s1502_s21 + $0xa4] ss:$8 sps:$4 sm:$0xff]  }
  0x1e   : > { %v1347_v40 = vld [vmem:[%s1502_s21 + $0x194] ss:$8 sps:$4 sm:$0xff]   ;;  %v1350_v42 = vld [vmem:[%s1502_s21 + $0x190] ss:$8 sps:$4 sm:$0xff]   ;;  %v1353_v44 = vld [vmem:[%s1502_s21 + $0x1a4] ss:$8 sps:$4 sm:$0xff]  }
  0x1f   : > { %850 = vmatpush1.bf16.msra.mxu1 %v1313_v17  ;;  %v1355_v45 = vld [vmem:[%s1502_s21 + $0xa0] ss:$8 sps:$4 sm:$0xff]   ;;  %v1357_v47 = vld [vmem:[%s1502_s21 + $0xb4] ss:$8 sps:$4 sm:$0xff]   ;;  %v1361_v49 = vld [vmem:[%s1502_s21 + $0xb0] ss:$8 sps:$4 sm:$0xff]  }
  0x20   : > { %903 = vmatpush1.bf16.msra.mxu0 %v1314_v18  ;;  %851 = vmatprep.subr.bf16.mxu1 %v1315_v19  ;;  %v1356_v46 = vld [vmem:[%s1502_s21 + $0x1a0] ss:$8 sps:$4 sm:$0xff]   ;;  %v1359_v48 = vld [vmem:[%s1502_s21 + $0x1b4] ss:$8 sps:$4 sm:$0xff]   ;;  %v1362_v50 = vld [vmem:[%s1502_s21 + $0x1b0] ss:$8 sps:$4 sm:$0xff]  }
  0x21   : > { %904 = vmatprep.subr.bf16.mxu0 %v1317_v20  ;;  %v1363_v51 = vld [vmem:[%s1502_s21 + $0xc4] ss:$8 sps:$4 sm:$0xff]   ;;  %v1367_v53 = vld [vmem:[%s1502_s21 + $0xc0] ss:$8 sps:$4 sm:$0xff]   ;;  %v1369_v55 = vld [vmem:[%s1502_s21 + $0xd4] ss:$8 sps:$4 sm:$0xff]  }
  0x22   : > { %v1365_v52 = vld [vmem:[%s1502_s21 + $0x1c4] ss:$8 sps:$4 sm:$0xff]   ;;  %v1368_v54 = vld [vmem:[%s1502_s21 + $0x1c0] ss:$8 sps:$4 sm:$0xff]   ;;  %v1371_v56 = vld [vmem:[%s1502_s21 + $0x1d4] ss:$8 sps:$4 sm:$0xff]  }
  0x23   : > { %852 = vmatpush1.bf16.msra.mxu1 %v1319_v21  ;;  %v1373_v57 = vld [vmem:[%s1502_s21 + $0xd0] ss:$8 sps:$4 sm:$0xff]   ;;  %v1375_v59 = vld [vmem:[%s1502_s21 + $0xe4] ss:$8 sps:$4 sm:$0xff]   ;;  %v1379_v61 = vld [vmem:[%s1502_s21 + $0xe0] ss:$8 sps:$4 sm:$0xff]  }
  0x24   : > { %905 = vmatpush1.bf16.msra.mxu0 %v1320_v22  ;;  %853 = vmatprep.subr.bf16.mxu1 %v1321_v23  ;;  %v1374_v58 = vld [vmem:[%s1502_s21 + $0x1d0] ss:$8 sps:$4 sm:$0xff]   ;;  %v1377_v60 = vld [vmem:[%s1502_s21 + $0x1e4] ss:$8 sps:$4 sm:$0xff]   ;;  %v1380_v62 = vld [vmem:[%s1502_s21 + $0x1e0] ss:$8 sps:$4 sm:$0xff]  }
  0x25   : > { %906 = vmatprep.subr.bf16.mxu0 %v1323_v24  ;;  %v1381_v63 = vld [vmem:[%s1502_s21 + $0xf4] ss:$8 sps:$4 sm:$0xff]   ;;  %v1385_v1 = vld [vmem:[%s1502_s21 + $0xf0] ss:$8 sps:$4 sm:$0xff]   ;;  %v1395_v3 = vld [vmem:[%s1502_s21 + $0x204] ss:$8 sps:$4 sm:$0xff]  }
  0x26   : > { %v1383_v0 = vld [vmem:[%s1502_s21 + $0x1f4] ss:$8 sps:$4 sm:$0xff]   ;;  %v1386_v2 = vld [vmem:[%s1502_s21 + $0x1f0] ss:$8 sps:$4 sm:$0xff]   ;;  %v1390_v5 = vld [vmem:[%s1652_s1 + $0x8] ss:$24 sps:$4 sm:$0xff]  }
  0x27   : > { %854 = vmatpush1.bf16.msra.mxu1 %v1325_v25  ;;  %v1387_v4 = vld [vmem:[%s1652_s1] ss:$24 sps:$4 sm:$0xff]   ;;  %v1398_v7 = vld [vmem:[%s1502_s21 + $0x214] ss:$8 sps:$4 sm:$0xff]   ;;  %v184_v12 = vld [vmem:[%s1653_s2 + $0x8] sm:$0xff] }
  0x28   : > { %907 = vmatpush1.bf16.msra.mxu0 %v1326_v26  ;;  %855 = vmatprep.subr.bf16.mxu1 %v1327_v27  ;;  %v1393_v6 = vld [vmem:[%s1502_s21 + $0x200] ss:$8 sps:$4 sm:$0xff]   ;;  %v1432_v9 = vld [vmem:[%s1652_s1 + $0x34] ss:$24 sps:$4 sm:$0xff]   ;;  %v1396_v11 = vld [vmem:[%s1502_s21 + $0x210] ss:$8 sps:$4 sm:$0xff]  }
  0x29   : > { %908 = vmatprep.subr.bf16.mxu0 %v1329_v28  ;;  %v183_v8 = vld [vmem:[%s1653_s2] sm:$0xff]  ;;  %v185_v13 = vld [vmem:[%s1653_s2 + $0x10] sm:$0xff]  ;;  %v186_v22 = vld [vmem:[%s1653_s2 + $0x18] sm:$0xff] }
  0x2a   : > { %285 = vperm.xlu1 %1290, %v183_v8   ;;  %v1401_v14 = vld [vmem:[%s1502_s21 + $0x224] ss:$8 sps:$4 sm:$0xff]   ;;  %v1434_v15 = vld [vmem:[%s1652_s1 + $0x30] ss:$24 sps:$4 sm:$0xff]   ;;  %295 = vperm.xlu0 %1289, %v185_v13   ;;  %v1404_v18 = vld [vmem:[%s1502_s21 + $0x234] ss:$8 sps:$4 sm:$0xff]  }
  0x2b   : > { %856 = vmatpush1.bf16.msra.mxu1 %v1331_v29  ;;  %v1440_v16 = vld [vmem:[%s1652_s1 + $0x38] ss:$24 sps:$4 sm:$0xff]   ;;  %v1399_v17 = vld [vmem:[%s1502_s21 + $0x220] ss:$8 sps:$4 sm:$0xff]   ;;  %v1449_v19 = vld [vmem:[%s1652_s1 + $0x14] ss:$24 sps:$4 sm:$0xff]  }
  0x2c   : > { %909 = vmatpush1.bf16.msra.mxu0 %v1332_v30  ;;  %857 = vmatprep.subr.bf16.mxu1 %v1333_v31  ;;  %v1452_v20 = vld [vmem:[%s1652_s1 + $0x44] ss:$24 sps:$4 sm:$0xff]   ;;  %v1402_v21 = vld [vmem:[%s1502_s21 + $0x230] ss:$8 sps:$4 sm:$0xff]   ;;  %v1405_v24 = vld [vmem:[%s1502_s21 + $0x240] ss:$8 sps:$4 sm:$0xff]  }
  0x2d   : > { %910 = vmatprep.subr.bf16.mxu0 %v1335_v32  ;;  %v1407_v23 = vld [vmem:[%s1502_s21 + $0x244] ss:$8 sps:$4 sm:$0xff]   ;;  %v1410_v25 = vld [vmem:[%s1502_s21 + $0x254] ss:$8 sps:$4 sm:$0xff]   ;;  %v1408_v26 = vld [vmem:[%s1502_s21 + $0x250] ss:$8 sps:$4 sm:$0xff]  }
  0x2e   : > { %290 = vperm.xlu1 %1290, %v184_v12   ;;  %300 = vperm.xlu0 %1289, %v186_v22   ;;  %v1413_v27 = vld [vmem:[%s1502_s21 + $0x264] ss:$8 sps:$4 sm:$0xff]   ;;  %v1411_v28 = vld [vmem:[%s1502_s21 + $0x260] ss:$8 sps:$4 sm:$0xff]   ;;  %v1416_v29 = vld [vmem:[%s1502_s21 + $0x274] ss:$8 sps:$4 sm:$0xff]  }
  0x2f   : > { %858 = vmatpush1.bf16.msra.mxu1 %v1337_v33  ;;  %v1414_v30 = vld [vmem:[%s1502_s21 + $0x270] ss:$8 sps:$4 sm:$0xff]   ;;  %v1419_v31 = vld [vmem:[%s1502_s21 + $0x284] ss:$8 sps:$4 sm:$0xff]   ;;  %v1417_v32 = vld [vmem:[%s1502_s21 + $0x280] ss:$8 sps:$4 sm:$0xff]  }
  0x30   : > { %911 = vmatpush1.bf16.msra.mxu0 %v1338_v34  ;;  %859 = vmatprep.subr.bf16.mxu1 %v1339_v35  ;;  %v1422_v33 = vld [vmem:[%s1502_s21 + $0x294] ss:$8 sps:$4 sm:$0xff]   ;;  %v1420_v34 = vld [vmem:[%s1502_s21 + $0x290] ss:$8 sps:$4 sm:$0xff]   ;;  %v1425_v35 = vld [vmem:[%s1502_s21 + $0x2a4] ss:$8 sps:$4 sm:$0xff]  }
  0x31   : > { %912 = vmatprep.subr.bf16.mxu0 %v1341_v36  ;;  %v1423_v36 = vld [vmem:[%s1502_s21 + $0x2a0] ss:$8 sps:$4 sm:$0xff]  }
  0x33   : > { %860 = vmatpush1.bf16.msra.mxu1 %v1343_v37  ;;  %v1428_v37 = vld [vmem:[%s1502_s21 + $0x2b4] ss:$8 sps:$4 sm:$0xff]  }
  0x34   : > { %913 = vmatpush1.bf16.msra.mxu0 %v1344_v38  ;;  %861 = vmatprep.subr.bf16.mxu1 %v1345_v39  ;;  %v1426_v38 = vld [vmem:[%s1502_s21 + $0x2b0] ss:$8 sps:$4 sm:$0xff]   ;;  %v1431_v39 = vld [vmem:[%s1502_s21 + $0x2c4] ss:$8 sps:$4 sm:$0xff]  }
  0x35   : > { %914 = vmatprep.subr.bf16.mxu0 %v1347_v40  ;;  %v1429_v40 = vld [vmem:[%s1502_s21 + $0x2c0] ss:$8 sps:$4 sm:$0xff]  }
  0x37   : > { %862 = vmatpush1.bf16.msra.mxu1 %v1349_v41  ;;  %v1439_v41 = vld [vmem:[%s1502_s21 + $0x2d4] ss:$8 sps:$4 sm:$0xff]  }
  0x38   : > { %915 = vmatpush1.bf16.msra.mxu0 %v1350_v42  ;;  %863 = vmatprep.subr.bf16.mxu1 %v1351_v43  ;;  %v1437_v42 = vld [vmem:[%s1502_s21 + $0x2d0] ss:$8 sps:$4 sm:$0xff]   ;;  %v1443_v43 = vld [vmem:[%s1502_s21 + $0x2e4] ss:$8 sps:$4 sm:$0xff]  }
  0x39   : > { %916 = vmatprep.subr.bf16.mxu0 %v1353_v44  ;;  %v1441_v44 = vld [vmem:[%s1502_s21 + $0x2e0] ss:$8 sps:$4 sm:$0xff]  }
  0x3b   : > { %864 = vmatpush1.bf16.msra.mxu1 %v1355_v45  ;;  %v1446_v45 = vld [vmem:[%s1502_s21 + $0x2f4] ss:$8 sps:$4 sm:$0xff]  }
  0x3c   : > { %917 = vmatpush1.bf16.msra.mxu0 %v1356_v46  ;;  %865 = vmatprep.subr.bf16.mxu1 %v1357_v47  ;;  %v1444_v46 = vld [vmem:[%s1502_s21 + $0x2f0] ss:$8 sps:$4 sm:$0xff]   ;;  %s1218_s21 = sshll.u32 %s1656_s13, 5 }
  0x3d   : > { %918 = vmatprep.subr.bf16.mxu0 %v1359_v48  ;;  %v1447_v47 = vld [vmem:[%s1652_s1 + $0x10] ss:$24 sps:$4 sm:$0xff]   ;;  %v1450_v48 = vld [vmem:[%s1652_s1 + $0x40] ss:$24 sps:$4 sm:$0xff]   ;;  %s170_s28 = scalar_lea.vmem %s1654_s3, %s1218_s21 }
  0x3f   : > { %866 = vmatpush1.bf16.msra.mxu1 %v1361_v49 }
  0x40   : > { %919 = vmatpush1.bf16.msra.mxu0 %v1362_v50  ;;  %867 = vmatprep.subr.bf16.mxu1 %v1363_v51 }
  0x41   : > { %920 = vmatprep.subr.bf16.mxu0 %v1365_v52 }
  0x43   : > { %868 = vmatpush1.bf16.msra.mxu1 %v1367_v53 }
  0x44   : > { %921 = vmatpush1.bf16.msra.mxu0 %v1368_v54  ;;  %869 = vmatprep.subr.bf16.mxu1 %v1369_v55 }
  0x45   : > { %922 = vmatprep.subr.bf16.mxu0 %v1371_v56 }
  0x47   : > { %870 = vmatpush1.bf16.msra.mxu1 %v1373_v57 }
  0x48   : > { %923 = vmatpush1.bf16.msra.mxu0 %v1374_v58  ;;  %871 = vmatprep.subr.bf16.mxu1 %v1375_v59 }
  0x49   : > { %924 = vmatprep.subr.bf16.mxu0 %v1377_v60 }
  0x4b   : > { %872 = vmatpush1.bf16.msra.mxu1 %v1379_v61 }
  0x4c   : > { %925 = vmatpush1.bf16.msra.mxu0 %v1380_v62  ;;  %873 = vmatprep.subr.bf16.mxu1 %v1381_v63 }
  0x4d   : > { %926 = vmatprep.subr.bf16.mxu0 %v1383_v0 }
  0x4f   : > { %874 = vmatpush1.bf16.msra.mxu1 %v1385_v1 }
  0x50   : > { %927 = vmatpush1.bf16.msra.mxu0 %v1386_v2  ;;  %1223 = vmatprep.subr.bf16.mxu1 %v1395_v3 }
  0x51   : > { %949 = vmatprep.subr.bf16.mxu0 %v1395_v3 }
  0x52   : > { %876 = vmatmul.mubr.bf16.vlgmr.msra.gmra.mrb[0].mxu1 %v1387_v4 }
  0x53   : > { %929 = vmatmul.mubr.bf16.vlgmr.msra.gmra.mrb[0].mxu0 %v1390_v5  ;;  %1239 = vmatpush1.bf16.msra.mxu1 %v1393_v6 }
  0x54   : > { %950 = vmatpush1.bf16.msra.mxu0 %v1393_v6  ;;  %1224 = vmatprep.subr.bf16.mxu1 %v1398_v7 }
  0x55   : > { %951 = vmatprep.subr.bf16.mxu0 %v1398_v7  ;;  %885 = vmatprep.mubr.bf16.mxu1 %v1432_v9 }
  0x56   : > { %938 = vmatprep.mubr.bf16.mxu0 %v1435_v10 }
  0x57   : > { %1240 = vmatpush1.bf16.msra.mxu1 %v1396_v11 }
  0x58   : > { %952 = vmatpush1.bf16.msra.mxu0 %v1396_v11  ;;  %1225 = vmatprep.subr.bf16.mxu1 %v1401_v14 }
  0x59   : > { %953 = vmatprep.subr.bf16.mxu0 %v1401_v14 }
  0x5a   : > { %886 = vmatmul.mubr.bf16.gmra.mrb[4].mxu1 %v1434_v15 }
  0x5b   : > { %939 = vmatmul.mubr.bf16.gmra.mrb[4].mxu0 %v1440_v16  ;;  %1241 = vmatpush1.bf16.msra.mxu1 %v1399_v17 }
  0x5c   : > { %954 = vmatpush1.bf16.msra.mxu0 %v1399_v17  ;;  %1226 = vmatprep.subr.bf16.mxu1 %v1404_v18 }
  0x5d   : > { %955 = vmatprep.subr.bf16.mxu0 %v1404_v18  ;;  %981 = vmatprep.mubr.bf16.mxu0 %v1449_v19 }
  0x5e   : > { %991 = vmatprep.mubr.bf16.mxu1 %v1452_v20 }
  0x5f   : > { %1242 = vmatpush1.bf16.msra.mxu1 %v1402_v21 }
  0x60   : > { %956 = vmatpush1.bf16.msra.mxu0 %v1402_v21  ;;  %1227 = vmatprep.subr.bf16.mxu1 %v1407_v23 }
  0x61   : > { %957 = vmatprep.subr.bf16.mxu0 %v1407_v23 }
  0x63   : > { %1243 = vmatpush1.bf16.msra.mxu1 %v1405_v24 }
  0x64   : > { %958 = vmatpush1.bf16.msra.mxu0 %v1405_v24  ;;  %1228 = vmatprep.subr.bf16.mxu1 %v1410_v25 }
  0x65   : > { %959 = vmatprep.subr.bf16.mxu0 %v1410_v25 }
  0x67   : > { %1244 = vmatpush1.bf16.msra.mxu1 %v1408_v26 }
  0x68   : > { %960 = vmatpush1.bf16.msra.mxu0 %v1408_v26  ;;  %1229 = vmatprep.subr.bf16.mxu1 %v1413_v27 }
  0x69   : > { %961 = vmatprep.subr.bf16.mxu0 %v1413_v27 }
  0x6b   : > { %1245 = vmatpush1.bf16.msra.mxu1 %v1411_v28 }
  0x6c   : > { %962 = vmatpush1.bf16.msra.mxu0 %v1411_v28  ;;  %1230 = vmatprep.subr.bf16.mxu1 %v1416_v29 }
  0x6d   : > { %963 = vmatprep.subr.bf16.mxu0 %v1416_v29 }
  0x6f   : > { %1246 = vmatpush1.bf16.msra.mxu1 %v1414_v30 }
  0x70   : > { %964 = vmatpush1.bf16.msra.mxu0 %v1414_v30  ;;  %1231 = vmatprep.subr.bf16.mxu1 %v1419_v31 }
  0x71   : > { %965 = vmatprep.subr.bf16.mxu0 %v1419_v31 }
  0x73   : > { %1247 = vmatpush1.bf16.msra.mxu1 %v1417_v32 }
  0x74   : > { %966 = vmatpush1.bf16.msra.mxu0 %v1417_v32  ;;  %1232 = vmatprep.subr.bf16.mxu1 %v1422_v33 }
  0x75   : > { %967 = vmatprep.subr.bf16.mxu0 %v1422_v33 }
  0x77   : > { %1248 = vmatpush1.bf16.msra.mxu1 %v1420_v34 }
  0x78   : > { %968 = vmatpush1.bf16.msra.mxu0 %v1420_v34  ;;  %1233 = vmatprep.subr.bf16.mxu1 %v1425_v35 }
  0x79   : > { %969 = vmatprep.subr.bf16.mxu0 %v1425_v35 }
  0x7b   : > { %1249 = vmatpush1.bf16.msra.mxu1 %v1423_v36 }
  0x7c   : > { %970 = vmatpush1.bf16.msra.mxu0 %v1423_v36  ;;  %1234 = vmatprep.subr.bf16.mxu1 %v1428_v37 }
  0x7d   : > { %971 = vmatprep.subr.bf16.mxu0 %v1428_v37 }
  0x7f   : > { %1250 = vmatpush1.bf16.msra.mxu1 %v1426_v38 }
  0x80   : > { %972 = vmatpush1.bf16.msra.mxu0 %v1426_v38  ;;  %1235 = vmatprep.subr.bf16.mxu1 %v1431_v39 }
  0x81   : > { %973 = vmatprep.subr.bf16.mxu0 %v1431_v39 }
  0x83   : > { %1251 = vmatpush1.bf16.msra.mxu1 %v1429_v40 }
  0x84   : > { %974 = vmatpush1.bf16.msra.mxu0 %v1429_v40  ;;  %1236 = vmatprep.subr.bf16.mxu1 %v1439_v41 }
  0x85   : > { %975 = vmatprep.subr.bf16.mxu0 %v1439_v41 }
  0x87   : > { %1252 = vmatpush1.bf16.msra.mxu1 %v1437_v42 }
  0x88   : > { %976 = vmatpush1.bf16.msra.mxu0 %v1437_v42  ;;  %1237 = vmatprep.subr.bf16.mxu1 %v1443_v43 }
  0x89   : > { %977 = vmatprep.subr.bf16.mxu0 %v1443_v43 }
  0x8b   : > { %1253 = vmatpush1.bf16.msra.mxu1 %v1441_v44 }
  0x8c   : > { %978 = vmatpush1.bf16.msra.mxu0 %v1441_v44  ;;  %1238 = vmatprep.subr.bf16.mxu1 %v1446_v45 }
  0x8d   : > { %979 = vmatprep.subr.bf16.mxu0 %v1446_v45 }
  0x8f   : > { %1254 = vmatpush1.bf16.msra.mxu1 %v1444_v46 }
  0x90   : > { %980 = vmatpush1.bf16.msra.mxu0 %v1444_v46 }
  0x92   : > { %992 = vmatmul.mubr.bf16.vlgmr.msra.gmra.mrb[8].mxu1 %v1450_v48 }
  0x93   : > { %982 = vmatmul.mubr.bf16.vlgmr.msra.gmra.mrb[0].mxu0 %v1447_v47 }
  0xa9   : > { %v296_v51 = vpop.permute.xlu0 %295  ;;  %v286_v7 = vpop.permute.xlu1 %285 }
  0xad   : > { %v301_v54 = vpop.permute.xlu0 %300  ;;  %v291_v8 = vpop.permute.xlu1 %290 }
 0x125   : > { %v877_v49 = vpop.f32.mrb[0].mxu1 }
 0x126   : > { %v879_v50 = vpop.f32.mrb[1].mxu1  ;;  %v878_v9 = vadd.f32 %v877_v49, %v286_v7 }
 0x127   : > { %v881_v52 = vpop.f32.mrb[2].mxu1  ;;  %v880_v10 = vadd.f32 %v879_v50, %v286_v7 }
 0x128   : > { %v883_v53 = vpop.f32.mrb[3].mxu1  ;;  %v882_v13 = vadd.f32 %v881_v52, %v291_v8 }
 0x129   : > { %v884_v18 = vadd.f32 %v883_v53, %v291_v8 }
 0x12d   : > { %v887_v55 = vpop.f32.mrb[4].mxu1 }
 0x12e   : > { %v940_v56 = vpop.f32.mrb[4].mxu0  ;;  %v888_v57 = vadd.f32 %v887_v55, %v296_v51  ;;  %v889_v58 = vpop.f32.mrb[5].mxu1 }
 0x12f   : > { %v942_v59 = vpop.f32.mrb[5].mxu0  ;;  %v890_v60 = vadd.f32 %v889_v58, %v296_v51  ;;  %v891_v61 = vpop.f32.mrb[6].mxu1 }
 0x130   : > { %v944_v62 = vpop.f32.mrb[6].mxu0  ;;  %v941_v63 = vadd.f32 %v940_v56, %v888_v57  ;;  %v892_v0 = vadd.f32 %v891_v61, %v301_v54  ;;  %v893_v1 = vpop.f32.mrb[7].mxu1 }
 0x131   : > { %v946_v2 = vpop.f32.mrb[7].mxu0  ;;  %v894_v3 = vadd.f32 %v893_v1, %v301_v54  ;;  %v943_v4 = vadd.f32 %v942_v59, %v890_v60 }
 0x132   : > { %v945_v5 = vadd.f32 %v944_v62, %v892_v0 }
 0x133   : > { %v947_v6 = vadd.f32 %v946_v2, %v894_v3 }
 0x165   : > { %v993_v12 = vpop.f32.mrb[8].mxu1 }
 0x166   : > { %v983_v11 = vpop.f32.mrb[0].mxu0  ;;  %v994_v15 = vadd.f32 %v993_v12, %v941_v63  ;;  %v995_v17 = vpop.f32.mrb[9].mxu1 }
 0x167   : > { %v1256_v14 = vadd.f32 %v983_v11, %v878_v9  ;;  %v985_v16 = vpop.f32.mrb[1].mxu0  ;;  %v996_v20 = vadd.f32 %v995_v17, %v943_v4  ;;  %v997_v22 = vpop.f32.mrb[10].mxu1 }
 0x168   : > { %v1258_v19 = vadd.f32 %v985_v16, %v880_v10  ;;  %v987_v21 = vpop.f32.mrb[2].mxu0  ;;  %v1006_v24 = vmax.f32 %v994_v15, 0.0  ;;  %v998_v26 = vadd.f32 %v997_v22, %v945_v5  ;;  %v999_v28 = vpop.f32.mrb[11].mxu1 }
 0x169   : > { %v1002_v23 = vmax.f32 %v1256_v14, 0.0  ;;  %v1260_v25 = vadd.f32 %v987_v21, %v882_v13  ;;  %v989_v27 = vpop.f32.mrb[3].mxu0  ;;  %v1007_v30 = vmax.f32 %v996_v20, 0.0  ;;  %v1000_v32 = vadd.f32 %v999_v28, %v947_v6 }
 0x16a   : > { %v1003_v29 = vmax.f32 %v1258_v19, 0.0  ;;  %v1262_v31 = vadd.f32 %v989_v27, %v884_v18  ;;  %v1008_v34 = vmax.f32 %v998_v26, 0.0 }
 0x16b   : > { %v1004_v33 = vmax.f32 %v1260_v25, 0.0  ;;  %v1221_v36 = vpack.c.bf16 %v1007_v30, %v1006_v24  ;;  %v1009_v38 = vmax.f32 %v1000_v32, 0.0 }
 0x16c   : > { %v1219_v35 = vpack.c.bf16 %v1003_v29, %v1002_v23  ;;  %v1005_v37 = vmax.f32 %v1262_v31, 0.0 }
 0x16d   : > { %1039 = vst.msk [vmem:[%s170_s28 + $0x10] sm:$0xff] %vm1036_vm2, %v1221_v36  ;;  %v1222_v40 = vpack.c.bf16 %v1009_v38, %v1008_v34 }
 0x16e   : > { %1037 = vst.msk [vmem:[%s170_s28] sm:$0xff] %vm1036_vm2, %v1219_v35  ;;  %v1220_v39 = vpack.c.bf16 %v1005_v37, %v1004_v33 }
 0x16f   : > { %1040 = vst.msk [vmem:[%s170_s28 + $0x18] sm:$0xff] %vm1036_vm2, %v1222_v40 }
 0x170   : > { %1038 = vst.msk [vmem:[%s170_s28 + $0x8] sm:$0xff] %vm1036_vm2, %v1220_v39 }
 0x171 PF: > { %s13_s12 = sadd.s32 1, %s1459_s12  }
 0x172   : > { %p10_p4 = scmp.ge.s32.totalorder %s13_s12, 4  }
 0x174   :  { %12 = sbr.rel (!%p10_p4) target bundleno = 1 (0x1), region = 62 }

// kernel: cnn3d_forward.5
= control target key start
LH: loop header
LB: loop body
LE: loop exit
PB: predicated region body
PF: predicated region fallthrough
CT: control target
= control target key end

     0   :  { %v833_v36 = vlaneseq  ;;  %v8587_v37 = vmov 1966171168   ;;  %s11341_s0 = inlined_call_operand.vmem [shape: bf16[2,6400], index: 0, kind: input, shape index: {}]   ;;  %s11342_s1 = inlined_call_operand.vmem [shape: bf16[6400,200], index: 1, kind: input, shape index: {}]   ;;  %s11343_s2 = inlined_call_operand.vmem [shape: f32[1,200], index: 2, kind: input, shape index: {}]   ;;  %s11344_s3 = inlined_call_operand.vmem [shape: bf16[200,7], index: 3, kind: input, shape index: {}]   ;;  %s11345_s4 = inlined_call_operand.vmem [shape: f32[1,7], index: 4, kind: input, shape index: {}]   ;;  %s11346_s5 = inlined_call_operand.hbm [shape: f32[2,6], index: 5, kind: output, shape index: {0}]   ;;  %s11347_s6 = inlined_call_operand.vmem [shape: f32[2,1], index: 6, kind: output, shape index: {1}]  }
   0x1   :  { %v7340_v0 = vld [vmem:[%s11342_s1 + $0x4] ss:$8 sps:$4 sm:$0xff]   ;;  %v7344_v2 = vld [vmem:[%s11342_s1] ss:$8 sps:$4 sm:$0xff]   ;;  %v7346_v4 = vld [vmem:[%s11342_s1 + $0x14] ss:$8 sps:$4 sm:$0xff]   ;;  %v852_v38 = vunpack.c.l.s4 %v8587_v37 }
   0x2   :  { %v7342_v1 = vld [vmem:[%s11342_s1 + $0xc04] ss:$8 sps:$4 sm:$0xff]   ;;  %5216 = vmatprep.subr.bf16.mxu1 %v7340_v0  ;;  %v7345_v3 = vld [vmem:[%s11342_s1 + $0xc00] ss:$8 sps:$4 sm:$0xff]   ;;  %v7348_v5 = vld [vmem:[%s11342_s1 + $0xc14] ss:$8 sps:$4 sm:$0xff]  }
   0x3   :  { %5708 = vmatprep.subr.bf16.mxu0 %v7342_v1  ;;  %5217 = vmatpush1.bf16.msra.mxu1 %v7344_v2  ;;  %v7350_v6 = vld [vmem:[%s11342_s1 + $0x10] ss:$8 sps:$4 sm:$0xff]   ;;  %v7352_v8 = vld [vmem:[%s11342_s1 + $0x24] ss:$8 sps:$4 sm:$0xff]   ;;  %v7356_v10 = vld [vmem:[%s11342_s1 + $0x20] ss:$8 sps:$4 sm:$0xff]   ;;  %v853_v43 = vunpack.c.0.s8 %v852_v38 }
   0x4   :  { %5709 = vmatpush1.bf16.msra.mxu0 %v7345_v3  ;;  %5218 = vmatprep.subr.bf16.mxu1 %v7346_v4  ;;  %v7351_v7 = vld [vmem:[%s11342_s1 + $0xc10] ss:$8 sps:$4 sm:$0xff]   ;;  %v7354_v9 = vld [vmem:[%s11342_s1 + $0xc24] ss:$8 sps:$4 sm:$0xff]   ;;  %v7357_v11 = vld [vmem:[%s11342_s1 + $0xc20] ss:$8 sps:$4 sm:$0xff]  }
   0x5   :  { %5710 = vmatprep.subr.bf16.mxu0 %v7348_v5  ;;  %v7358_v12 = vld [vmem:[%s11342_s1 + $0x34] ss:$8 sps:$4 sm:$0xff]   ;;  %v7362_v14 = vld [vmem:[%s11342_s1 + $0x30] ss:$8 sps:$4 sm:$0xff]   ;;  %v7364_v16 = vld [vmem:[%s11342_s1 + $0x44] ss:$8 sps:$4 sm:$0xff]  }
   0x6   :  { %v7360_v13 = vld [vmem:[%s11342_s1 + $0xc34] ss:$8 sps:$4 sm:$0xff]   ;;  %v7363_v15 = vld [vmem:[%s11342_s1 + $0xc30] ss:$8 sps:$4 sm:$0xff]   ;;  %v7366_v17 = vld [vmem:[%s11342_s1 + $0xc44] ss:$8 sps:$4 sm:$0xff]  }
   0x7   :  { %5219 = vmatpush1.bf16.msra.mxu1 %v7350_v6  ;;  %v7368_v18 = vld [vmem:[%s11342_s1 + $0x40] ss:$8 sps:$4 sm:$0xff]   ;;  %v7370_v20 = vld [vmem:[%s11342_s1 + $0x54] ss:$8 sps:$4 sm:$0xff]   ;;  %v7374_v22 = vld [vmem:[%s11342_s1 + $0x50] ss:$8 sps:$4 sm:$0xff]  }
   0x8   :  { %5711 = vmatpush1.bf16.msra.mxu0 %v7351_v7  ;;  %5220 = vmatprep.subr.bf16.mxu1 %v7352_v8  ;;  %v7369_v19 = vld [vmem:[%s11342_s1 + $0xc40] ss:$8 sps:$4 sm:$0xff]   ;;  %v7372_v21 = vld [vmem:[%s11342_s1 + $0xc54] ss:$8 sps:$4 sm:$0xff]   ;;  %v7375_v23 = vld [vmem:[%s11342_s1 + $0xc50] ss:$8 sps:$4 sm:$0xff]  }
   0x9   :  { %5712 = vmatprep.subr.bf16.mxu0 %v7354_v9  ;;  %v7376_v24 = vld [vmem:[%s11342_s1 + $0x64] ss:$8 sps:$4 sm:$0xff]   ;;  %v7380_v26 = vld [vmem:[%s11342_s1 + $0x60] ss:$8 sps:$4 sm:$0xff]   ;;  %v7382_v28 = vld [vmem:[%s11342_s1 + $0x74] ss:$8 sps:$4 sm:$0xff]  }
   0xa   :  { %v7378_v25 = vld [vmem:[%s11342_s1 + $0xc64] ss:$8 sps:$4 sm:$0xff]   ;;  %v7381_v27 = vld [vmem:[%s11342_s1 + $0xc60] ss:$8 sps:$4 sm:$0xff]   ;;  %v7384_v29 = vld [vmem:[%s11342_s1 + $0xc74] ss:$8 sps:$4 sm:$0xff]  }
   0xb   :  { %5221 = vmatpush1.bf16.msra.mxu1 %v7356_v10  ;;  %v7386_v30 = vld [vmem:[%s11342_s1 + $0x70] ss:$8 sps:$4 sm:$0xff]   ;;  %v7388_v32 = vld [vmem:[%s11342_s1 + $0x84] ss:$8 sps:$4 sm:$0xff]   ;;  %v7392_v34 = vld [vmem:[%s11342_s1 + $0x80] ss:$8 sps:$4 sm:$0xff]  }
   0xc   :  { %5713 = vmatpush1.bf16.msra.mxu0 %v7357_v11  ;;  %5222 = vmatprep.subr.bf16.mxu1 %v7358_v12  ;;  %v7387_v31 = vld [vmem:[%s11342_s1 + $0xc70] ss:$8 sps:$4 sm:$0xff]   ;;  %v7390_v33 = vld [vmem:[%s11342_s1 + $0xc84] ss:$8 sps:$4 sm:$0xff]   ;;  %v7393_v35 = vld [vmem:[%s11342_s1 + $0xc80] ss:$8 sps:$4 sm:$0xff]  }
   0xd   :  { %5714 = vmatprep.subr.bf16.mxu0 %v7360_v13  ;;  %v7394_v39 = vld [vmem:[%s11342_s1 + $0x94] ss:$8 sps:$4 sm:$0xff]   ;;  %v7398_v41 = vld [vmem:[%s11342_s1 + $0x90] ss:$8 sps:$4 sm:$0xff]   ;;  %v8743_v42 = vshrl.u32 %v833_v36, 7  ;;  %v8772_v52 = vld [vmem:[%s11341_s0] sm:$0xff] }
   0xe   :  { %v7396_v40 = vld [vmem:[%s11342_s1 + $0xc94] ss:$8 sps:$4 sm:$0xff]   ;;  %v7399_v44 = vld [vmem:[%s11342_s1 + $0xc90] ss:$8 sps:$4 sm:$0xff]   ;;  %v7400_v45 = vld [vmem:[%s11342_s1 + $0xa4] ss:$8 sps:$4 sm:$0xff]  }
   0xf   :  { %5223 = vmatpush1.bf16.msra.mxu1 %v7362_v14  ;;  %v7402_v46 = vld [vmem:[%s11342_s1 + $0xca4] ss:$8 sps:$4 sm:$0xff]   ;;  %v7404_v47 = vld [vmem:[%s11342_s1 + $0xa0] ss:$8 sps:$4 sm:$0xff]   ;;  %v8761_v49 = vsub.s32 %v853_v43, %v8743_v42  ;;  %v7406_v50 = vld [vmem:[%s11342_s1 + $0xb4] ss:$8 sps:$4 sm:$0xff]  }
  0x10   :  { %5715 = vmatpush1.bf16.msra.mxu0 %v7363_v15  ;;  %5224 = vmatprep.subr.bf16.mxu1 %v7364_v16  ;;  %v7405_v48 = vld [vmem:[%s11342_s1 + $0xca0] ss:$8 sps:$4 sm:$0xff]   ;;  %v7408_v51 = vld [vmem:[%s11342_s1 + $0xcb4] ss:$8 sps:$4 sm:$0xff]   ;;  %v7410_v53 = vld [vmem:[%s11342_s1 + $0xb0] ss:$8 sps:$4 sm:$0xff]  }
  0x11   :  { %5716 = vmatprep.subr.bf16.mxu0 %v7366_v17  ;;  %v857_v54 = vrot.slane %v8772_v52, %v8761_v49  ;;  %v7411_v55 = vld [vmem:[%s11342_s1 + $0xcb0] ss:$8 sps:$4 sm:$0xff]   ;;  %v7412_v57 = vld [vmem:[%s11342_s1 + $0xc4] ss:$8 sps:$4 sm:$0xff]   ;;  %v7416_v63 = vld [vmem:[%s11342_s1 + $0xc0] ss:$8 sps:$4 sm:$0xff]  }
  0x12   :  { %v8785_v56 = vld [vmem:[%s11341_s0 + $0x18] sm:$0xff]  ;;  %v7414_v58 = vld [vmem:[%s11342_s1 + $0xcc4] ss:$8 sps:$4 sm:$0xff]   ;;  %v7417_v0 = vld [vmem:[%s11342_s1 + $0xcc0] ss:$8 sps:$4 sm:$0xff]  }
  0x13   :  { %5225 = vmatpush1.bf16.msra.mxu1 %v7368_v18  ;;  %v865_v59 = vcombine.high %v857_v54, %v857_v54  ;;  %v1004_v60 = vrot.slane %v8785_v56, %v8761_v49  ;;  %v7418_v1 = vld [vmem:[%s11342_s1 + $0xd4] ss:$8 sps:$4 sm:$0xff]   ;;  %v7422_v4 = vld [vmem:[%s11342_s1 + $0xd0] ss:$8 sps:$4 sm:$0xff]   ;;  %v7424_v6 = vld [vmem:[%s11342_s1 + $0xe4] ss:$8 sps:$4 sm:$0xff]   ;;  %v8846_v16 = vrot.slane %v857_v54, %v8761_v49 }
  0x14   :  { %5717 = vmatpush1.bf16.msra.mxu0 %v7369_v19  ;;  %5226 = vmatprep.subr.bf16.mxu1 %v7370_v20  ;;  %v7420_v2 = vld [vmem:[%s11342_s1 + $0xcd4] ss:$8 sps:$4 sm:$0xff]   ;;  %v7423_v5 = vld [vmem:[%s11342_s1 + $0xcd0] ss:$8 sps:$4 sm:$0xff]   ;;  %v7426_v7 = vld [vmem:[%s11342_s1 + $0xce4] ss:$8 sps:$4 sm:$0xff]  }
  0x15   :  { %5718 = vmatprep.subr.bf16.mxu0 %v7372_v21  ;;  %v887_v61 = vrot.slane %v865_v59, %v8761_v49  ;;  %v1012_v62 = vcombine.high %v1004_v60, %v1004_v60  ;;  %v7428_v8 = vld [vmem:[%s11342_s1 + $0xe0] ss:$8 sps:$4 sm:$0xff]   ;;  %v7430_v10 = vld [vmem:[%s11342_s1 + $0xf4] ss:$8 sps:$4 sm:$0xff]   ;;  %v7434_v12 = vld [vmem:[%s11342_s1 + $0xf0] ss:$8 sps:$4 sm:$0xff]   ;;  %v8849_v17 = vrot.slane %v1004_v60, %v8761_v49 }
  0x16   :  { %v7429_v9 = vld [vmem:[%s11342_s1 + $0xce0] ss:$8 sps:$4 sm:$0xff]   ;;  %v7432_v11 = vld [vmem:[%s11342_s1 + $0xcf4] ss:$8 sps:$4 sm:$0xff]   ;;  %v7435_v13 = vld [vmem:[%s11342_s1 + $0xcf0] ss:$8 sps:$4 sm:$0xff]  }
  0x17   :  { %5227 = vmatpush1.bf16.msra.mxu1 %v7374_v22  ;;  %v1034_v3 = vrot.slane %v1012_v62, %v8761_v49  ;;  %5248 = vmatprep.mubr.bf16.mxu1 %v887_v61  ;;  %v7439_v14 = vld [vmem:[%s11342_s1 + $0x104] ss:$8 sps:$4 sm:$0xff]   ;;  %v7437_v18 = vld [vmem:[%s11342_s1 + $0x100] ss:$8 sps:$4 sm:$0xff]   ;;  %v7446_v20 = vld [vmem:[%s11342_s1 + $0x114] ss:$8 sps:$4 sm:$0xff]   ;;  %v897_v22 = vcombine.high %v887_v61, %v887_v61 }
  0x18   :  { %5719 = vmatpush1.bf16.msra.mxu0 %v7375_v23  ;;  %5228 = vmatprep.subr.bf16.mxu1 %v7376_v24  ;;  %v7443_v15 = vld [vmem:[%s11342_s1 + $0xd04] ss:$8 sps:$4 sm:$0xff]   ;;  %v7441_v19 = vld [vmem:[%s11342_s1 + $0xd00] ss:$8 sps:$4 sm:$0xff]   ;;  %v7449_v21 = vld [vmem:[%s11342_s1 + $0xd14] ss:$8 sps:$4 sm:$0xff]  }
  0x19   :  { %5720 = vmatprep.subr.bf16.mxu0 %v7378_v25  ;;  %5740 = vmatprep.mubr.bf16.mxu0 %v1034_v3  ;;  %v1044_v23 = vcombine.high %v1034_v3, %v1034_v3  ;;  %v7444_v24 = vld [vmem:[%s11342_s1 + $0x110] ss:$8 sps:$4 sm:$0xff]   ;;  %v7462_v36 = vld [vmem:[%s11342_s1 + $0x140] ss:$8 sps:$4 sm:$0xff]   ;;  %v7470_v38 = vld [vmem:[%s11342_s1 + $0x154] ss:$8 sps:$4 sm:$0xff]  }
  0x1a   :  { %v7447_v25 = vld [vmem:[%s11342_s1 + $0xd10] ss:$8 sps:$4 sm:$0xff]   ;;  %v7465_v37 = vld [vmem:[%s11342_s1 + $0xd40] ss:$8 sps:$4 sm:$0xff]   ;;  %v7476_v43 = vld [vmem:[%s11342_s1 + $0x164] ss:$8 sps:$4 sm:$0xff]  }
  0x1b   :  { %5229 = vmatpush1.bf16.msra.mxu1 %v7380_v26  ;;  %v7452_v26 = vld [vmem:[%s11342_s1 + $0x124] ss:$8 sps:$4 sm:$0xff]   ;;  %v7497_v59 = vld [vmem:[%s11342_s1 + $0xd94] ss:$8 sps:$4 sm:$0xff]   ;;  %v7492_v60 = vld [vmem:[%s11342_s1 + $0x190] ss:$8 sps:$4 sm:$0xff]  }
  0x1c   :  { %5721 = vmatpush1.bf16.msra.mxu0 %v7381_v27  ;;  %5230 = vmatprep.subr.bf16.mxu1 %v7382_v28  ;;  %v7455_v27 = vld [vmem:[%s11342_s1 + $0xd24] ss:$8 sps:$4 sm:$0xff]   ;;  %v7450_v28 = vld [vmem:[%s11342_s1 + $0x120] ss:$8 sps:$4 sm:$0xff]   ;;  %v7495_v61 = vld [vmem:[%s11342_s1 + $0xd90] ss:$8 sps:$4 sm:$0xff]  }
  0x1d   :  { %5722 = vmatprep.subr.bf16.mxu0 %v7384_v29  ;;  %v7453_v29 = vld [vmem:[%s11342_s1 + $0xd20] ss:$8 sps:$4 sm:$0xff]   ;;  %v7491_v54 = vld [vmem:[%s11342_s1 + $0xd84] ss:$8 sps:$4 sm:$0xff]   ;;  %v7509_v3 = vld [vmem:[%s11342_s1 + $0xdb4] ss:$8 sps:$4 sm:$0xff]  }
  0x1e   :  { %v7500_v62 = vld [vmem:[%s11342_s1 + $0x1a4] ss:$8 sps:$4 sm:$0xff]  }
  0x1f   :  { %5231 = vmatpush1.bf16.msra.mxu1 %v7386_v30  ;;  %v7458_v30 = vld [vmem:[%s11342_s1 + $0x134] ss:$8 sps:$4 sm:$0xff]  }
  0x20   :  { %5723 = vmatpush1.bf16.msra.mxu0 %v7387_v31  ;;  %5232 = vmatprep.subr.bf16.mxu1 %v7388_v32  ;;  %v7461_v31 = vld [vmem:[%s11342_s1 + $0xd34] ss:$8 sps:$4 sm:$0xff]   ;;  %v7456_v32 = vld [vmem:[%s11342_s1 + $0x130] ss:$8 sps:$4 sm:$0xff]  }
  0x21   :  { %5724 = vmatprep.subr.bf16.mxu0 %v7390_v33  ;;  %v7459_v33 = vld [vmem:[%s11342_s1 + $0xd30] ss:$8 sps:$4 sm:$0xff]  }
  0x23   :  { %5233 = vmatpush1.bf16.msra.mxu1 %v7392_v34  ;;  %v7464_v34 = vld [vmem:[%s11342_s1 + $0x144] ss:$8 sps:$4 sm:$0xff]  }
  0x24   :  { %5725 = vmatpush1.bf16.msra.mxu0 %v7393_v35  ;;  %5234 = vmatprep.subr.bf16.mxu1 %v7394_v39  ;;  %v7467_v35 = vld [vmem:[%s11342_s1 + $0xd44] ss:$8 sps:$4 sm:$0xff]   ;;  %v7473_v39 = vld [vmem:[%s11342_s1 + $0xd54] ss:$8 sps:$4 sm:$0xff]  }
  0x25   :  { %5726 = vmatprep.subr.bf16.mxu0 %v7396_v40  ;;  %v7468_v40 = vld [vmem:[%s11342_s1 + $0x150] ss:$8 sps:$4 sm:$0xff]  }
  0x27   :  { %5235 = vmatpush1.bf16.msra.mxu1 %v7398_v41  ;;  %v7471_v41 = vld [vmem:[%s11342_s1 + $0xd50] ss:$8 sps:$4 sm:$0xff]  }
  0x28   :  { %5727 = vmatpush1.bf16.msra.mxu0 %v7399_v44  ;;  %5236 = vmatprep.subr.bf16.mxu1 %v7400_v45  ;;  %v7479_v44 = vld [vmem:[%s11342_s1 + $0xd64] ss:$8 sps:$4 sm:$0xff]   ;;  %v7474_v45 = vld [vmem:[%s11342_s1 + $0x160] ss:$8 sps:$4 sm:$0xff]  }
  0x29   :  { %5728 = vmatprep.subr.bf16.mxu0 %v7402_v46  ;;  %v7477_v46 = vld [vmem:[%s11342_s1 + $0xd60] ss:$8 sps:$4 sm:$0xff]  }
  0x2b   :  { %5237 = vmatpush1.bf16.msra.mxu1 %v7404_v47  ;;  %v7482_v47 = vld [vmem:[%s11342_s1 + $0x174] ss:$8 sps:$4 sm:$0xff]  }
  0x2c   :  { %5729 = vmatpush1.bf16.msra.mxu0 %v7405_v48  ;;  %5238 = vmatprep.subr.bf16.mxu1 %v7406_v50  ;;  %v7485_v48 = vld [vmem:[%s11342_s1 + $0xd74] ss:$8 sps:$4 sm:$0xff]   ;;  %v7480_v50 = vld [vmem:[%s11342_s1 + $0x170] ss:$8 sps:$4 sm:$0xff]  }
  0x2d   :  { %5730 = vmatprep.subr.bf16.mxu0 %v7408_v51  ;;  %v7483_v51 = vld [vmem:[%s11342_s1 + $0xd70] ss:$8 sps:$4 sm:$0xff]  }
  0x2f   :  { %5239 = vmatpush1.bf16.msra.mxu1 %v7410_v53  ;;  %v7488_v53 = vld [vmem:[%s11342_s1 + $0x184] ss:$8 sps:$4 sm:$0xff]  }
  0x30   :  { %5731 = vmatpush1.bf16.msra.mxu0 %v7411_v55  ;;  %5240 = vmatprep.subr.bf16.mxu1 %v7412_v57  ;;  %v7486_v55 = vld [vmem:[%s11342_s1 + $0x180] ss:$8 sps:$4 sm:$0xff]  }
  0x31   :  { %5732 = vmatprep.subr.bf16.mxu0 %v7414_v58  ;;  %v7489_v57 = vld [vmem:[%s11342_s1 + $0xd80] ss:$8 sps:$4 sm:$0xff]   ;;  %v7494_v58 = vld [vmem:[%s11342_s1 + $0x194] ss:$8 sps:$4 sm:$0xff]  }
  0x33   :  { %5241 = vmatpush1.bf16.msra.mxu1 %v7416_v63  ;;  %v7503_v63 = vld [vmem:[%s11342_s1 + $0xda4] ss:$8 sps:$4 sm:$0xff]  }
  0x34   :  { %5733 = vmatpush1.bf16.msra.mxu0 %v7417_v0  ;;  %5242 = vmatprep.subr.bf16.mxu1 %v7418_v1  ;;  %v7498_v0 = vld [vmem:[%s11342_s1 + $0x1a0] ss:$8 sps:$4 sm:$0xff]  }
  0x35   :  { %5734 = vmatprep.subr.bf16.mxu0 %v7420_v2  ;;  %v7501_v1 = vld [vmem:[%s11342_s1 + $0xda0] ss:$8 sps:$4 sm:$0xff]   ;;  %v7506_v2 = vld [vmem:[%s11342_s1 + $0x1b4] ss:$8 sps:$4 sm:$0xff]  }
  0x37   :  { %5243 = vmatpush1.bf16.msra.mxu1 %v7422_v4  ;;  %v7504_v4 = vld [vmem:[%s11342_s1 + $0x1b0] ss:$8 sps:$4 sm:$0xff]  }
  0x38   :  { %5735 = vmatpush1.bf16.msra.mxu0 %v7423_v5  ;;  %5244 = vmatprep.subr.bf16.mxu1 %v7424_v6  ;;  %v7507_v5 = vld [vmem:[%s11342_s1 + $0xdb0] ss:$8 sps:$4 sm:$0xff]   ;;  %v7512_v6 = vld [vmem:[%s11342_s1 + $0x1c4] ss:$8 sps:$4 sm:$0xff]  }
  0x39   :  { %5736 = vmatprep.subr.bf16.mxu0 %v7426_v7  ;;  %v7515_v7 = vld [vmem:[%s11342_s1 + $0xdc4] ss:$8 sps:$4 sm:$0xff]  }
  0x3b   :  { %5245 = vmatpush1.bf16.msra.mxu1 %v7428_v8  ;;  %v7510_v8 = vld [vmem:[%s11342_s1 + $0x1c0] ss:$8 sps:$4 sm:$0xff]  }
  0x3c   :  { %5737 = vmatpush1.bf16.msra.mxu0 %v7429_v9  ;;  %5246 = vmatprep.subr.bf16.mxu1 %v7430_v10  ;;  %v7513_v9 = vld [vmem:[%s11342_s1 + $0xdc0] ss:$8 sps:$4 sm:$0xff]   ;;  %v7518_v10 = vld [vmem:[%s11342_s1 + $0x1d4] ss:$8 sps:$4 sm:$0xff]  }
  0x3d   :  { %5738 = vmatprep.subr.bf16.mxu0 %v7432_v11  ;;  %v7521_v11 = vld [vmem:[%s11342_s1 + $0xdd4] ss:$8 sps:$4 sm:$0xff]  }
  0x3f   :  { %5247 = vmatpush1.bf16.msra.mxu1 %v7434_v12  ;;  %v7516_v12 = vld [vmem:[%s11342_s1 + $0x1d0] ss:$8 sps:$4 sm:$0xff]  }
  0x40   :  { %5739 = vmatpush1.bf16.msra.mxu0 %v7435_v13  ;;  %5257 = vmatprep.subr.bf16.mxu1 %v7439_v14  ;;  %v7519_v13 = vld [vmem:[%s11342_s1 + $0xdd0] ss:$8 sps:$4 sm:$0xff]   ;;  %v7524_v14 = vld [vmem:[%s11342_s1 + $0x1e4] ss:$8 sps:$4 sm:$0xff]  }
  0x41   :  { %5749 = vmatprep.subr.bf16.mxu0 %v7443_v15  ;;  %v7527_v15 = vld [vmem:[%s11342_s1 + $0xde4] ss:$8 sps:$4 sm:$0xff]  }
  0x42   :  { %5249 = vmatmul.mubr.bf16.vlgmr.msra.gmra.mrb[0].mxu1 %v8846_v16 }
  0x43   :  { %5741 = vmatmul.mubr.bf16.vlgmr.msra.gmra.mrb[0].mxu0 %v8849_v17  ;;  %5258 = vmatpush1.bf16.msra.mxu1 %v7437_v18  ;;  %v850_v18 = vcombine.high %v8772_v52, %v8772_v52  ;;  %v7533_v52 = vld [vmem:[%s11342_s1 + $0xdf4] ss:$8 sps:$4 sm:$0xff]  }
  0x44   :  { %5750 = vmatpush1.bf16.msra.mxu0 %v7441_v19  ;;  %5259 = vmatprep.subr.bf16.mxu1 %v7446_v20  ;;  %v997_v19 = vcombine.high %v8785_v56, %v8785_v56  ;;  %v7522_v20 = vld [vmem:[%s11342_s1 + $0x1e0] ss:$8 sps:$4 sm:$0xff]  }
  0x45   :  { %5751 = vmatprep.subr.bf16.mxu0 %v7449_v21  ;;  %5289 = vmatprep.mubr.bf16.mxu1 %v897_v22  ;;  %v7525_v21 = vld [vmem:[%s11342_s1 + $0xde0] ss:$8 sps:$4 sm:$0xff]   ;;  %v7530_v22 = vld [vmem:[%s11342_s1 + $0x1f4] ss:$8 sps:$4 sm:$0xff]   ;;  %v9038_v56 = vrot.slane %v850_v18, %v8761_v49  ;;  %v7600_v18 = vld [vmem:[%s11342_s1 + $0x2b0] ss:$8 sps:$4 sm:$0xff]  }
  0x46   :  { %5781 = vmatprep.mubr.bf16.mxu0 %v1044_v23  ;;  %v9041_v23 = vrot.slane %v997_v19, %v8761_v49  ;;  %v7603_v19 = vld [vmem:[%s11342_s1 + $0xeb0] ss:$8 sps:$4 sm:$0xff]  }
  0x47   :  { %5260 = vmatpush1.bf16.msra.mxu1 %v7444_v24  ;;  %v7528_v24 = vld [vmem:[%s11342_s1 + $0x1f0] ss:$8 sps:$4 sm:$0xff]  }
  0x48   :  { %5752 = vmatpush1.bf16.msra.mxu0 %v7447_v25  ;;  %5261 = vmatprep.subr.bf16.mxu1 %v7452_v26  ;;  %v7531_v25 = vld [vmem:[%s11342_s1 + $0xdf0] ss:$8 sps:$4 sm:$0xff]   ;;  %v7536_v26 = vld [vmem:[%s11342_s1 + $0x204] ss:$8 sps:$4 sm:$0xff]  }
  0x49   :  { %5753 = vmatprep.subr.bf16.mxu0 %v7455_v27  ;;  %v7539_v27 = vld [vmem:[%s11342_s1 + $0xe04] ss:$8 sps:$4 sm:$0xff]  }
  0x4b   :  { %5262 = vmatpush1.bf16.msra.mxu1 %v7450_v28  ;;  %v866_v28 = vcombine.high %v9038_v56, %v9038_v56 }
  0x4c   :  { %5754 = vmatpush1.bf16.msra.mxu0 %v7453_v29  ;;  %5263 = vmatprep.subr.bf16.mxu1 %v7458_v30  ;;  %v1013_v29 = vcombine.high %v9041_v23, %v9041_v23  ;;  %v895_v30 = vcombine.high %v8846_v16, %v8846_v16  ;;  %v7545_v16 = vld [vmem:[%s11342_s1 + $0xe14] ss:$8 sps:$4 sm:$0xff]  }
  0x4d   :  { %5755 = vmatprep.subr.bf16.mxu0 %v7461_v31  ;;  %v1042_v31 = vcombine.high %v8849_v17, %v8849_v17  ;;  %v9076_v17 = vrot.slane %v866_v28, %v8761_v49  ;;  %v7620_v28 = vld [vmem:[%s11342_s1 + $0x2e4] ss:$8 sps:$4 sm:$0xff]  }
  0x4f   :  { %5264 = vmatpush1.bf16.msra.mxu1 %v7456_v32  ;;  %v7534_v32 = vld [vmem:[%s11342_s1 + $0x200] ss:$8 sps:$4 sm:$0xff]  }
  0x50   :  { %5756 = vmatpush1.bf16.msra.mxu0 %v7459_v33  ;;  %5265 = vmatprep.subr.bf16.mxu1 %v7464_v34  ;;  %v7537_v33 = vld [vmem:[%s11342_s1 + $0xe00] ss:$8 sps:$4 sm:$0xff]   ;;  %v7542_v34 = vld [vmem:[%s11342_s1 + $0x214] ss:$8 sps:$4 sm:$0xff]  }
  0x51   :  { %5757 = vmatprep.subr.bf16.mxu0 %v7467_v35  ;;  %v9079_v35 = vrot.slane %v1013_v29, %v8761_v49  ;;  %v7623_v29 = vld [vmem:[%s11342_s1 + $0xee4] ss:$8 sps:$4 sm:$0xff]  }
  0x53   :  { %5266 = vmatpush1.bf16.msra.mxu1 %v7462_v36  ;;  %v7540_v36 = vld [vmem:[%s11342_s1 + $0x210] ss:$8 sps:$4 sm:$0xff]  }
  0x54   :  { %5758 = vmatpush1.bf16.msra.mxu0 %v7465_v37  ;;  %5267 = vmatprep.subr.bf16.mxu1 %v7470_v38  ;;  %v7543_v37 = vld [vmem:[%s11342_s1 + $0xe10] ss:$8 sps:$4 sm:$0xff]   ;;  %v7548_v38 = vld [vmem:[%s11342_s1 + $0x224] ss:$8 sps:$4 sm:$0xff]  }
  0x55   :  { %5759 = vmatprep.subr.bf16.mxu0 %v7473_v39  ;;  %v7551_v39 = vld [vmem:[%s11342_s1 + $0xe24] ss:$8 sps:$4 sm:$0xff]  }
  0x57   :  { %5268 = vmatpush1.bf16.msra.mxu1 %v7468_v40  ;;  %v7546_v40 = vld [vmem:[%s11342_s1 + $0x220] ss:$8 sps:$4 sm:$0xff]  }
  0x58   :  { %5760 = vmatpush1.bf16.msra.mxu0 %v7471_v41  ;;  %5269 = vmatprep.subr.bf16.mxu1 %v7476_v43  ;;  %v7549_v41 = vld [vmem:[%s11342_s1 + $0xe20] ss:$8 sps:$4 sm:$0xff]   ;;  %v7554_v43 = vld [vmem:[%s11342_s1 + $0x234] ss:$8 sps:$4 sm:$0xff]  }
  0x59   :  { %5761 = vmatprep.subr.bf16.mxu0 %v7479_v44  ;;  %v7557_v44 = vld [vmem:[%s11342_s1 + $0xe34] ss:$8 sps:$4 sm:$0xff]  }
  0x5b   :  { %5270 = vmatpush1.bf16.msra.mxu1 %v7474_v45  ;;  %v7552_v45 = vld [vmem:[%s11342_s1 + $0x230] ss:$8 sps:$4 sm:$0xff]  }
  0x5c   :  { %5762 = vmatpush1.bf16.msra.mxu0 %v7477_v46  ;;  %5271 = vmatprep.subr.bf16.mxu1 %v7482_v47  ;;  %v7555_v46 = vld [vmem:[%s11342_s1 + $0xe30] ss:$8 sps:$4 sm:$0xff]   ;;  %v7560_v47 = vld [vmem:[%s11342_s1 + $0x244] ss:$8 sps:$4 sm:$0xff]  }
  0x5d   :  { %5763 = vmatprep.subr.bf16.mxu0 %v7485_v48  ;;  %v7563_v48 = vld [vmem:[%s11342_s1 + $0xe44] ss:$8 sps:$4 sm:$0xff]  }
  0x5f   :  { %5272 = vmatpush1.bf16.msra.mxu1 %v7480_v50  ;;  %v7558_v50 = vld [vmem:[%s11342_s1 + $0x240] ss:$8 sps:$4 sm:$0xff]  }
  0x60   :  { %5764 = vmatpush1.bf16.msra.mxu0 %v7483_v51  ;;  %5273 = vmatprep.subr.bf16.mxu1 %v7488_v53  ;;  %v7561_v51 = vld [vmem:[%s11342_s1 + $0xe40] ss:$8 sps:$4 sm:$0xff]   ;;  %v7566_v53 = vld [vmem:[%s11342_s1 + $0x254] ss:$8 sps:$4 sm:$0xff]  }
  0x61   :  { %5765 = vmatprep.subr.bf16.mxu0 %v7491_v54  ;;  %v7569_v54 = vld [vmem:[%s11342_s1 + $0xe54] ss:$8 sps:$4 sm:$0xff]  }
  0x63   :  { %5274 = vmatpush1.bf16.msra.mxu1 %v7486_v55  ;;  %v7564_v55 = vld [vmem:[%s11342_s1 + $0x250] ss:$8 sps:$4 sm:$0xff]  }
  0x64   :  { %5766 = vmatpush1.bf16.msra.mxu0 %v7489_v57  ;;  %5275 = vmatprep.subr.bf16.mxu1 %v7494_v58  ;;  %v7567_v57 = vld [vmem:[%s11342_s1 + $0xe50] ss:$8 sps:$4 sm:$0xff]   ;;  %v7572_v58 = vld [vmem:[%s11342_s1 + $0x264] ss:$8 sps:$4 sm:$0xff]  }
  0x65   :  { %5767 = vmatprep.subr.bf16.mxu0 %v7497_v59  ;;  %v7575_v59 = vld [vmem:[%s11342_s1 + $0xe64] ss:$8 sps:$4 sm:$0xff]  }
  0x67   :  { %5276 = vmatpush1.bf16.msra.mxu1 %v7492_v60  ;;  %v7570_v60 = vld [vmem:[%s11342_s1 + $0x260] ss:$8 sps:$4 sm:$0xff]  }
  0x68   :  { %5768 = vmatpush1.bf16.msra.mxu0 %v7495_v61  ;;  %5277 = vmatprep.subr.bf16.mxu1 %v7500_v62  ;;  %v7573_v61 = vld [vmem:[%s11342_s1 + $0xe60] ss:$8 sps:$4 sm:$0xff]   ;;  %v7578_v62 = vld [vmem:[%s11342_s1 + $0x274] ss:$8 sps:$4 sm:$0xff]  }
  0x69   :  { %5769 = vmatprep.subr.bf16.mxu0 %v7503_v63  ;;  %v7581_v63 = vld [vmem:[%s11342_s1 + $0xe74] ss:$8 sps:$4 sm:$0xff]  }
  0x6b   :  { %5278 = vmatpush1.bf16.msra.mxu1 %v7498_v0  ;;  %v7576_v0 = vld [vmem:[%s11342_s1 + $0x270] ss:$8 sps:$4 sm:$0xff]  }
  0x6c   :  { %5770 = vmatpush1.bf16.msra.mxu0 %v7501_v1  ;;  %5279 = vmatprep.subr.bf16.mxu1 %v7506_v2  ;;  %v7579_v1 = vld [vmem:[%s11342_s1 + $0xe70] ss:$8 sps:$4 sm:$0xff]   ;;  %v7584_v2 = vld [vmem:[%s11342_s1 + $0x284] ss:$8 sps:$4 sm:$0xff]  }
  0x6d   :  { %5771 = vmatprep.subr.bf16.mxu0 %v7509_v3  ;;  %v7587_v3 = vld [vmem:[%s11342_s1 + $0xe84] ss:$8 sps:$4 sm:$0xff]  }
  0x6f   :  { %5280 = vmatpush1.bf16.msra.mxu1 %v7504_v4  ;;  %v7582_v4 = vld [vmem:[%s11342_s1 + $0x280] ss:$8 sps:$4 sm:$0xff]  }
  0x70   :  { %5772 = vmatpush1.bf16.msra.mxu0 %v7507_v5  ;;  %5281 = vmatprep.subr.bf16.mxu1 %v7512_v6  ;;  %v7585_v5 = vld [vmem:[%s11342_s1 + $0xe80] ss:$8 sps:$4 sm:$0xff]   ;;  %v7590_v6 = vld [vmem:[%s11342_s1 + $0x294] ss:$8 sps:$4 sm:$0xff]  }
  0x71   :  { %5773 = vmatprep.subr.bf16.mxu0 %v7515_v7  ;;  %v7593_v7 = vld [vmem:[%s11342_s1 + $0xe94] ss:$8 sps:$4 sm:$0xff]  }
  0x73   :  { %5282 = vmatpush1.bf16.msra.mxu1 %v7510_v8  ;;  %v7588_v8 = vld [vmem:[%s11342_s1 + $0x290] ss:$8 sps:$4 sm:$0xff]  }
  0x74   :  { %5774 = vmatpush1.bf16.msra.mxu0 %v7513_v9  ;;  %5283 = vmatprep.subr.bf16.mxu1 %v7518_v10  ;;  %v7591_v9 = vld [vmem:[%s11342_s1 + $0xe90] ss:$8 sps:$4 sm:$0xff]   ;;  %v7596_v10 = vld [vmem:[%s11342_s1 + $0x2a4] ss:$8 sps:$4 sm:$0xff]  }
  0x75   :  { %5775 = vmatprep.subr.bf16.mxu0 %v7521_v11  ;;  %v7599_v11 = vld [vmem:[%s11342_s1 + $0xea4] ss:$8 sps:$4 sm:$0xff]  }
  0x77   :  { %5284 = vmatpush1.bf16.msra.mxu1 %v7516_v12  ;;  %v7594_v12 = vld [vmem:[%s11342_s1 + $0x2a0] ss:$8 sps:$4 sm:$0xff]  }
  0x78   :  { %5776 = vmatpush1.bf16.msra.mxu0 %v7519_v13  ;;  %5285 = vmatprep.subr.bf16.mxu1 %v7524_v14  ;;  %v7597_v13 = vld [vmem:[%s11342_s1 + $0xea0] ss:$8 sps:$4 sm:$0xff]   ;;  %v7602_v14 = vld [vmem:[%s11342_s1 + $0x2b4] ss:$8 sps:$4 sm:$0xff]  }
  0x79   :  { %5777 = vmatprep.subr.bf16.mxu0 %v7527_v15  ;;  %v7605_v15 = vld [vmem:[%s11342_s1 + $0xeb4] ss:$8 sps:$4 sm:$0xff]  }
  0x7b   :  { %5286 = vmatpush1.bf16.msra.mxu1 %v7522_v20  ;;  %v7608_v20 = vld [vmem:[%s11342_s1 + $0x2c4] ss:$8 sps:$4 sm:$0xff]  }
  0x7c   :  { %5778 = vmatpush1.bf16.msra.mxu0 %v7525_v21  ;;  %5287 = vmatprep.subr.bf16.mxu1 %v7530_v22  ;;  %v7611_v21 = vld [vmem:[%s11342_s1 + $0xec4] ss:$8 sps:$4 sm:$0xff]   ;;  %v7606_v22 = vld [vmem:[%s11342_s1 + $0x2c0] ss:$8 sps:$4 sm:$0xff]  }
  0x7d   :  { %5779 = vmatprep.subr.bf16.mxu0 %v7533_v52  ;;  %v7609_v52 = vld [vmem:[%s11342_s1 + $0xec0] ss:$8 sps:$4 sm:$0xff]  }
  0x7f   :  { %5288 = vmatpush1.bf16.msra.mxu1 %v7528_v24  ;;  %v7614_v24 = vld [vmem:[%s11342_s1 + $0x2d4] ss:$8 sps:$4 sm:$0xff]  }
  0x80   :  { %5780 = vmatpush1.bf16.msra.mxu0 %v7531_v25  ;;  %5298 = vmatprep.subr.bf16.mxu1 %v7536_v26  ;;  %v7617_v25 = vld [vmem:[%s11342_s1 + $0xed4] ss:$8 sps:$4 sm:$0xff]   ;;  %v7612_v26 = vld [vmem:[%s11342_s1 + $0x2d0] ss:$8 sps:$4 sm:$0xff]  }
  0x81   :  { %5790 = vmatprep.subr.bf16.mxu0 %v7539_v27  ;;  %v7615_v27 = vld [vmem:[%s11342_s1 + $0xed0] ss:$8 sps:$4 sm:$0xff]  }
  0x82   :  { %5290 = vmatmul.mubr.bf16.vlgmr.msra.gmra.mrb[0].mxu1 %v895_v30  ;;  %v7618_v30 = vld [vmem:[%s11342_s1 + $0x2e0] ss:$8 sps:$4 sm:$0xff]  }
  0x83   :  { %5782 = vmatmul.mubr.bf16.vlgmr.msra.gmra.mrb[0].mxu0 %v1042_v31  ;;  %5299 = vmatpush1.bf16.msra.mxu1 %v7534_v32  ;;  %v7621_v31 = vld [vmem:[%s11342_s1 + $0xee0] ss:$8 sps:$4 sm:$0xff]   ;;  %v7626_v32 = vld [vmem:[%s11342_s1 + $0x2f4] ss:$8 sps:$4 sm:$0xff]  }
  0x84   :  { %5791 = vmatpush1.bf16.msra.mxu0 %v7537_v33  ;;  %5300 = vmatprep.subr.bf16.mxu1 %v7542_v34  ;;  %v7629_v33 = vld [vmem:[%s11342_s1 + $0xef4] ss:$8 sps:$4 sm:$0xff]   ;;  %v7624_v34 = vld [vmem:[%s11342_s1 + $0x2f0] ss:$8 sps:$4 sm:$0xff]  }
  0x85   :  { %5792 = vmatprep.subr.bf16.mxu0 %v7545_v16  ;;  %5330 = vmatprep.mubr.bf16.mxu1 %v9076_v17  ;;  %v7627_v16 = vld [vmem:[%s11342_s1 + $0xef0] ss:$8 sps:$4 sm:$0xff]  }
  0x86   :  { %5822 = vmatprep.mubr.bf16.mxu0 %v9079_v35 }
  0x87   :  { %5301 = vmatpush1.bf16.msra.mxu1 %v7540_v36  ;;  %v7632_v36 = vld [vmem:[%s11342_s1 + $0x304] ss:$8 sps:$4 sm:$0xff]  }
  0x88   :  { %5793 = vmatpush1.bf16.msra.mxu0 %v7543_v37  ;;  %5302 = vmatprep.subr.bf16.mxu1 %v7548_v38  ;;  %v7635_v37 = vld [vmem:[%s11342_s1 + $0xf04] ss:$8 sps:$4 sm:$0xff]   ;;  %v9265_v38 = vrot.slane %v9038_v56, %v8761_v49  ;;  %v7638_v56 = vld [vmem:[%s11342_s1 + $0x314] ss:$8 sps:$4 sm:$0xff]  }
  0x89   :  { %5794 = vmatprep.subr.bf16.mxu0 %v7551_v39  ;;  %v9269_v39 = vrot.slane %v9041_v23, %v8761_v49  ;;  %v7641_v23 = vld [vmem:[%s11342_s1 + $0xf14] ss:$8 sps:$4 sm:$0xff]  }
  0x8b   :  { %5303 = vmatpush1.bf16.msra.mxu1 %v7546_v40  ;;  %v7630_v40 = vld [vmem:[%s11342_s1 + $0x300] ss:$8 sps:$4 sm:$0xff]  }
  0x8c   :  { %5795 = vmatpush1.bf16.msra.mxu0 %v7549_v41  ;;  %5304 = vmatprep.subr.bf16.mxu1 %v7554_v43  ;;  %v7633_v41 = vld [vmem:[%s11342_s1 + $0xf00] ss:$8 sps:$4 sm:$0xff]   ;;  %v898_v43 = vcombine.high %v9076_v17, %v9076_v17  ;;  %v7644_v17 = vld [vmem:[%s11342_s1 + $0x324] ss:$8 sps:$4 sm:$0xff]  }
  0x8d   :  { %5796 = vmatprep.subr.bf16.mxu0 %v7557_v44  ;;  %v1045_v44 = vcombine.high %v9079_v35, %v9079_v35  ;;  %v7647_v35 = vld [vmem:[%s11342_s1 + $0xf24] ss:$8 sps:$4 sm:$0xff]  }
  0x8f   :  { %5305 = vmatpush1.bf16.msra.mxu1 %v7552_v45  ;;  %v7636_v45 = vld [vmem:[%s11342_s1 + $0x310] ss:$8 sps:$4 sm:$0xff]  }
  0x90   :  { %5797 = vmatpush1.bf16.msra.mxu0 %v7555_v46  ;;  %5306 = vmatprep.subr.bf16.mxu1 %v7560_v47  ;;  %v7639_v46 = vld [vmem:[%s11342_s1 + $0xf10] ss:$8 sps:$4 sm:$0xff]   ;;  %v7642_v47 = vld [vmem:[%s11342_s1 + $0x320] ss:$8 sps:$4 sm:$0xff]  }
  0x91   :  { %5798 = vmatprep.subr.bf16.mxu0 %v7563_v48  ;;  %v7645_v48 = vld [vmem:[%s11342_s1 + $0xf20] ss:$8 sps:$4 sm:$0xff]  }
  0x93   :  { %5307 = vmatpush1.bf16.msra.mxu1 %v7558_v50  ;;  %v7650_v50 = vld [vmem:[%s11342_s1 + $0x334] ss:$8 sps:$4 sm:$0xff]  }
  0x94   :  { %5799 = vmatpush1.bf16.msra.mxu0 %v7561_v51  ;;  %5308 = vmatprep.subr.bf16.mxu1 %v7566_v53  ;;  %v7653_v51 = vld [vmem:[%s11342_s1 + $0xf34] ss:$8 sps:$4 sm:$0xff]   ;;  %v7648_v53 = vld [vmem:[%s11342_s1 + $0x330] ss:$8 sps:$4 sm:$0xff]  }
  0x95   :  { %5800 = vmatprep.subr.bf16.mxu0 %v7569_v54  ;;  %v7651_v54 = vld [vmem:[%s11342_s1 + $0xf30] ss:$8 sps:$4 sm:$0xff]  }
  0x97   :  { %5309 = vmatpush1.bf16.msra.mxu1 %v7564_v55  ;;  %v7656_v55 = vld [vmem:[%s11342_s1 + $0x344] ss:$8 sps:$4 sm:$0xff]  }
  0x98   :  { %5801 = vmatpush1.bf16.msra.mxu0 %v7567_v57  ;;  %5310 = vmatprep.subr.bf16.mxu1 %v7572_v58  ;;  %v7659_v57 = vld [vmem:[%s11342_s1 + $0xf44] ss:$8 sps:$4 sm:$0xff]   ;;  %v7654_v58 = vld [vmem:[%s11342_s1 + $0x340] ss:$8 sps:$4 sm:$0xff]  }
  0x99   :  { %5802 = vmatprep.subr.bf16.mxu0 %v7575_v59  ;;  %v7657_v59 = vld [vmem:[%s11342_s1 + $0xf40] ss:$8 sps:$4 sm:$0xff]  }
  0x9b   :  { %5311 = vmatpush1.bf16.msra.mxu1 %v7570_v60  ;;  %v7662_v60 = vld [vmem:[%s11342_s1 + $0x354] ss:$8 sps:$4 sm:$0xff]  }
  0x9c   :  { %5803 = vmatpush1.bf16.msra.mxu0 %v7573_v61  ;;  %5312 = vmatprep.subr.bf16.mxu1 %v7578_v62  ;;  %v7665_v61 = vld [vmem:[%s11342_s1 + $0xf54] ss:$8 sps:$4 sm:$0xff]   ;;  %v7660_v62 = vld [vmem:[%s11342_s1 + $0x350] ss:$8 sps:$4 sm:$0xff]  }
  0x9d   :  { %5804 = vmatprep.subr.bf16.mxu0 %v7581_v63  ;;  %v7663_v63 = vld [vmem:[%s11342_s1 + $0xf50] ss:$8 sps:$4 sm:$0xff]  }
  0x9f   :  { %5313 = vmatpush1.bf16.msra.mxu1 %v7576_v0  ;;  %v7668_v0 = vld [vmem:[%s11342_s1 + $0x364] ss:$8 sps:$4 sm:$0xff]  }
  0xa0   :  { %5805 = vmatpush1.bf16.msra.mxu0 %v7579_v1  ;;  %5314 = vmatprep.subr.bf16.mxu1 %v7584_v2  ;;  %v7671_v1 = vld [vmem:[%s11342_s1 + $0xf64] ss:$8 sps:$4 sm:$0xff]   ;;  %v7666_v2 = vld [vmem:[%s11342_s1 + $0x360] ss:$8 sps:$4 sm:$0xff]  }
  0xa1   :  { %5806 = vmatprep.subr.bf16.mxu0 %v7587_v3  ;;  %v7669_v3 = vld [vmem:[%s11342_s1 + $0xf60] ss:$8 sps:$4 sm:$0xff]  }
  0xa3   :  { %5315 = vmatpush1.bf16.msra.mxu1 %v7582_v4  ;;  %v7674_v4 = vld [vmem:[%s11342_s1 + $0x374] ss:$8 sps:$4 sm:$0xff]  }
  0xa4   :  { %5807 = vmatpush1.bf16.msra.mxu0 %v7585_v5  ;;  %5316 = vmatprep.subr.bf16.mxu1 %v7590_v6  ;;  %v7677_v5 = vld [vmem:[%s11342_s1 + $0xf74] ss:$8 sps:$4 sm:$0xff]   ;;  %v7672_v6 = vld [vmem:[%s11342_s1 + $0x370] ss:$8 sps:$4 sm:$0xff]  }
  0xa5   :  { %5808 = vmatprep.subr.bf16.mxu0 %v7593_v7  ;;  %v7675_v7 = vld [vmem:[%s11342_s1 + $0xf70] ss:$8 sps:$4 sm:$0xff]  }
  0xa7   :  { %5317 = vmatpush1.bf16.msra.mxu1 %v7588_v8  ;;  %v7680_v8 = vld [vmem:[%s11342_s1 + $0x384] ss:$8 sps:$4 sm:$0xff]  }
  0xa8   :  { %5809 = vmatpush1.bf16.msra.mxu0 %v7591_v9  ;;  %5318 = vmatprep.subr.bf16.mxu1 %v7596_v10  ;;  %v7683_v9 = vld [vmem:[%s11342_s1 + $0xf84] ss:$8 sps:$4 sm:$0xff]   ;;  %v7678_v10 = vld [vmem:[%s11342_s1 + $0x380] ss:$8 sps:$4 sm:$0xff]  }
  0xa9   :  { %5810 = vmatprep.subr.bf16.mxu0 %v7599_v11  ;;  %v7681_v11 = vld [vmem:[%s11342_s1 + $0xf80] ss:$8 sps:$4 sm:$0xff]  }
  0xab   :  { %5319 = vmatpush1.bf16.msra.mxu1 %v7594_v12  ;;  %v7686_v12 = vld [vmem:[%s11342_s1 + $0x394] ss:$8 sps:$4 sm:$0xff]  }
  0xac   :  { %5811 = vmatpush1.bf16.msra.mxu0 %v7597_v13  ;;  %5320 = vmatprep.subr.bf16.mxu1 %v7602_v14  ;;  %v7689_v13 = vld [vmem:[%s11342_s1 + $0xf94] ss:$8 sps:$4 sm:$0xff]   ;;  %v7684_v14 = vld [vmem:[%s11342_s1 + $0x390] ss:$8 sps:$4 sm:$0xff]  }
  0xad   :  { %5812 = vmatprep.subr.bf16.mxu0 %v7605_v15  ;;  %v7687_v15 = vld [vmem:[%s11342_s1 + $0xf90] ss:$8 sps:$4 sm:$0xff]  }
  0xaf   :  { %5321 = vmatpush1.bf16.msra.mxu1 %v7600_v18  ;;  %v7692_v18 = vld [vmem:[%s11342_s1 + $0x3a4] ss:$8 sps:$4 sm:$0xff]  }
  0xb0   :  { %5813 = vmatpush1.bf16.msra.mxu0 %v7603_v19  ;;  %5322 = vmatprep.subr.bf16.mxu1 %v7608_v20  ;;  %v7695_v19 = vld [vmem:[%s11342_s1 + $0xfa4] ss:$8 sps:$4 sm:$0xff]   ;;  %v7690_v20 = vld [vmem:[%s11342_s1 + $0x3a0] ss:$8 sps:$4 sm:$0xff]  }
  0xb1   :  { %5814 = vmatprep.subr.bf16.mxu0 %v7611_v21  ;;  %v7693_v21 = vld [vmem:[%s11342_s1 + $0xfa0] ss:$8 sps:$4 sm:$0xff]  }
  0xb3   :  { %5323 = vmatpush1.bf16.msra.mxu1 %v7606_v22  ;;  %v7698_v22 = vld [vmem:[%s11342_s1 + $0x3b4] ss:$8 sps:$4 sm:$0xff]  }
  0xb4   :  { %5815 = vmatpush1.bf16.msra.mxu0 %v7609_v52  ;;  %5324 = vmatprep.subr.bf16.mxu1 %v7614_v24  ;;  %v7701_v52 = vld [vmem:[%s11342_s1 + $0xfb4] ss:$8 sps:$4 sm:$0xff]   ;;  %v7696_v24 = vld [vmem:[%s11342_s1 + $0x3b0] ss:$8 sps:$4 sm:$0xff]  }
  0xb5   :  { %5816 = vmatprep.subr.bf16.mxu0 %v7617_v25  ;;  %v7699_v25 = vld [vmem:[%s11342_s1 + $0xfb0] ss:$8 sps:$4 sm:$0xff]  }
  0xb7   :  { %5325 = vmatpush1.bf16.msra.mxu1 %v7612_v26  ;;  %v7704_v26 = vld [vmem:[%s11342_s1 + $0x3c4] ss:$8 sps:$4 sm:$0xff]  }
  0xb8   :  { %5817 = vmatpush1.bf16.msra.mxu0 %v7615_v27  ;;  %5326 = vmatprep.subr.bf16.mxu1 %v7620_v28  ;;  %v7707_v27 = vld [vmem:[%s11342_s1 + $0xfc4] ss:$8 sps:$4 sm:$0xff]   ;;  %v7702_v28 = vld [vmem:[%s11342_s1 + $0x3c0] ss:$8 sps:$4 sm:$0xff]  }
  0xb9   :  { %5818 = vmatprep.subr.bf16.mxu0 %v7623_v29  ;;  %v7705_v29 = vld [vmem:[%s11342_s1 + $0xfc0] ss:$8 sps:$4 sm:$0xff]  }
  0xbb   :  { %5327 = vmatpush1.bf16.msra.mxu1 %v7618_v30  ;;  %v7710_v30 = vld [vmem:[%s11342_s1 + $0x3d4] ss:$8 sps:$4 sm:$0xff]  }
  0xbc   :  { %5819 = vmatpush1.bf16.msra.mxu0 %v7621_v31  ;;  %5328 = vmatprep.subr.bf16.mxu1 %v7626_v32  ;;  %v7713_v31 = vld [vmem:[%s11342_s1 + $0xfd4] ss:$8 sps:$4 sm:$0xff]   ;;  %v7708_v32 = vld [vmem:[%s11342_s1 + $0x3d0] ss:$8 sps:$4 sm:$0xff]  }
  0xbd   :  { %5820 = vmatprep.subr.bf16.mxu0 %v7629_v33  ;;  %v7711_v33 = vld [vmem:[%s11342_s1 + $0xfd0] ss:$8 sps:$4 sm:$0xff]  }
  0xbf   :  { %5329 = vmatpush1.bf16.msra.mxu1 %v7624_v34  ;;  %v7716_v34 = vld [vmem:[%s11342_s1 + $0x3e4] ss:$8 sps:$4 sm:$0xff]  }
  0xc0   :  { %5821 = vmatpush1.bf16.msra.mxu0 %v7627_v16  ;;  %5339 = vmatprep.subr.bf16.mxu1 %v7632_v36  ;;  %v7719_v16 = vld [vmem:[%s11342_s1 + $0xfe4] ss:$8 sps:$4 sm:$0xff]   ;;  %v7714_v36 = vld [vmem:[%s11342_s1 + $0x3e0] ss:$8 sps:$4 sm:$0xff]  }
  0xc1   :  { %5831 = vmatprep.subr.bf16.mxu0 %v7635_v37  ;;  %v7717_v37 = vld [vmem:[%s11342_s1 + $0xfe0] ss:$8 sps:$4 sm:$0xff]  }
  0xc2   :  { %5331 = vmatmul.mubr.bf16.vlgmr.msra.gmra.mrb[0].mxu1 %v9265_v38 }
  0xc3   :  { %5823 = vmatmul.mubr.bf16.vlgmr.msra.gmra.mrb[0].mxu0 %v9269_v39  ;;  %5340 = vmatpush1.bf16.msra.mxu1 %v7630_v40  ;;  %v9454_v40 = vld.sshfl [vmem:[%s11341_s0 + $0x8] sm:$0xff pattern:$0x75316420] }
  0xc4   :  { %5832 = vmatpush1.bf16.msra.mxu0 %v7633_v41  ;;  %5341 = vmatprep.subr.bf16.mxu1 %v7638_v56  ;;  %v9459_v41 = vld.sshfl [vmem:[%s11341_s0 + $0x20] sm:$0xff pattern:$0x75316420]  ;;  %v7722_v56 = vld [vmem:[%s11342_s1 + $0x3f4] ss:$8 sps:$4 sm:$0xff]  }
  0xc5   :  { %5833 = vmatprep.subr.bf16.mxu0 %v7641_v23  ;;  %5371 = vmatprep.mubr.bf16.mxu1 %v898_v43  ;;  %v7725_v23 = vld [vmem:[%s11342_s1 + $0xff4] ss:$8 sps:$4 sm:$0xff]   ;;  %v7720_v43 = vld [vmem:[%s11342_s1 + $0x3f0] ss:$8 sps:$4 sm:$0xff]  }
  0xc6   :  { %5863 = vmatprep.mubr.bf16.mxu0 %v1045_v44  ;;  %v7723_v44 = vld [vmem:[%s11342_s1 + $0xff0] ss:$8 sps:$4 sm:$0xff]  }
  0xc7   :  { %5342 = vmatpush1.bf16.msra.mxu1 %v7636_v45  ;;  %v7728_v45 = vld [vmem:[%s11342_s1 + $0x404] ss:$8 sps:$4 sm:$0xff]  }
  0xc8   :  { %5834 = vmatpush1.bf16.msra.mxu0 %v7639_v46  ;;  %5343 = vmatprep.subr.bf16.mxu1 %v7644_v17  ;;  %v7731_v46 = vld [vmem:[%s11342_s1 + $0x1004] ss:$8 sps:$4 sm:$0xff]   ;;  %v914_v17 = vcombine.high %v9454_v40, %v9454_v40 }
  0xc9   :  { %5835 = vmatprep.subr.bf16.mxu0 %v7647_v35  ;;  %v1061_v35 = vcombine.high %v9459_v41, %v9459_v41 }
  0xcb   :  { %5344 = vmatpush1.bf16.msra.mxu1 %v7642_v47  ;;  %v7726_v47 = vld [vmem:[%s11342_s1 + $0x400] ss:$8 sps:$4 sm:$0xff]  }
  0xcc   :  { %5836 = vmatpush1.bf16.msra.mxu0 %v7645_v48  ;;  %5345 = vmatprep.subr.bf16.mxu1 %v7650_v50  ;;  %v7729_v48 = vld [vmem:[%s11342_s1 + $0x1000] ss:$8 sps:$4 sm:$0xff]   ;;  %v896_v50 = vcombine.high %v9265_v38, %v9265_v38  ;;  %v9503_v38 = vrot.slane %v1061_v35, %v8761_v49  ;;  %v7815_v35 = vld [vmem:[%s11342_s1 + $0x10e4] ss:$8 sps:$4 sm:$0xff]  }
  0xcd   :  { %5837 = vmatprep.subr.bf16.mxu0 %v7653_v51  ;;  %v1043_v51 = vcombine.high %v9269_v39, %v9269_v39  ;;  %v7732_v39 = vld [vmem:[%s11342_s1 + $0x410] ss:$8 sps:$4 sm:$0xff]  }
  0xcf   :  { %5346 = vmatpush1.bf16.msra.mxu1 %v7648_v53  ;;  %v7734_v53 = vld [vmem:[%s11342_s1 + $0x414] ss:$8 sps:$4 sm:$0xff]  }
  0xd0   :  { %5838 = vmatpush1.bf16.msra.mxu0 %v7651_v54  ;;  %5347 = vmatprep.subr.bf16.mxu1 %v7656_v55  ;;  %v7737_v54 = vld [vmem:[%s11342_s1 + $0x1014] ss:$8 sps:$4 sm:$0xff]   ;;  %v9500_v55 = vrot.slane %v914_v17, %v8761_v49  ;;  %v7812_v17 = vld [vmem:[%s11342_s1 + $0x4e4] ss:$8 sps:$4 sm:$0xff]  }
  0xd1   :  { %5839 = vmatprep.subr.bf16.mxu0 %v7659_v57  ;;  %v7735_v57 = vld [vmem:[%s11342_s1 + $0x1010] ss:$8 sps:$4 sm:$0xff]  }
  0xd3   :  { %5348 = vmatpush1.bf16.msra.mxu1 %v7654_v58  ;;  %v7740_v58 = vld [vmem:[%s11342_s1 + $0x424] ss:$8 sps:$4 sm:$0xff]  }
  0xd4   :  { %5840 = vmatpush1.bf16.msra.mxu0 %v7657_v59  ;;  %5349 = vmatprep.subr.bf16.mxu1 %v7662_v60  ;;  %v7743_v59 = vld [vmem:[%s11342_s1 + $0x1024] ss:$8 sps:$4 sm:$0xff]   ;;  %v7738_v60 = vld [vmem:[%s11342_s1 + $0x420] ss:$8 sps:$4 sm:$0xff]  }
  0xd5   :  { %5841 = vmatprep.subr.bf16.mxu0 %v7665_v61  ;;  %v7741_v61 = vld [vmem:[%s11342_s1 + $0x1020] ss:$8 sps:$4 sm:$0xff]  }
  0xd7   :  { %5350 = vmatpush1.bf16.msra.mxu1 %v7660_v62  ;;  %v7746_v62 = vld [vmem:[%s11342_s1 + $0x434] ss:$8 sps:$4 sm:$0xff]  }
  0xd8   :  { %5842 = vmatpush1.bf16.msra.mxu0 %v7663_v63  ;;  %5351 = vmatprep.subr.bf16.mxu1 %v7668_v0  ;;  %v7749_v63 = vld [vmem:[%s11342_s1 + $0x1034] ss:$8 sps:$4 sm:$0xff]   ;;  %v7744_v0 = vld [vmem:[%s11342_s1 + $0x430] ss:$8 sps:$4 sm:$0xff]  }
  0xd9   :  { %5843 = vmatprep.subr.bf16.mxu0 %v7671_v1  ;;  %v7747_v1 = vld [vmem:[%s11342_s1 + $0x1030] ss:$8 sps:$4 sm:$0xff]  }
  0xdb   :  { %5352 = vmatpush1.bf16.msra.mxu1 %v7666_v2  ;;  %v7752_v2 = vld [vmem:[%s11342_s1 + $0x444] ss:$8 sps:$4 sm:$0xff]  }
  0xdc   :  { %5844 = vmatpush1.bf16.msra.mxu0 %v7669_v3  ;;  %5353 = vmatprep.subr.bf16.mxu1 %v7674_v4  ;;  %v7755_v3 = vld [vmem:[%s11342_s1 + $0x1044] ss:$8 sps:$4 sm:$0xff]   ;;  %v7750_v4 = vld [vmem:[%s11342_s1 + $0x440] ss:$8 sps:$4 sm:$0xff]  }
  0xdd   :  { %5845 = vmatprep.subr.bf16.mxu0 %v7677_v5  ;;  %v7753_v5 = vld [vmem:[%s11342_s1 + $0x1040] ss:$8 sps:$4 sm:$0xff]  }
  0xdf   :  { %5354 = vmatpush1.bf16.msra.mxu1 %v7672_v6  ;;  %v7758_v6 = vld [vmem:[%s11342_s1 + $0x454] ss:$8 sps:$4 sm:$0xff]  }
  0xe0   :  { %5846 = vmatpush1.bf16.msra.mxu0 %v7675_v7  ;;  %5355 = vmatprep.subr.bf16.mxu1 %v7680_v8  ;;  %v7761_v7 = vld [vmem:[%s11342_s1 + $0x1054] ss:$8 sps:$4 sm:$0xff]   ;;  %v7756_v8 = vld [vmem:[%s11342_s1 + $0x450] ss:$8 sps:$4 sm:$0xff]  }
  0xe1   :  { %5847 = vmatprep.subr.bf16.mxu0 %v7683_v9  ;;  %v7759_v9 = vld [vmem:[%s11342_s1 + $0x1050] ss:$8 sps:$4 sm:$0xff]  }
  0xe3   :  { %5356 = vmatpush1.bf16.msra.mxu1 %v7678_v10  ;;  %v7764_v10 = vld [vmem:[%s11342_s1 + $0x464] ss:$8 sps:$4 sm:$0xff]  }
  0xe4   :  { %5848 = vmatpush1.bf16.msra.mxu0 %v7681_v11  ;;  %5357 = vmatprep.subr.bf16.mxu1 %v7686_v12  ;;  %v7767_v11 = vld [vmem:[%s11342_s1 + $0x1064] ss:$8 sps:$4 sm:$0xff]   ;;  %v7762_v12 = vld [vmem:[%s11342_s1 + $0x460] ss:$8 sps:$4 sm:$0xff]  }
  0xe5   :  { %5849 = vmatprep.subr.bf16.mxu0 %v7689_v13  ;;  %v7765_v13 = vld [vmem:[%s11342_s1 + $0x1060] ss:$8 sps:$4 sm:$0xff]  }
  0xe7   :  { %5358 = vmatpush1.bf16.msra.mxu1 %v7684_v14  ;;  %v7770_v14 = vld [vmem:[%s11342_s1 + $0x474] ss:$8 sps:$4 sm:$0xff]  }
  0xe8   :  { %5850 = vmatpush1.bf16.msra.mxu0 %v7687_v15  ;;  %5359 = vmatprep.subr.bf16.mxu1 %v7692_v18  ;;  %v7773_v15 = vld [vmem:[%s11342_s1 + $0x1074] ss:$8 sps:$4 sm:$0xff]   ;;  %v7768_v18 = vld [vmem:[%s11342_s1 + $0x470] ss:$8 sps:$4 sm:$0xff]  }
  0xe9   :  { %5851 = vmatprep.subr.bf16.mxu0 %v7695_v19  ;;  %v7771_v19 = vld [vmem:[%s11342_s1 + $0x1070] ss:$8 sps:$4 sm:$0xff]  }
  0xeb   :  { %5360 = vmatpush1.bf16.msra.mxu1 %v7690_v20  ;;  %v7776_v20 = vld [vmem:[%s11342_s1 + $0x484] ss:$8 sps:$4 sm:$0xff]  }
  0xec   :  { %5852 = vmatpush1.bf16.msra.mxu0 %v7693_v21  ;;  %5361 = vmatprep.subr.bf16.mxu1 %v7698_v22  ;;  %v7779_v21 = vld [vmem:[%s11342_s1 + $0x1084] ss:$8 sps:$4 sm:$0xff]   ;;  %v7774_v22 = vld [vmem:[%s11342_s1 + $0x480] ss:$8 sps:$4 sm:$0xff]  }
  0xed   :  { %5853 = vmatprep.subr.bf16.mxu0 %v7701_v52  ;;  %v7777_v52 = vld [vmem:[%s11342_s1 + $0x1080] ss:$8 sps:$4 sm:$0xff]  }
  0xef   :  { %5362 = vmatpush1.bf16.msra.mxu1 %v7696_v24  ;;  %v7782_v24 = vld [vmem:[%s11342_s1 + $0x494] ss:$8 sps:$4 sm:$0xff]  }
  0xf0   :  { %5854 = vmatpush1.bf16.msra.mxu0 %v7699_v25  ;;  %5363 = vmatprep.subr.bf16.mxu1 %v7704_v26  ;;  %v7785_v25 = vld [vmem:[%s11342_s1 + $0x1094] ss:$8 sps:$4 sm:$0xff]   ;;  %v7780_v26 = vld [vmem:[%s11342_s1 + $0x490] ss:$8 sps:$4 sm:$0xff]  }
  0xf1   :  { %5855 = vmatprep.subr.bf16.mxu0 %v7707_v27  ;;  %v7783_v27 = vld [vmem:[%s11342_s1 + $0x1090] ss:$8 sps:$4 sm:$0xff]  }
  0xf3   :  { %5364 = vmatpush1.bf16.msra.mxu1 %v7702_v28  ;;  %v7788_v28 = vld [vmem:[%s11342_s1 + $0x4a4] ss:$8 sps:$4 sm:$0xff]  }
  0xf4   :  { %5856 = vmatpush1.bf16.msra.mxu0 %v7705_v29  ;;  %5365 = vmatprep.subr.bf16.mxu1 %v7710_v30  ;;  %v7791_v29 = vld [vmem:[%s11342_s1 + $0x10a4] ss:$8 sps:$4 sm:$0xff]   ;;  %v7786_v30 = vld [vmem:[%s11342_s1 + $0x4a0] ss:$8 sps:$4 sm:$0xff]  }
  0xf5   :  { %5857 = vmatprep.subr.bf16.mxu0 %v7713_v31  ;;  %v7789_v31 = vld [vmem:[%s11342_s1 + $0x10a0] ss:$8 sps:$4 sm:$0xff]  }
  0xf7   :  { %5366 = vmatpush1.bf16.msra.mxu1 %v7708_v32  ;;  %v7794_v32 = vld [vmem:[%s11342_s1 + $0x4b4] ss:$8 sps:$4 sm:$0xff]  }
  0xf8   :  { %5858 = vmatpush1.bf16.msra.mxu0 %v7711_v33  ;;  %5367 = vmatprep.subr.bf16.mxu1 %v7716_v34  ;;  %v7797_v33 = vld [vmem:[%s11342_s1 + $0x10b4] ss:$8 sps:$4 sm:$0xff]   ;;  %v7792_v34 = vld [vmem:[%s11342_s1 + $0x4b0] ss:$8 sps:$4 sm:$0xff]  }
  0xf9   :  { %5859 = vmatprep.subr.bf16.mxu0 %v7719_v16  ;;  %v7795_v16 = vld [vmem:[%s11342_s1 + $0x10b0] ss:$8 sps:$4 sm:$0xff]  }
  0xfb   :  { %5368 = vmatpush1.bf16.msra.mxu1 %v7714_v36  ;;  %v7800_v36 = vld [vmem:[%s11342_s1 + $0x4c4] ss:$8 sps:$4 sm:$0xff]  }
  0xfc   :  { %5860 = vmatpush1.bf16.msra.mxu0 %v7717_v37  ;;  %5369 = vmatprep.subr.bf16.mxu1 %v7722_v56  ;;  %v7803_v37 = vld [vmem:[%s11342_s1 + $0x10c4] ss:$8 sps:$4 sm:$0xff]   ;;  %v7798_v56 = vld [vmem:[%s11342_s1 + $0x4c0] ss:$8 sps:$4 sm:$0xff]  }
  0xfd   :  { %5861 = vmatprep.subr.bf16.mxu0 %v7725_v23  ;;  %v7801_v23 = vld [vmem:[%s11342_s1 + $0x10c0] ss:$8 sps:$4 sm:$0xff]  }
  0xff   :  { %5370 = vmatpush1.bf16.msra.mxu1 %v7720_v43  ;;  %v7806_v43 = vld [vmem:[%s11342_s1 + $0x4d4] ss:$8 sps:$4 sm:$0xff]  }
 0x100   :  { %5862 = vmatpush1.bf16.msra.mxu0 %v7723_v44  ;;  %5380 = vmatprep.subr.bf16.mxu1 %v7728_v45  ;;  %v7809_v44 = vld [vmem:[%s11342_s1 + $0x10d4] ss:$8 sps:$4 sm:$0xff]   ;;  %v7804_v45 = vld [vmem:[%s11342_s1 + $0x4d0] ss:$8 sps:$4 sm:$0xff]  }
 0x101   :  { %5872 = vmatprep.subr.bf16.mxu0 %v7731_v46  ;;  %v7807_v46 = vld [vmem:[%s11342_s1 + $0x10d0] ss:$8 sps:$4 sm:$0xff]  }
 0x102   :  { %5372 = vmatmul.mubr.bf16.vlgmr.msra.gmra.mrb[0].mxu1 %v896_v50  ;;  %v7818_v50 = vld [vmem:[%s11342_s1 + $0x4f4] ss:$8 sps:$4 sm:$0xff]  }
 0x103   :  { %5864 = vmatmul.mubr.bf16.vlgmr.msra.gmra.mrb[0].mxu0 %v1043_v51  ;;  %5381 = vmatpush1.bf16.msra.mxu1 %v7726_v47  ;;  %v7810_v47 = vld [vmem:[%s11342_s1 + $0x4e0] ss:$8 sps:$4 sm:$0xff]   ;;  %v7821_v51 = vld [vmem:[%s11342_s1 + $0x10f4] ss:$8 sps:$4 sm:$0xff]  }
 0x104   :  { %5873 = vmatpush1.bf16.msra.mxu0 %v7729_v48  ;;  %5382 = vmatprep.subr.bf16.mxu1 %v7734_v53  ;;  %v7813_v48 = vld [vmem:[%s11342_s1 + $0x10e0] ss:$8 sps:$4 sm:$0xff]   ;;  %v7816_v53 = vld [vmem:[%s11342_s1 + $0x4f0] ss:$8 sps:$4 sm:$0xff]  }
 0x105   :  { %5874 = vmatprep.subr.bf16.mxu0 %v7737_v54  ;;  %5412 = vmatprep.mubr.bf16.mxu1 %v9500_v55  ;;  %v7819_v54 = vld [vmem:[%s11342_s1 + $0x10f0] ss:$8 sps:$4 sm:$0xff]  }
 0x106   :  { %5904 = vmatprep.mubr.bf16.mxu0 %v9503_v38 }
 0x107   :  { %5383 = vmatpush1.bf16.msra.mxu1 %v7732_v39  ;;  %v7824_v39 = vld [vmem:[%s11342_s1 + $0x504] ss:$8 sps:$4 sm:$0xff]  }
 0x108   :  { %5875 = vmatpush1.bf16.msra.mxu0 %v7735_v57  ;;  %5384 = vmatprep.subr.bf16.mxu1 %v7740_v58  ;;  %v7827_v57 = vld [vmem:[%s11342_s1 + $0x1104] ss:$8 sps:$4 sm:$0xff]   ;;  %v9689_v58 = vrot.slane %v9454_v40, %v8761_v49  ;;  %v7830_v40 = vld [vmem:[%s11342_s1 + $0x514] ss:$8 sps:$4 sm:$0xff]  }
 0x109   :  { %5876 = vmatprep.subr.bf16.mxu0 %v7743_v59  ;;  %v9693_v59 = vrot.slane %v9459_v41, %v8761_v49  ;;  %v7833_v41 = vld [vmem:[%s11342_s1 + $0x1114] ss:$8 sps:$4 sm:$0xff]  }
 0x10b   :  { %5385 = vmatpush1.bf16.msra.mxu1 %v7738_v60  ;;  %v7822_v60 = vld [vmem:[%s11342_s1 + $0x500] ss:$8 sps:$4 sm:$0xff]  }
 0x10c   :  { %5877 = vmatpush1.bf16.msra.mxu0 %v7741_v61  ;;  %5386 = vmatprep.subr.bf16.mxu1 %v7746_v62  ;;  %v7825_v61 = vld [vmem:[%s11342_s1 + $0x1100] ss:$8 sps:$4 sm:$0xff]   ;;  %v946_v62 = vcombine.high %v9500_v55, %v9500_v55  ;;  %v7836_v55 = vld [vmem:[%s11342_s1 + $0x524] ss:$8 sps:$4 sm:$0xff]  }
 0x10d   :  { %5878 = vmatprep.subr.bf16.mxu0 %v7749_v63  ;;  %v1093_v63 = vcombine.high %v9503_v38, %v9503_v38  ;;  %v7839_v38 = vld [vmem:[%s11342_s1 + $0x1124] ss:$8 sps:$4 sm:$0xff]  }
 0x10f   :  { %5387 = vmatpush1.bf16.msra.mxu1 %v7744_v0  ;;  %v7828_v0 = vld [vmem:[%s11342_s1 + $0x510] ss:$8 sps:$4 sm:$0xff]  }
 0x110   :  { %5879 = vmatpush1.bf16.msra.mxu0 %v7747_v1  ;;  %5388 = vmatprep.subr.bf16.mxu1 %v7752_v2  ;;  %v7831_v1 = vld [vmem:[%s11342_s1 + $0x1110] ss:$8 sps:$4 sm:$0xff]   ;;  %v7834_v2 = vld [vmem:[%s11342_s1 + $0x520] ss:$8 sps:$4 sm:$0xff]  }
 0x111   :  { %5880 = vmatprep.subr.bf16.mxu0 %v7755_v3  ;;  %v7837_v3 = vld [vmem:[%s11342_s1 + $0x1120] ss:$8 sps:$4 sm:$0xff]  }
 0x113   :  { %5389 = vmatpush1.bf16.msra.mxu1 %v7750_v4  ;;  %v7842_v4 = vld [vmem:[%s11342_s1 + $0x534] ss:$8 sps:$4 sm:$0xff]  }
 0x114   :  { %5881 = vmatpush1.bf16.msra.mxu0 %v7753_v5  ;;  %5390 = vmatprep.subr.bf16.mxu1 %v7758_v6  ;;  %v7845_v5 = vld [vmem:[%s11342_s1 + $0x1134] ss:$8 sps:$4 sm:$0xff]   ;;  %v7840_v6 = vld [vmem:[%s11342_s1 + $0x530] ss:$8 sps:$4 sm:$0xff]  }
 0x115   :  { %5882 = vmatprep.subr.bf16.mxu0 %v7761_v7  ;;  %v7843_v7 = vld [vmem:[%s11342_s1 + $0x1130] ss:$8 sps:$4 sm:$0xff]  }
 0x117   :  { %5391 = vmatpush1.bf16.msra.mxu1 %v7756_v8  ;;  %v7848_v8 = vld [vmem:[%s11342_s1 + $0x544] ss:$8 sps:$4 sm:$0xff]  }
 0x118   :  { %5883 = vmatpush1.bf16.msra.mxu0 %v7759_v9  ;;  %5392 = vmatprep.subr.bf16.mxu1 %v7764_v10  ;;  %v7851_v9 = vld [vmem:[%s11342_s1 + $0x1144] ss:$8 sps:$4 sm:$0xff]   ;;  %v7846_v10 = vld [vmem:[%s11342_s1 + $0x540] ss:$8 sps:$4 sm:$0xff]  }
 0x119   :  { %5884 = vmatprep.subr.bf16.mxu0 %v7767_v11  ;;  %v7849_v11 = vld [vmem:[%s11342_s1 + $0x1140] ss:$8 sps:$4 sm:$0xff]  }
 0x11b   :  { %5393 = vmatpush1.bf16.msra.mxu1 %v7762_v12  ;;  %v7854_v12 = vld [vmem:[%s11342_s1 + $0x554] ss:$8 sps:$4 sm:$0xff]  }
 0x11c   :  { %5885 = vmatpush1.bf16.msra.mxu0 %v7765_v13  ;;  %5394 = vmatprep.subr.bf16.mxu1 %v7770_v14  ;;  %v7857_v13 = vld [vmem:[%s11342_s1 + $0x1154] ss:$8 sps:$4 sm:$0xff]   ;;  %v7852_v14 = vld [vmem:[%s11342_s1 + $0x550] ss:$8 sps:$4 sm:$0xff]  }
 0x11d   :  { %5886 = vmatprep.subr.bf16.mxu0 %v7773_v15  ;;  %v7855_v15 = vld [vmem:[%s11342_s1 + $0x1150] ss:$8 sps:$4 sm:$0xff]  }
 0x11f   :  { %5395 = vmatpush1.bf16.msra.mxu1 %v7768_v18  ;;  %v7860_v18 = vld [vmem:[%s11342_s1 + $0x564] ss:$8 sps:$4 sm:$0xff]  }
 0x120   :  { %5887 = vmatpush1.bf16.msra.mxu0 %v7771_v19  ;;  %5396 = vmatprep.subr.bf16.mxu1 %v7776_v20  ;;  %v7863_v19 = vld [vmem:[%s11342_s1 + $0x1164] ss:$8 sps:$4 sm:$0xff]   ;;  %v7858_v20 = vld [vmem:[%s11342_s1 + $0x560] ss:$8 sps:$4 sm:$0xff]  }
 0x121   :  { %5888 = vmatprep.subr.bf16.mxu0 %v7779_v21  ;;  %v7861_v21 = vld [vmem:[%s11342_s1 + $0x1160] ss:$8 sps:$4 sm:$0xff]  }
 0x123   :  { %5397 = vmatpush1.bf16.msra.mxu1 %v7774_v22  ;;  %v7866_v22 = vld [vmem:[%s11342_s1 + $0x574] ss:$8 sps:$4 sm:$0xff]  }
 0x124   :  { %5889 = vmatpush1.bf16.msra.mxu0 %v7777_v52  ;;  %5398 = vmatprep.subr.bf16.mxu1 %v7782_v24  ;;  %v7869_v52 = vld [vmem:[%s11342_s1 + $0x1174] ss:$8 sps:$4 sm:$0xff]   ;;  %v7864_v24 = vld [vmem:[%s11342_s1 + $0x570] ss:$8 sps:$4 sm:$0xff]  }
 0x125   :  { %5890 = vmatprep.subr.bf16.mxu0 %v7785_v25  ;;  %v7867_v25 = vld [vmem:[%s11342_s1 + $0x1170] ss:$8 sps:$4 sm:$0xff]  }
 0x127   :  { %5399 = vmatpush1.bf16.msra.mxu1 %v7780_v26  ;;  %v7872_v26 = vld [vmem:[%s11342_s1 + $0x584] ss:$8 sps:$4 sm:$0xff]  }
 0x128   :  { %5891 = vmatpush1.bf16.msra.mxu0 %v7783_v27  ;;  %5400 = vmatprep.subr.bf16.mxu1 %v7788_v28  ;;  %v7875_v27 = vld [vmem:[%s11342_s1 + $0x1184] ss:$8 sps:$4 sm:$0xff]   ;;  %v7870_v28 = vld [vmem:[%s11342_s1 + $0x580] ss:$8 sps:$4 sm:$0xff]  }
 0x129   :  { %5892 = vmatprep.subr.bf16.mxu0 %v7791_v29  ;;  %v7873_v29 = vld [vmem:[%s11342_s1 + $0x1180] ss:$8 sps:$4 sm:$0xff]  }
 0x12b   :  { %5401 = vmatpush1.bf16.msra.mxu1 %v7786_v30  ;;  %v7878_v30 = vld [vmem:[%s11342_s1 + $0x594] ss:$8 sps:$4 sm:$0xff]  }
 0x12c   :  { %5893 = vmatpush1.bf16.msra.mxu0 %v7789_v31  ;;  %5402 = vmatprep.subr.bf16.mxu1 %v7794_v32  ;;  %v7881_v31 = vld [vmem:[%s11342_s1 + $0x1194] ss:$8 sps:$4 sm:$0xff]   ;;  %v7876_v32 = vld [vmem:[%s11342_s1 + $0x590] ss:$8 sps:$4 sm:$0xff]  }
 0x12d   :  { %5894 = vmatprep.subr.bf16.mxu0 %v7797_v33  ;;  %v7879_v33 = vld [vmem:[%s11342_s1 + $0x1190] ss:$8 sps:$4 sm:$0xff]  }
 0x12f   :  { %5403 = vmatpush1.bf16.msra.mxu1 %v7792_v34  ;;  %v7884_v34 = vld [vmem:[%s11342_s1 + $0x5a4] ss:$8 sps:$4 sm:$0xff]  }
 0x130   :  { %5895 = vmatpush1.bf16.msra.mxu0 %v7795_v16  ;;  %5404 = vmatprep.subr.bf16.mxu1 %v7800_v36  ;;  %v7887_v16 = vld [vmem:[%s11342_s1 + $0x11a4] ss:$8 sps:$4 sm:$0xff]   ;;  %v7882_v36 = vld [vmem:[%s11342_s1 + $0x5a0] ss:$8 sps:$4 sm:$0xff]  }
 0x131   :  { %5896 = vmatprep.subr.bf16.mxu0 %v7803_v37  ;;  %v7885_v37 = vld [vmem:[%s11342_s1 + $0x11a0] ss:$8 sps:$4 sm:$0xff]  }
 0x133   :  { %5405 = vmatpush1.bf16.msra.mxu1 %v7798_v56  ;;  %v7890_v56 = vld [vmem:[%s11342_s1 + $0x5b4] ss:$8 sps:$4 sm:$0xff]  }
 0x134   :  { %5897 = vmatpush1.bf16.msra.mxu0 %v7801_v23  ;;  %5406 = vmatprep.subr.bf16.mxu1 %v7806_v43  ;;  %v7893_v23 = vld [vmem:[%s11342_s1 + $0x11b4] ss:$8 sps:$4 sm:$0xff]   ;;  %v7888_v43 = vld [vmem:[%s11342_s1 + $0x5b0] ss:$8 sps:$4 sm:$0xff]  }
 0x135   :  { %5898 = vmatprep.subr.bf16.mxu0 %v7809_v44  ;;  %v7891_v44 = vld [vmem:[%s11342_s1 + $0x11b0] ss:$8 sps:$4 sm:$0xff]  }
 0x137   :  { %5407 = vmatpush1.bf16.msra.mxu1 %v7804_v45  ;;  %v7896_v45 = vld [vmem:[%s11342_s1 + $0x5c4] ss:$8 sps:$4 sm:$0xff]  }
 0x138   :  { %5899 = vmatpush1.bf16.msra.mxu0 %v7807_v46  ;;  %5408 = vmatprep.subr.bf16.mxu1 %v7812_v17  ;;  %v7899_v46 = vld [vmem:[%s11342_s1 + $0x11c4] ss:$8 sps:$4 sm:$0xff]   ;;  %v7894_v17 = vld [vmem:[%s11342_s1 + $0x5c0] ss:$8 sps:$4 sm:$0xff]  }
 0x139   :  { %5900 = vmatprep.subr.bf16.mxu0 %v7815_v35  ;;  %v7897_v35 = vld [vmem:[%s11342_s1 + $0x11c0] ss:$8 sps:$4 sm:$0xff]  }
 0x13b   :  { %5409 = vmatpush1.bf16.msra.mxu1 %v7810_v47  ;;  %v7902_v47 = vld [vmem:[%s11342_s1 + $0x5d4] ss:$8 sps:$4 sm:$0xff]  }
 0x13c   :  { %5901 = vmatpush1.bf16.msra.mxu0 %v7813_v48  ;;  %5410 = vmatprep.subr.bf16.mxu1 %v7818_v50  ;;  %v7905_v48 = vld [vmem:[%s11342_s1 + $0x11d4] ss:$8 sps:$4 sm:$0xff]   ;;  %v7900_v50 = vld [vmem:[%s11342_s1 + $0x5d0] ss:$8 sps:$4 sm:$0xff]  }
 0x13d   :  { %5902 = vmatprep.subr.bf16.mxu0 %v7821_v51  ;;  %v7903_v51 = vld [vmem:[%s11342_s1 + $0x11d0] ss:$8 sps:$4 sm:$0xff]  }
 0x13f   :  { %5411 = vmatpush1.bf16.msra.mxu1 %v7816_v53  ;;  %v7908_v53 = vld [vmem:[%s11342_s1 + $0x5e4] ss:$8 sps:$4 sm:$0xff]  }
 0x140   :  { %5903 = vmatpush1.bf16.msra.mxu0 %v7819_v54  ;;  %5421 = vmatprep.subr.bf16.mxu1 %v7824_v39  ;;  %v7911_v54 = vld [vmem:[%s11342_s1 + $0x11e4] ss:$8 sps:$4 sm:$0xff]  }
 0x141   :  { %5913 = vmatprep.subr.bf16.mxu0 %v7827_v57  ;;  %v8559_v39 = vld [vmem:[%s11341_s0 + $0x8] sm:$0xff] }
 0x142   :  { %5413 = vmatmul.mubr.bf16.vlgmr.msra.gmra.mrb[0].mxu1 %v9689_v58  ;;  %v899_v57 = vcombine.high %v8559_v39, %v8559_v39  ;;  %v7986_v39 = vld [vmem:[%s11342_s1 + $0x6b4] ss:$8 sps:$4 sm:$0xff]  }
 0x143   :  { %5905 = vmatmul.mubr.bf16.vlgmr.msra.gmra.mrb[0].mxu0 %v9693_v59  ;;  %5422 = vmatpush1.bf16.msra.mxu1 %v7822_v60  ;;  %v8560_v60 = vld [vmem:[%s11341_s0 + $0x20] sm:$0xff] }
 0x144   :  { %5914 = vmatpush1.bf16.msra.mxu0 %v7825_v61  ;;  %5423 = vmatprep.subr.bf16.mxu1 %v7830_v40  ;;  %v1046_v61 = vcombine.high %v8560_v60, %v8560_v60  ;;  %v7906_v40 = vld [vmem:[%s11342_s1 + $0x5e0] ss:$8 sps:$4 sm:$0xff]   ;;  %v7984_v60 = vld [vmem:[%s11342_s1 + $0x6b0] ss:$8 sps:$4 sm:$0xff]  }
 0x145   :  { %5915 = vmatprep.subr.bf16.mxu0 %v7833_v41  ;;  %5453 = vmatprep.mubr.bf16.mxu1 %v946_v62  ;;  %v7909_v41 = vld [vmem:[%s11342_s1 + $0x11e0] ss:$8 sps:$4 sm:$0xff]   ;;  %v7914_v62 = vld [vmem:[%s11342_s1 + $0x5f4] ss:$8 sps:$4 sm:$0xff]  }
 0x146   :  { %5945 = vmatprep.mubr.bf16.mxu0 %v1093_v63  ;;  %v7917_v63 = vld [vmem:[%s11342_s1 + $0x11f4] ss:$8 sps:$4 sm:$0xff]  }
 0x147   :  { %5424 = vmatpush1.bf16.msra.mxu1 %v7828_v0  ;;  %v9888_v0 = vrot.slane %v899_v57, %v8761_v49  ;;  %v7989_v57 = vld [vmem:[%s11342_s1 + $0x12b4] ss:$8 sps:$4 sm:$0xff]  }
 0x148   :  { %5916 = vmatpush1.bf16.msra.mxu0 %v7831_v1  ;;  %5425 = vmatprep.subr.bf16.mxu1 %v7836_v55  ;;  %v9891_v1 = vrot.slane %v1046_v61, %v8761_v49  ;;  %v7912_v55 = vld [vmem:[%s11342_s1 + $0x5f0] ss:$8 sps:$4 sm:$0xff]  }
 0x149   :  { %5917 = vmatprep.subr.bf16.mxu0 %v7839_v38  ;;  %v7915_v38 = vld [vmem:[%s11342_s1 + $0x11f0] ss:$8 sps:$4 sm:$0xff]  }
 0x14a   :  { %v7987_v61 = vld [vmem:[%s11342_s1 + $0x12b0] ss:$8 sps:$4 sm:$0xff]  }
 0x14b   :  { %5426 = vmatpush1.bf16.msra.mxu1 %v7834_v2  ;;  %v7920_v2 = vld [vmem:[%s11342_s1 + $0x604] ss:$8 sps:$4 sm:$0xff]  }
 0x14c   :  { %5918 = vmatpush1.bf16.msra.mxu0 %v7837_v3  ;;  %5427 = vmatprep.subr.bf16.mxu1 %v7842_v4  ;;  %v7923_v3 = vld [vmem:[%s11342_s1 + $0x1204] ss:$8 sps:$4 sm:$0xff]   ;;  %v915_v4 = vcombine.high %v9888_v0, %v9888_v0 }
 0x14d   :  { %5919 = vmatprep.subr.bf16.mxu0 %v7845_v5  ;;  %v1062_v5 = vcombine.high %v9891_v1, %v9891_v1 }
 0x14f   :  { %5428 = vmatpush1.bf16.msra.mxu1 %v7840_v6  ;;  %v944_v6 = vcombine.high %v9689_v58, %v9689_v58  ;;  %v7929_v58 = vld [vmem:[%s11342_s1 + $0x1214] ss:$8 sps:$4 sm:$0xff]  }
 0x150   :  { %5920 = vmatpush1.bf16.msra.mxu0 %v7843_v7  ;;  %5429 = vmatprep.subr.bf16.mxu1 %v7848_v8  ;;  %v1091_v7 = vcombine.high %v9693_v59, %v9693_v59  ;;  %v7918_v8 = vld [vmem:[%s11342_s1 + $0x600] ss:$8 sps:$4 sm:$0xff]   ;;  %v9926_v59 = vrot.slane %v915_v4, %v8761_v49  ;;  %v8004_v4 = vld [vmem:[%s11342_s1 + $0x6e4] ss:$8 sps:$4 sm:$0xff]  }
 0x151   :  { %5921 = vmatprep.subr.bf16.mxu0 %v7851_v9  ;;  %v7921_v9 = vld [vmem:[%s11342_s1 + $0x1200] ss:$8 sps:$4 sm:$0xff]  }
 0x153   :  { %5430 = vmatpush1.bf16.msra.mxu1 %v7846_v10  ;;  %v7926_v10 = vld [vmem:[%s11342_s1 + $0x614] ss:$8 sps:$4 sm:$0xff]  }
 0x154   :  { %5922 = vmatpush1.bf16.msra.mxu0 %v7849_v11  ;;  %5431 = vmatprep.subr.bf16.mxu1 %v7854_v12  ;;  %v9929_v11 = vrot.slane %v1062_v5, %v8761_v49  ;;  %v7924_v12 = vld [vmem:[%s11342_s1 + $0x610] ss:$8 sps:$4 sm:$0xff]   ;;  %v8007_v5 = vld [vmem:[%s11342_s1 + $0x12e4] ss:$8 sps:$4 sm:$0xff]  }
 0x155   :  { %5923 = vmatprep.subr.bf16.mxu0 %v7857_v13  ;;  %v7927_v13 = vld [vmem:[%s11342_s1 + $0x1210] ss:$8 sps:$4 sm:$0xff]  }
 0x157   :  { %5432 = vmatpush1.bf16.msra.mxu1 %v7852_v14  ;;  %v7932_v14 = vld [vmem:[%s11342_s1 + $0x624] ss:$8 sps:$4 sm:$0xff]  }
 0x158   :  { %5924 = vmatpush1.bf16.msra.mxu0 %v7855_v15  ;;  %5433 = vmatprep.subr.bf16.mxu1 %v7860_v18  ;;  %v7935_v15 = vld [vmem:[%s11342_s1 + $0x1224] ss:$8 sps:$4 sm:$0xff]   ;;  %v7930_v18 = vld [vmem:[%s11342_s1 + $0x620] ss:$8 sps:$4 sm:$0xff]  }
 0x159   :  { %5925 = vmatprep.subr.bf16.mxu0 %v7863_v19  ;;  %v7933_v19 = vld [vmem:[%s11342_s1 + $0x1220] ss:$8 sps:$4 sm:$0xff]  }
 0x15b   :  { %5434 = vmatpush1.bf16.msra.mxu1 %v7858_v20  ;;  %v7938_v20 = vld [vmem:[%s11342_s1 + $0x634] ss:$8 sps:$4 sm:$0xff]  }
 0x15c   :  { %5926 = vmatpush1.bf16.msra.mxu0 %v7861_v21  ;;  %5435 = vmatprep.subr.bf16.mxu1 %v7866_v22  ;;  %v7941_v21 = vld [vmem:[%s11342_s1 + $0x1234] ss:$8 sps:$4 sm:$0xff]   ;;  %v7936_v22 = vld [vmem:[%s11342_s1 + $0x630] ss:$8 sps:$4 sm:$0xff]  }
 0x15d   :  { %5927 = vmatprep.subr.bf16.mxu0 %v7869_v52  ;;  %v7939_v52 = vld [vmem:[%s11342_s1 + $0x1230] ss:$8 sps:$4 sm:$0xff]  }
 0x15f   :  { %5436 = vmatpush1.bf16.msra.mxu1 %v7864_v24  ;;  %v7944_v24 = vld [vmem:[%s11342_s1 + $0x644] ss:$8 sps:$4 sm:$0xff]  }
 0x160   :  { %5928 = vmatpush1.bf16.msra.mxu0 %v7867_v25  ;;  %5437 = vmatprep.subr.bf16.mxu1 %v7872_v26  ;;  %v7947_v25 = vld [vmem:[%s11342_s1 + $0x1244] ss:$8 sps:$4 sm:$0xff]   ;;  %v7942_v26 = vld [vmem:[%s11342_s1 + $0x640] ss:$8 sps:$4 sm:$0xff]  }
 0x161   :  { %5929 = vmatprep.subr.bf16.mxu0 %v7875_v27  ;;  %v7945_v27 = vld [vmem:[%s11342_s1 + $0x1240] ss:$8 sps:$4 sm:$0xff]  }
 0x163   :  { %5438 = vmatpush1.bf16.msra.mxu1 %v7870_v28  ;;  %v7950_v28 = vld [vmem:[%s11342_s1 + $0x654] ss:$8 sps:$4 sm:$0xff]  }
 0x164   :  { %5930 = vmatpush1.bf16.msra.mxu0 %v7873_v29  ;;  %5439 = vmatprep.subr.bf16.mxu1 %v7878_v30  ;;  %v7953_v29 = vld [vmem:[%s11342_s1 + $0x1254] ss:$8 sps:$4 sm:$0xff]   ;;  %v7948_v30 = vld [vmem:[%s11342_s1 + $0x650] ss:$8 sps:$4 sm:$0xff]  }
 0x165   :  { %5931 = vmatprep.subr.bf16.mxu0 %v7881_v31  ;;  %v7951_v31 = vld [vmem:[%s11342_s1 + $0x1250] ss:$8 sps:$4 sm:$0xff]  }
 0x167   :  { %5440 = vmatpush1.bf16.msra.mxu1 %v7876_v32  ;;  %v7956_v32 = vld [vmem:[%s11342_s1 + $0x664] ss:$8 sps:$4 sm:$0xff]  }
 0x168   :  { %5932 = vmatpush1.bf16.msra.mxu0 %v7879_v33  ;;  %5441 = vmatprep.subr.bf16.mxu1 %v7884_v34  ;;  %v7959_v33 = vld [vmem:[%s11342_s1 + $0x1264] ss:$8 sps:$4 sm:$0xff]   ;;  %v7954_v34 = vld [vmem:[%s11342_s1 + $0x660] ss:$8 sps:$4 sm:$0xff]  }
 0x169   :  { %5933 = vmatprep.subr.bf16.mxu0 %v7887_v16  ;;  %v7957_v16 = vld [vmem:[%s11342_s1 + $0x1260] ss:$8 sps:$4 sm:$0xff]  }
 0x16b   :  { %5442 = vmatpush1.bf16.msra.mxu1 %v7882_v36  ;;  %v7962_v36 = vld [vmem:[%s11342_s1 + $0x674] ss:$8 sps:$4 sm:$0xff]  }
 0x16c   :  { %5934 = vmatpush1.bf16.msra.mxu0 %v7885_v37  ;;  %5443 = vmatprep.subr.bf16.mxu1 %v7890_v56  ;;  %v7965_v37 = vld [vmem:[%s11342_s1 + $0x1274] ss:$8 sps:$4 sm:$0xff]   ;;  %v7960_v56 = vld [vmem:[%s11342_s1 + $0x670] ss:$8 sps:$4 sm:$0xff]  }
 0x16d   :  { %5935 = vmatprep.subr.bf16.mxu0 %v7893_v23  ;;  %v7963_v23 = vld [vmem:[%s11342_s1 + $0x1270] ss:$8 sps:$4 sm:$0xff]  }
 0x16f   :  { %5444 = vmatpush1.bf16.msra.mxu1 %v7888_v43  ;;  %v7968_v43 = vld [vmem:[%s11342_s1 + $0x684] ss:$8 sps:$4 sm:$0xff]  }
 0x170   :  { %5936 = vmatpush1.bf16.msra.mxu0 %v7891_v44  ;;  %5445 = vmatprep.subr.bf16.mxu1 %v7896_v45  ;;  %v7971_v44 = vld [vmem:[%s11342_s1 + $0x1284] ss:$8 sps:$4 sm:$0xff]   ;;  %v7966_v45 = vld [vmem:[%s11342_s1 + $0x680] ss:$8 sps:$4 sm:$0xff]  }
 0x171   :  { %5937 = vmatprep.subr.bf16.mxu0 %v7899_v46  ;;  %v7969_v46 = vld [vmem:[%s11342_s1 + $0x1280] ss:$8 sps:$4 sm:$0xff]  }
 0x173   :  { %5446 = vmatpush1.bf16.msra.mxu1 %v7894_v17  ;;  %v7974_v17 = vld [vmem:[%s11342_s1 + $0x694] ss:$8 sps:$4 sm:$0xff]  }
 0x174   :  { %5938 = vmatpush1.bf16.msra.mxu0 %v7897_v35  ;;  %5447 = vmatprep.subr.bf16.mxu1 %v7902_v47  ;;  %v7977_v35 = vld [vmem:[%s11342_s1 + $0x1294] ss:$8 sps:$4 sm:$0xff]   ;;  %v7972_v47 = vld [vmem:[%s11342_s1 + $0x690] ss:$8 sps:$4 sm:$0xff]  }
 0x175   :  { %5939 = vmatprep.subr.bf16.mxu0 %v7905_v48  ;;  %v7975_v48 = vld [vmem:[%s11342_s1 + $0x1290] ss:$8 sps:$4 sm:$0xff]  }
 0x177   :  { %5448 = vmatpush1.bf16.msra.mxu1 %v7900_v50  ;;  %v7980_v50 = vld [vmem:[%s11342_s1 + $0x6a4] ss:$8 sps:$4 sm:$0xff]  }
 0x178   :  { %5940 = vmatpush1.bf16.msra.mxu0 %v7903_v51  ;;  %5449 = vmatprep.subr.bf16.mxu1 %v7908_v53  ;;  %v7983_v51 = vld [vmem:[%s11342_s1 + $0x12a4] ss:$8 sps:$4 sm:$0xff]   ;;  %v7978_v53 = vld [vmem:[%s11342_s1 + $0x6a0] ss:$8 sps:$4 sm:$0xff]  }
 0x179   :  { %5941 = vmatprep.subr.bf16.mxu0 %v7911_v54  ;;  %v7981_v54 = vld [vmem:[%s11342_s1 + $0x12a0] ss:$8 sps:$4 sm:$0xff]  }
 0x17b   :  { %5450 = vmatpush1.bf16.msra.mxu1 %v7906_v40  ;;  %v7992_v40 = vld [vmem:[%s11342_s1 + $0x6c4] ss:$8 sps:$4 sm:$0xff]  }
 0x17c   :  { %5942 = vmatpush1.bf16.msra.mxu0 %v7909_v41  ;;  %5451 = vmatprep.subr.bf16.mxu1 %v7914_v62  ;;  %v7995_v41 = vld [vmem:[%s11342_s1 + $0x12c4] ss:$8 sps:$4 sm:$0xff]   ;;  %v7990_v62 = vld [vmem:[%s11342_s1 + $0x6c0] ss:$8 sps:$4 sm:$0xff]  }
 0x17d   :  { %5943 = vmatprep.subr.bf16.mxu0 %v7917_v63  ;;  %v7993_v63 = vld [vmem:[%s11342_s1 + $0x12c0] ss:$8 sps:$4 sm:$0xff]  }
 0x17f   :  { %5452 = vmatpush1.bf16.msra.mxu1 %v7912_v55  ;;  %v7998_v55 = vld [vmem:[%s11342_s1 + $0x6d4] ss:$8 sps:$4 sm:$0xff]  }
 0x180   :  { %5944 = vmatpush1.bf16.msra.mxu0 %v7915_v38  ;;  %5462 = vmatprep.subr.bf16.mxu1 %v7920_v2  ;;  %v8001_v38 = vld [vmem:[%s11342_s1 + $0x12d4] ss:$8 sps:$4 sm:$0xff]   ;;  %v7996_v2 = vld [vmem:[%s11342_s1 + $0x6d0] ss:$8 sps:$4 sm:$0xff]  }
 0x181   :  { %5954 = vmatprep.subr.bf16.mxu0 %v7923_v3  ;;  %v7999_v3 = vld [vmem:[%s11342_s1 + $0x12d0] ss:$8 sps:$4 sm:$0xff]  }
 0x182   :  { %5454 = vmatmul.mubr.bf16.vlgmr.msra.gmra.mrb[0].mxu1 %v944_v6  ;;  %v8002_v6 = vld [vmem:[%s11342_s1 + $0x6e0] ss:$8 sps:$4 sm:$0xff]  }
 0x183   :  { %5946 = vmatmul.mubr.bf16.vlgmr.msra.gmra.mrb[0].mxu0 %v1091_v7  ;;  %5463 = vmatpush1.bf16.msra.mxu1 %v7918_v8  ;;  %v8005_v7 = vld [vmem:[%s11342_s1 + $0x12e0] ss:$8 sps:$4 sm:$0xff]   ;;  %v8010_v8 = vld [vmem:[%s11342_s1 + $0x6f4] ss:$8 sps:$4 sm:$0xff]  }
 0x184   :  { %5955 = vmatpush1.bf16.msra.mxu0 %v7921_v9  ;;  %5464 = vmatprep.subr.bf16.mxu1 %v7926_v10  ;;  %v8013_v9 = vld [vmem:[%s11342_s1 + $0x12f4] ss:$8 sps:$4 sm:$0xff]   ;;  %v8008_v10 = vld [vmem:[%s11342_s1 + $0x6f0] ss:$8 sps:$4 sm:$0xff]  }
 0x185   :  { %5956 = vmatprep.subr.bf16.mxu0 %v7929_v58  ;;  %5494 = vmatprep.mubr.bf16.mxu1 %v9926_v59  ;;  %v8011_v58 = vld [vmem:[%s11342_s1 + $0x12f0] ss:$8 sps:$4 sm:$0xff]  }
 0x186   :  { %5986 = vmatprep.mubr.bf16.mxu0 %v9929_v11 }
 0x187   :  { %5465 = vmatpush1.bf16.msra.mxu1 %v7924_v12  ;;  %v8017_v12 = vld [vmem:[%s11342_s1 + $0x704] ss:$8 sps:$4 sm:$0xff]  }
 0x188   :  { %5957 = vmatpush1.bf16.msra.mxu0 %v7927_v13  ;;  %5466 = vmatprep.subr.bf16.mxu1 %v7932_v14  ;;  %v8021_v13 = vld [vmem:[%s11342_s1 + $0x1304] ss:$8 sps:$4 sm:$0xff]   ;;  %v10115_v14 = vrot.slane %v9888_v0, %v8761_v49  ;;  %v8024_v0 = vld [vmem:[%s11342_s1 + $0x714] ss:$8 sps:$4 sm:$0xff]  }
 0x189   :  { %5958 = vmatprep.subr.bf16.mxu0 %v7935_v15  ;;  %v10119_v15 = vrot.slane %v9891_v1, %v8761_v49  ;;  %v8027_v1 = vld [vmem:[%s11342_s1 + $0x1314] ss:$8 sps:$4 sm:$0xff]  }
 0x18b   :  { %5467 = vmatpush1.bf16.msra.mxu1 %v7930_v18  ;;  %v8015_v18 = vld [vmem:[%s11342_s1 + $0x700] ss:$8 sps:$4 sm:$0xff]  }
 0x18c   :  { %5959 = vmatpush1.bf16.msra.mxu0 %v7933_v19  ;;  %5468 = vmatprep.subr.bf16.mxu1 %v7938_v20  ;;  %v8019_v19 = vld [vmem:[%s11342_s1 + $0x1300] ss:$8 sps:$4 sm:$0xff]   ;;  %v947_v20 = vcombine.high %v9926_v59, %v9926_v59  ;;  %v8030_v59 = vld [vmem:[%s11342_s1 + $0x724] ss:$8 sps:$4 sm:$0xff]  }
 0x18d   :  { %5960 = vmatprep.subr.bf16.mxu0 %v7941_v21  ;;  %v1094_v21 = vcombine.high %v9929_v11, %v9929_v11  ;;  %v8033_v11 = vld [vmem:[%s11342_s1 + $0x1324] ss:$8 sps:$4 sm:$0xff]  }
 0x18f   :  { %5469 = vmatpush1.bf16.msra.mxu1 %v7936_v22  ;;  %v8022_v22 = vld [vmem:[%s11342_s1 + $0x710] ss:$8 sps:$4 sm:$0xff]  }
 0x190   :  { %5961 = vmatpush1.bf16.msra.mxu0 %v7939_v52  ;;  %5470 = vmatprep.subr.bf16.mxu1 %v7944_v24  ;;  %v8025_v52 = vld [vmem:[%s11342_s1 + $0x1310] ss:$8 sps:$4 sm:$0xff]   ;;  %v8028_v24 = vld [vmem:[%s11342_s1 + $0x720] ss:$8 sps:$4 sm:$0xff]  }
 0x191   :  { %5962 = vmatprep.subr.bf16.mxu0 %v7947_v25  ;;  %v8031_v25 = vld [vmem:[%s11342_s1 + $0x1320] ss:$8 sps:$4 sm:$0xff]  }
 0x193   :  { %5471 = vmatpush1.bf16.msra.mxu1 %v7942_v26  ;;  %v8036_v26 = vld [vmem:[%s11342_s1 + $0x734] ss:$8 sps:$4 sm:$0xff]  }
 0x194   :  { %5963 = vmatpush1.bf16.msra.mxu0 %v7945_v27  ;;  %5472 = vmatprep.subr.bf16.mxu1 %v7950_v28  ;;  %v8039_v27 = vld [vmem:[%s11342_s1 + $0x1334] ss:$8 sps:$4 sm:$0xff]   ;;  %v8034_v28 = vld [vmem:[%s11342_s1 + $0x730] ss:$8 sps:$4 sm:$0xff]  }
 0x195   :  { %5964 = vmatprep.subr.bf16.mxu0 %v7953_v29  ;;  %v8037_v29 = vld [vmem:[%s11342_s1 + $0x1330] ss:$8 sps:$4 sm:$0xff]  }
 0x197   :  { %5473 = vmatpush1.bf16.msra.mxu1 %v7948_v30  ;;  %v8042_v30 = vld [vmem:[%s11342_s1 + $0x744] ss:$8 sps:$4 sm:$0xff]  }
 0x198   :  { %5965 = vmatpush1.bf16.msra.mxu0 %v7951_v31  ;;  %5474 = vmatprep.subr.bf16.mxu1 %v7956_v32  ;;  %v8045_v31 = vld [vmem:[%s11342_s1 + $0x1344] ss:$8 sps:$4 sm:$0xff]   ;;  %v8040_v32 = vld [vmem:[%s11342_s1 + $0x740] ss:$8 sps:$4 sm:$0xff]  }
 0x199   :  { %5966 = vmatprep.subr.bf16.mxu0 %v7959_v33  ;;  %v8043_v33 = vld [vmem:[%s11342_s1 + $0x1340] ss:$8 sps:$4 sm:$0xff]  }
 0x19b   :  { %5475 = vmatpush1.bf16.msra.mxu1 %v7954_v34  ;;  %v8048_v34 = vld [vmem:[%s11342_s1 + $0x754] ss:$8 sps:$4 sm:$0xff]  }
 0x19c   :  { %5967 = vmatpush1.bf16.msra.mxu0 %v7957_v16  ;;  %5476 = vmatprep.subr.bf16.mxu1 %v7962_v36  ;;  %v8051_v16 = vld [vmem:[%s11342_s1 + $0x1354] ss:$8 sps:$4 sm:$0xff]   ;;  %v8046_v36 = vld [vmem:[%s11342_s1 + $0x750] ss:$8 sps:$4 sm:$0xff]  }
 0x19d   :  { %5968 = vmatprep.subr.bf16.mxu0 %v7965_v37  ;;  %v8049_v37 = vld [vmem:[%s11342_s1 + $0x1350] ss:$8 sps:$4 sm:$0xff]  }
 0x19f   :  { %5477 = vmatpush1.bf16.msra.mxu1 %v7960_v56  ;;  %v8054_v56 = vld [vmem:[%s11342_s1 + $0x764] ss:$8 sps:$4 sm:$0xff]  }
 0x1a0   :  { %5969 = vmatpush1.bf16.msra.mxu0 %v7963_v23  ;;  %5478 = vmatprep.subr.bf16.mxu1 %v7968_v43  ;;  %v8057_v23 = vld [vmem:[%s11342_s1 + $0x1364] ss:$8 sps:$4 sm:$0xff]   ;;  %v8052_v43 = vld [vmem:[%s11342_s1 + $0x760] ss:$8 sps:$4 sm:$0xff]  }
 0x1a1   :  { %5970 = vmatprep.subr.bf16.mxu0 %v7971_v44  ;;  %v8055_v44 = vld [vmem:[%s11342_s1 + $0x1360] ss:$8 sps:$4 sm:$0xff]  }
 0x1a3   :  { %5479 = vmatpush1.bf16.msra.mxu1 %v7966_v45  ;;  %v8060_v45 = vld [vmem:[%s11342_s1 + $0x774] ss:$8 sps:$4 sm:$0xff]  }
 0x1a4   :  { %5971 = vmatpush1.bf16.msra.mxu0 %v7969_v46  ;;  %5480 = vmatprep.subr.bf16.mxu1 %v7974_v17  ;;  %v8063_v46 = vld [vmem:[%s11342_s1 + $0x1374] ss:$8 sps:$4 sm:$0xff]   ;;  %v8058_v17 = vld [vmem:[%s11342_s1 + $0x770] ss:$8 sps:$4 sm:$0xff]  }
 0x1a5   :  { %5972 = vmatprep.subr.bf16.mxu0 %v7977_v35  ;;  %v8061_v35 = vld [vmem:[%s11342_s1 + $0x1370] ss:$8 sps:$4 sm:$0xff]  }
 0x1a7   :  { %5481 = vmatpush1.bf16.msra.mxu1 %v7972_v47  ;;  %v8066_v47 = vld [vmem:[%s11342_s1 + $0x784] ss:$8 sps:$4 sm:$0xff]  }
 0x1a8   :  { %5973 = vmatpush1.bf16.msra.mxu0 %v7975_v48  ;;  %5482 = vmatprep.subr.bf16.mxu1 %v7980_v50  ;;  %v8069_v48 = vld [vmem:[%s11342_s1 + $0x1384] ss:$8 sps:$4 sm:$0xff]  }
 0x1a9   :  { %5974 = vmatprep.subr.bf16.mxu0 %v7983_v51 }
 0x1ab   :  { %5483 = vmatpush1.bf16.msra.mxu1 %v7978_v53 }
 0x1ac   :  { %5975 = vmatpush1.bf16.msra.mxu0 %v7981_v54  ;;  %5484 = vmatprep.subr.bf16.mxu1 %v7986_v39 }
 0x1ad   :  { %5976 = vmatprep.subr.bf16.mxu0 %v7989_v57 }
 0x1af   :  { %5485 = vmatpush1.bf16.msra.mxu1 %v7984_v60 }
 0x1b0   :  { %5977 = vmatpush1.bf16.msra.mxu0 %v7987_v61  ;;  %5486 = vmatprep.subr.bf16.mxu1 %v7992_v40 }
 0x1b1   :  { %5978 = vmatprep.subr.bf16.mxu0 %v7995_v41 }
 0x1b3   :  { %5487 = vmatpush1.bf16.msra.mxu1 %v7990_v62 }
 0x1b4   :  { %5979 = vmatpush1.bf16.msra.mxu0 %v7993_v63  ;;  %5488 = vmatprep.subr.bf16.mxu1 %v7998_v55 }
 0x1b5   :  { %5980 = vmatprep.subr.bf16.mxu0 %v8001_v38 }
 0x1b7   :  { %5489 = vmatpush1.bf16.msra.mxu1 %v7996_v2 }
 0x1b8   :  { %5981 = vmatpush1.bf16.msra.mxu0 %v7999_v3  ;;  %5490 = vmatprep.subr.bf16.mxu1 %v8004_v4 }
 0x1b9   :  { %5982 = vmatprep.subr.bf16.mxu0 %v8007_v5 }
 0x1bb   :  { %5491 = vmatpush1.bf16.msra.mxu1 %v8002_v6 }
 0x1bc   :  { %5983 = vmatpush1.bf16.msra.mxu0 %v8005_v7  ;;  %5492 = vmatprep.subr.bf16.mxu1 %v8010_v8 }
 0x1bd   :  { %5984 = vmatprep.subr.bf16.mxu0 %v8013_v9 }
 0x1bf   :  { %5493 = vmatpush1.bf16.msra.mxu1 %v8008_v10 }
 0x1c0   :  { %5985 = vmatpush1.bf16.msra.mxu0 %v8011_v58  ;;  %5503 = vmatprep.subr.bf16.mxu1 %v8017_v12 }
 0x1c1   :  { %5995 = vmatprep.subr.bf16.mxu0 %v8021_v13 }
 0x1c2   :  { %5495 = vmatmul.mubr.bf16.vlgmr.msra.gmra.mrb[0].mxu1 %v10115_v14 }
 0x1c3   :  { %5987 = vmatmul.mubr.bf16.vlgmr.msra.gmra.mrb[0].mxu0 %v10119_v15  ;;  %5504 = vmatpush1.bf16.msra.mxu1 %v8015_v18 }
 0x1c4   :  { %5996 = vmatpush1.bf16.msra.mxu0 %v8019_v19  ;;  %5505 = vmatprep.subr.bf16.mxu1 %v8024_v0 }
 0x1c5   :  { %5997 = vmatprep.subr.bf16.mxu0 %v8027_v1  ;;  %5535 = vmatprep.mubr.bf16.mxu1 %v947_v20 }
 0x1c6   :  { %6027 = vmatprep.mubr.bf16.mxu0 %v1094_v21 }
 0x1c7   :  { %5506 = vmatpush1.bf16.msra.mxu1 %v8022_v22 }
 0x1c8   :  { %5998 = vmatpush1.bf16.msra.mxu0 %v8025_v52  ;;  %5507 = vmatprep.subr.bf16.mxu1 %v8030_v59 }
 0x1c9   :  { %5999 = vmatprep.subr.bf16.mxu0 %v8033_v11 }
 0x1cb   :  { %5508 = vmatpush1.bf16.msra.mxu1 %v8028_v24 }
 0x1cc   :  { %6000 = vmatpush1.bf16.msra.mxu0 %v8031_v25  ;;  %5509 = vmatprep.subr.bf16.mxu1 %v8036_v26 }
 0x1cd   :  { %6001 = vmatprep.subr.bf16.mxu0 %v8039_v27 }
 0x1cf   :  { %5510 = vmatpush1.bf16.msra.mxu1 %v8034_v28 }
 0x1d0   :  { %6002 = vmatpush1.bf16.msra.mxu0 %v8037_v29  ;;  %5511 = vmatprep.subr.bf16.mxu1 %v8042_v30 }
 0x1d1   :  { %6003 = vmatprep.subr.bf16.mxu0 %v8045_v31 }
 0x1d3   :  { %5512 = vmatpush1.bf16.msra.mxu1 %v8040_v32 }
 0x1d4   :  { %6004 = vmatpush1.bf16.msra.mxu0 %v8043_v33  ;;  %5513 = vmatprep.subr.bf16.mxu1 %v8048_v34 }
 0x1d5   :  { %6005 = vmatprep.subr.bf16.mxu0 %v8051_v16 }
 0x1d7   :  { %5514 = vmatpush1.bf16.msra.mxu1 %v8046_v36 }
 0x1d8   :  { %6006 = vmatpush1.bf16.msra.mxu0 %v8049_v37  ;;  %5515 = vmatprep.subr.bf16.mxu1 %v8054_v56 }
 0x1d9   :  { %6007 = vmatprep.subr.bf16.mxu0 %v8057_v23 }
 0x1db   :  { %5516 = vmatpush1.bf16.msra.mxu1 %v8052_v43 }
 0x1dc   :  { %6008 = vmatpush1.bf16.msra.mxu0 %v8055_v44  ;;  %5517 = vmatprep.subr.bf16.mxu1 %v8060_v45 }
 0x1dd   :  { %6009 = vmatprep.subr.bf16.mxu0 %v8063_v46 }
 0x1de   :  { %12 = vsyncpa [#allocation3], 0  ;;  %v8064_v50 = vld [vmem:[%s11342_s1 + $0x780] ss:$8 sps:$4 sm:$0xff]   ;;  %v8072_v53 = vld [vmem:[%s11342_s1 + $0x794] ss:$8 sps:$4 sm:$0xff]   ;;  %v945_v26 = vcombine.high %v10115_v14, %v10115_v14  ;;  %v1092_v27 = vcombine.high %v10119_v15, %v10119_v15 }
 0x1df   :  { %5518 = vmatpush1.bf16.msra.mxu1 %v8058_v17  ;;  %v8067_v51 = vld [vmem:[%s11342_s1 + $0x1380] ss:$8 sps:$4 sm:$0xff]   ;;  %v8075_v54 = vld [vmem:[%s11342_s1 + $0x1394] ss:$8 sps:$4 sm:$0xff]   ;;  %v8070_v39 = vld [vmem:[%s11342_s1 + $0x790] ss:$8 sps:$4 sm:$0xff]  }
 0x1e0   :  { %6010 = vmatpush1.bf16.msra.mxu0 %v8061_v35  ;;  %5519 = vmatprep.subr.bf16.mxu1 %v8066_v47  ;;  %v8073_v57 = vld [vmem:[%s11342_s1 + $0x1390] ss:$8 sps:$4 sm:$0xff]   ;;  %v8078_v60 = vld [vmem:[%s11342_s1 + $0x7a4] ss:$8 sps:$4 sm:$0xff]   ;;  %v8076_v40 = vld [vmem:[%s11342_s1 + $0x7a0] ss:$8 sps:$4 sm:$0xff]  }
 0x1e1   :  { %6011 = vmatprep.subr.bf16.mxu0 %v8069_v48  ;;  %v8081_v61 = vld [vmem:[%s11342_s1 + $0x13a4] ss:$8 sps:$4 sm:$0xff]   ;;  %v8079_v41 = vld [vmem:[%s11342_s1 + $0x13a0] ss:$8 sps:$4 sm:$0xff]   ;;  %v8084_v62 = vld [vmem:[%s11342_s1 + $0x7b4] ss:$8 sps:$4 sm:$0xff]  }
 0x1e2   :  { %v8087_v63 = vld [vmem:[%s11342_s1 + $0x13b4] ss:$8 sps:$4 sm:$0xff]   ;;  %v8082_v55 = vld [vmem:[%s11342_s1 + $0x7b0] ss:$8 sps:$4 sm:$0xff]   ;;  %v8090_v2 = vld [vmem:[%s11342_s1 + $0x7c4] ss:$8 sps:$4 sm:$0xff]  }
 0x1e3   :  { %5520 = vmatpush1.bf16.msra.mxu1 %v8064_v50  ;;  %v8085_v38 = vld [vmem:[%s11342_s1 + $0x13b0] ss:$8 sps:$4 sm:$0xff]   ;;  %v8093_v3 = vld [vmem:[%s11342_s1 + $0x13c4] ss:$8 sps:$4 sm:$0xff]   ;;  %v8088_v4 = vld [vmem:[%s11342_s1 + $0x7c0] ss:$8 sps:$4 sm:$0xff]  }
 0x1e4   :  { %6012 = vmatpush1.bf16.msra.mxu0 %v8067_v51  ;;  %5521 = vmatprep.subr.bf16.mxu1 %v8072_v53  ;;  %v8091_v5 = vld [vmem:[%s11342_s1 + $0x13c0] ss:$8 sps:$4 sm:$0xff]   ;;  %v8096_v6 = vld [vmem:[%s11342_s1 + $0x7d4] ss:$8 sps:$4 sm:$0xff]   ;;  %v8094_v8 = vld [vmem:[%s11342_s1 + $0x7d0] ss:$8 sps:$4 sm:$0xff]  }
 0x1e5   :  { %6013 = vmatprep.subr.bf16.mxu0 %v8075_v54  ;;  %v8099_v7 = vld [vmem:[%s11342_s1 + $0x13d4] ss:$8 sps:$4 sm:$0xff]   ;;  %v8097_v9 = vld [vmem:[%s11342_s1 + $0x13d0] ss:$8 sps:$4 sm:$0xff]   ;;  %v8102_v10 = vld [vmem:[%s11342_s1 + $0x7e4] ss:$8 sps:$4 sm:$0xff]  }
 0x1e6   :  { %v8105_v58 = vld [vmem:[%s11342_s1 + $0x13e4] ss:$8 sps:$4 sm:$0xff]   ;;  %v10298_v12 = vld [vmem:[%s11341_s0 + $0x10] sm:$0xff]  ;;  %v8100_v18 = vld [vmem:[%s11342_s1 + $0x7e0] ss:$8 sps:$4 sm:$0xff]   ;;  %vm6354_vm0 = vcmask 1043456  }
 0x1e7   :  { %5522 = vmatpush1.bf16.msra.mxu1 %v8070_v39  ;;  %v10303_v13 = vld [vmem:[%s11341_s0 + $0x28] sm:$0xff]  ;;  %v8108_v0 = vld [vmem:[%s11342_s1 + $0x7f4] ss:$8 sps:$4 sm:$0xff]   ;;  %v10319_v20 = vrot.slane %v10298_v12, %v8761_v49  ;;  %v8106_v22 = vld [vmem:[%s11342_s1 + $0x7f0] ss:$8 sps:$4 sm:$0xff]   ;;  %vm6350_vm1 = vcmask 588800  }
 0x1e8   :  { %6014 = vmatpush1.bf16.msra.mxu0 %v8073_v57  ;;  %5523 = vmatprep.subr.bf16.mxu1 %v8078_v60  ;;  %v8103_v19 = vld [vmem:[%s11342_s1 + $0x13e0] ss:$8 sps:$4 sm:$0xff]   ;;  %v8111_v1 = vld [vmem:[%s11342_s1 + $0x13f4] ss:$8 sps:$4 sm:$0xff]   ;;  %v10323_v21 = vrot.slane %v10303_v13, %v8761_v49  ;;  %v8109_v52 = vld [vmem:[%s11342_s1 + $0x13f0] ss:$8 sps:$4 sm:$0xff]  }
 0x1e9   :  { %6015 = vmatprep.subr.bf16.mxu0 %v8081_v61  ;;  %v8114_v59 = vld [vmem:[%s11342_s1 + $0x804] ss:$8 sps:$4 sm:$0xff]   ;;  %v963_v24 = vcombine.high %v10319_v20, %v10319_v20  ;;  %v8112_v28 = vld [vmem:[%s11342_s1 + $0x800] ss:$8 sps:$4 sm:$0xff]   ;;  %v8120_v30 = vld [vmem:[%s11342_s1 + $0x814] ss:$8 sps:$4 sm:$0xff]  }
 0x1ea   :  { %v8117_v11 = vld [vmem:[%s11342_s1 + $0x1404] ss:$8 sps:$4 sm:$0xff]   ;;  %v1110_v25 = vcombine.high %v10323_v21, %v10323_v21  ;;  %v8115_v29 = vld [vmem:[%s11342_s1 + $0x1400] ss:$8 sps:$4 sm:$0xff]   ;;  %v8123_v14 = vld [vmem:[%s11342_s1 + $0x1414] ss:$8 sps:$4 sm:$0xff]  }
 0x1eb   :  { %5524 = vmatpush1.bf16.msra.mxu1 %v8076_v40  ;;  %v10358_v15 = vrot.slane %v963_v24, %v8761_v49  ;;  %v8118_v32 = vld [vmem:[%s11342_s1 + $0x810] ss:$8 sps:$4 sm:$0xff]   ;;  %v8126_v34 = vld [vmem:[%s11342_s1 + $0x824] ss:$8 sps:$4 sm:$0xff]   ;;  %v8124_v36 = vld [vmem:[%s11342_s1 + $0x820] ss:$8 sps:$4 sm:$0xff]  }
 0x1ec   :  { %6016 = vmatpush1.bf16.msra.mxu0 %v8079_v41  ;;  %5525 = vmatprep.subr.bf16.mxu1 %v8084_v62  ;;  %v10361_v31 = vrot.slane %v1110_v25, %v8761_v49  ;;  %v8121_v33 = vld [vmem:[%s11342_s1 + $0x1410] ss:$8 sps:$4 sm:$0xff]   ;;  %v8129_v16 = vld [vmem:[%s11342_s1 + $0x1424] ss:$8 sps:$4 sm:$0xff]   ;;  %v8127_v37 = vld [vmem:[%s11342_s1 + $0x1420] ss:$8 sps:$4 sm:$0xff]  }
 0x1ed   :  { %6017 = vmatprep.subr.bf16.mxu0 %v8087_v63  ;;  %v8132_v56 = vld [vmem:[%s11342_s1 + $0x834] ss:$8 sps:$4 sm:$0xff]   ;;  %v8130_v43 = vld [vmem:[%s11342_s1 + $0x830] ss:$8 sps:$4 sm:$0xff]   ;;  %v8138_v45 = vld [vmem:[%s11342_s1 + $0x844] ss:$8 sps:$4 sm:$0xff]  }
 0x1ee   :  { %v8135_v23 = vld [vmem:[%s11342_s1 + $0x1434] ss:$8 sps:$4 sm:$0xff]   ;;  %v8133_v44 = vld [vmem:[%s11342_s1 + $0x1430] ss:$8 sps:$4 sm:$0xff]   ;;  %v8141_v46 = vld [vmem:[%s11342_s1 + $0x1444] ss:$8 sps:$4 sm:$0xff]  }
 0x1ef   :  { %5526 = vmatpush1.bf16.msra.mxu1 %v8082_v55  ;;  %v8136_v17 = vld [vmem:[%s11342_s1 + $0x840] ss:$8 sps:$4 sm:$0xff]   ;;  %v8144_v47 = vld [vmem:[%s11342_s1 + $0x854] ss:$8 sps:$4 sm:$0xff]   ;;  %v8142_v50 = vld [vmem:[%s11342_s1 + $0x850] ss:$8 sps:$4 sm:$0xff]  }
 0x1f0   :  { %6018 = vmatpush1.bf16.msra.mxu0 %v8085_v38  ;;  %5527 = vmatprep.subr.bf16.mxu1 %v8090_v2  ;;  %v8139_v35 = vld [vmem:[%s11342_s1 + $0x1440] ss:$8 sps:$4 sm:$0xff]   ;;  %v8147_v48 = vld [vmem:[%s11342_s1 + $0x1454] ss:$8 sps:$4 sm:$0xff]   ;;  %v8145_v51 = vld [vmem:[%s11342_s1 + $0x1450] ss:$8 sps:$4 sm:$0xff]  }
 0x1f1   :  { %6019 = vmatprep.subr.bf16.mxu0 %v8093_v3  ;;  %v8150_v53 = vld [vmem:[%s11342_s1 + $0x864] ss:$8 sps:$4 sm:$0xff]   ;;  %v8148_v39 = vld [vmem:[%s11342_s1 + $0x860] ss:$8 sps:$4 sm:$0xff]   ;;  %v8156_v60 = vld [vmem:[%s11342_s1 + $0x874] ss:$8 sps:$4 sm:$0xff]  }
 0x1f2   :  { %v8153_v54 = vld [vmem:[%s11342_s1 + $0x1464] ss:$8 sps:$4 sm:$0xff]   ;;  %v8151_v57 = vld [vmem:[%s11342_s1 + $0x1460] ss:$8 sps:$4 sm:$0xff]   ;;  %v8159_v61 = vld [vmem:[%s11342_s1 + $0x1474] ss:$8 sps:$4 sm:$0xff]  }
 0x1f3   :  { %5528 = vmatpush1.bf16.msra.mxu1 %v8088_v4  ;;  %v8154_v40 = vld [vmem:[%s11342_s1 + $0x870] ss:$8 sps:$4 sm:$0xff]   ;;  %v8162_v62 = vld [vmem:[%s11342_s1 + $0x884] ss:$8 sps:$4 sm:$0xff]   ;;  %v8160_v55 = vld [vmem:[%s11342_s1 + $0x880] ss:$8 sps:$4 sm:$0xff]  }
 0x1f4   :  { %6020 = vmatpush1.bf16.msra.mxu0 %v8091_v5  ;;  %5529 = vmatprep.subr.bf16.mxu1 %v8096_v6  ;;  %v8157_v41 = vld [vmem:[%s11342_s1 + $0x1470] ss:$8 sps:$4 sm:$0xff]   ;;  %v8165_v63 = vld [vmem:[%s11342_s1 + $0x1484] ss:$8 sps:$4 sm:$0xff]   ;;  %v8163_v38 = vld [vmem:[%s11342_s1 + $0x1480] ss:$8 sps:$4 sm:$0xff]  }
 0x1f5   :  { %6021 = vmatprep.subr.bf16.mxu0 %v8099_v7  ;;  %v8168_v2 = vld [vmem:[%s11342_s1 + $0x894] ss:$8 sps:$4 sm:$0xff]   ;;  %v8166_v4 = vld [vmem:[%s11342_s1 + $0x890] ss:$8 sps:$4 sm:$0xff]   ;;  %v8174_v6 = vld [vmem:[%s11342_s1 + $0x8a4] ss:$8 sps:$4 sm:$0xff]  }
 0x1f6   :  { %v8171_v3 = vld [vmem:[%s11342_s1 + $0x1494] ss:$8 sps:$4 sm:$0xff]   ;;  %v8169_v5 = vld [vmem:[%s11342_s1 + $0x1490] ss:$8 sps:$4 sm:$0xff]   ;;  %v8177_v7 = vld [vmem:[%s11342_s1 + $0x14a4] ss:$8 sps:$4 sm:$0xff]  }
 0x1f7   :  { %5530 = vmatpush1.bf16.msra.mxu1 %v8094_v8  ;;  %v8172_v8 = vld [vmem:[%s11342_s1 + $0x8a0] ss:$8 sps:$4 sm:$0xff]   ;;  %v8190_v24 = vld [vmem:[%s11342_s1 + $0x8d0] ss:$8 sps:$4 sm:$0xff]   ;;  %vm6398_vm2 = vcmask 41984  }
 0x1f8   :  { %6022 = vmatpush1.bf16.msra.mxu0 %v8097_v9  ;;  %5531 = vmatprep.subr.bf16.mxu1 %v8102_v10  ;;  %v8175_v9 = vld [vmem:[%s11342_s1 + $0x14a0] ss:$8 sps:$4 sm:$0xff]   ;;  %v8180_v10 = vld [vmem:[%s11342_s1 + $0x8b4] ss:$8 sps:$4 sm:$0xff]   ;;  %v8193_v25 = vld [vmem:[%s11342_s1 + $0x14d0] ss:$8 sps:$4 sm:$0xff]  }
 0x1f9   :  { %6023 = vmatprep.subr.bf16.mxu0 %v8105_v58  ;;  %v8183_v58 = vld [vmem:[%s11342_s1 + $0x14b4] ss:$8 sps:$4 sm:$0xff]  }
 0x1fb   :  { %5532 = vmatpush1.bf16.msra.mxu1 %v8100_v18  ;;  %v8178_v18 = vld [vmem:[%s11342_s1 + $0x8b0] ss:$8 sps:$4 sm:$0xff]  }
 0x1fc   :  { %6024 = vmatpush1.bf16.msra.mxu0 %v8103_v19  ;;  %5533 = vmatprep.subr.bf16.mxu1 %v8108_v0  ;;  %v8181_v19 = vld [vmem:[%s11342_s1 + $0x14b0] ss:$8 sps:$4 sm:$0xff]   ;;  %v8186_v0 = vld [vmem:[%s11342_s1 + $0x8c4] ss:$8 sps:$4 sm:$0xff]  }
 0x1fd   :  { %6025 = vmatprep.subr.bf16.mxu0 %v8111_v1  ;;  %v8189_v1 = vld [vmem:[%s11342_s1 + $0x14c4] ss:$8 sps:$4 sm:$0xff]  }
 0x1ff   :  { %5534 = vmatpush1.bf16.msra.mxu1 %v8106_v22  ;;  %v8184_v22 = vld [vmem:[%s11342_s1 + $0x8c0] ss:$8 sps:$4 sm:$0xff]  }
 0x200   :  { %6026 = vmatpush1.bf16.msra.mxu0 %v8109_v52  ;;  %5544 = vmatprep.subr.bf16.mxu1 %v8114_v59  ;;  %v8187_v52 = vld [vmem:[%s11342_s1 + $0x14c0] ss:$8 sps:$4 sm:$0xff]   ;;  %v8192_v59 = vld [vmem:[%s11342_s1 + $0x8d4] ss:$8 sps:$4 sm:$0xff]  }
 0x201   :  { %6036 = vmatprep.subr.bf16.mxu0 %v8117_v11  ;;  %v8195_v11 = vld [vmem:[%s11342_s1 + $0x14d4] ss:$8 sps:$4 sm:$0xff]  }
 0x202   :  { %5536 = vmatmul.mubr.bf16.vlgmr.msra.gmra.mrb[0].mxu1 %v945_v26  ;;  %v8198_v26 = vld [vmem:[%s11342_s1 + $0x8e4] ss:$8 sps:$4 sm:$0xff]  }
 0x203   :  { %6028 = vmatmul.mubr.bf16.vlgmr.msra.gmra.mrb[0].mxu0 %v1092_v27  ;;  %5545 = vmatpush1.bf16.msra.mxu1 %v8112_v28  ;;  %v8201_v27 = vld [vmem:[%s11342_s1 + $0x14e4] ss:$8 sps:$4 sm:$0xff]   ;;  %v8196_v28 = vld [vmem:[%s11342_s1 + $0x8e0] ss:$8 sps:$4 sm:$0xff]  }
 0x204   :  { %6037 = vmatpush1.bf16.msra.mxu0 %v8115_v29  ;;  %5546 = vmatprep.subr.bf16.mxu1 %v8120_v30  ;;  %v8199_v29 = vld [vmem:[%s11342_s1 + $0x14e0] ss:$8 sps:$4 sm:$0xff]   ;;  %v8204_v30 = vld [vmem:[%s11342_s1 + $0x8f4] ss:$8 sps:$4 sm:$0xff]  }
 0x205   :  { %6038 = vmatprep.subr.bf16.mxu0 %v8123_v14  ;;  %5576 = vmatprep.mubr.bf16.mxu1 %v10358_v15  ;;  %v8207_v14 = vld [vmem:[%s11342_s1 + $0x14f4] ss:$8 sps:$4 sm:$0xff]  }
 0x206   :  { %6068 = vmatprep.mubr.bf16.mxu0 %v10361_v31 }
 0x207   :  { %5547 = vmatpush1.bf16.msra.mxu1 %v8118_v32  ;;  %v8202_v32 = vld [vmem:[%s11342_s1 + $0x8f0] ss:$8 sps:$4 sm:$0xff]  }
 0x208   :  { %6039 = vmatpush1.bf16.msra.mxu0 %v8121_v33  ;;  %5548 = vmatprep.subr.bf16.mxu1 %v8126_v34  ;;  %v8205_v33 = vld [vmem:[%s11342_s1 + $0x14f0] ss:$8 sps:$4 sm:$0xff]   ;;  %v8210_v34 = vld [vmem:[%s11342_s1 + $0x904] ss:$8 sps:$4 sm:$0xff]  }
 0x209   :  { %6040 = vmatprep.subr.bf16.mxu0 %v8129_v16  ;;  %v8213_v16 = vld [vmem:[%s11342_s1 + $0x1504] ss:$8 sps:$4 sm:$0xff]  }
 0x20b   :  { %5549 = vmatpush1.bf16.msra.mxu1 %v8124_v36  ;;  %v10547_v36 = vrot.slane %v10319_v20, %v8761_v49  ;;  %v8216_v20 = vld [vmem:[%s11342_s1 + $0x914] ss:$8 sps:$4 sm:$0xff]  }
 0x20c   :  { %6041 = vmatpush1.bf16.msra.mxu0 %v8127_v37  ;;  %5550 = vmatprep.subr.bf16.mxu1 %v8132_v56  ;;  %v10551_v37 = vrot.slane %v10323_v21, %v8761_v49  ;;  %v8208_v56 = vld [vmem:[%s11342_s1 + $0x900] ss:$8 sps:$4 sm:$0xff]   ;;  %v8219_v21 = vld [vmem:[%s11342_s1 + $0x1514] ss:$8 sps:$4 sm:$0xff]  }
 0x20d   :  { %6042 = vmatprep.subr.bf16.mxu0 %v8135_v23  ;;  %v8211_v23 = vld [vmem:[%s11342_s1 + $0x1500] ss:$8 sps:$4 sm:$0xff]  }
 0x20f   :  { %5551 = vmatpush1.bf16.msra.mxu1 %v8130_v43  ;;  %v995_v43 = vcombine.high %v10358_v15, %v10358_v15  ;;  %v8222_v15 = vld [vmem:[%s11342_s1 + $0x924] ss:$8 sps:$4 sm:$0xff]  }
 0x210   :  { %6043 = vmatpush1.bf16.msra.mxu0 %v8133_v44  ;;  %5552 = vmatprep.subr.bf16.mxu1 %v8138_v45  ;;  %v1142_v44 = vcombine.high %v10361_v31, %v10361_v31  ;;  %v8214_v45 = vld [vmem:[%s11342_s1 + $0x910] ss:$8 sps:$4 sm:$0xff]   ;;  %v8225_v31 = vld [vmem:[%s11342_s1 + $0x1524] ss:$8 sps:$4 sm:$0xff]  }
 0x211   :  { %6044 = vmatprep.subr.bf16.mxu0 %v8141_v46  ;;  %v8217_v46 = vld [vmem:[%s11342_s1 + $0x1510] ss:$8 sps:$4 sm:$0xff]  }
 0x213   :  { %5553 = vmatpush1.bf16.msra.mxu1 %v8136_v17  ;;  %v8220_v17 = vld [vmem:[%s11342_s1 + $0x920] ss:$8 sps:$4 sm:$0xff]  }
 0x214   :  { %6045 = vmatpush1.bf16.msra.mxu0 %v8139_v35  ;;  %5554 = vmatprep.subr.bf16.mxu1 %v8144_v47  ;;  %v8223_v35 = vld [vmem:[%s11342_s1 + $0x1520] ss:$8 sps:$4 sm:$0xff]   ;;  %v8228_v47 = vld [vmem:[%s11342_s1 + $0x934] ss:$8 sps:$4 sm:$0xff]  }
 0x215   :  { %6046 = vmatprep.subr.bf16.mxu0 %v8147_v48  ;;  %v8231_v48 = vld [vmem:[%s11342_s1 + $0x1534] ss:$8 sps:$4 sm:$0xff]  }
 0x217   :  { %5555 = vmatpush1.bf16.msra.mxu1 %v8142_v50  ;;  %v8226_v50 = vld [vmem:[%s11342_s1 + $0x930] ss:$8 sps:$4 sm:$0xff]  }
 0x218   :  { %6047 = vmatpush1.bf16.msra.mxu0 %v8145_v51  ;;  %5556 = vmatprep.subr.bf16.mxu1 %v8150_v53  ;;  %v8229_v51 = vld [vmem:[%s11342_s1 + $0x1530] ss:$8 sps:$4 sm:$0xff]   ;;  %v8234_v53 = vld [vmem:[%s11342_s1 + $0x944] ss:$8 sps:$4 sm:$0xff]  }
 0x219   :  { %6048 = vmatprep.subr.bf16.mxu0 %v8153_v54  ;;  %v8237_v54 = vld [vmem:[%s11342_s1 + $0x1544] ss:$8 sps:$4 sm:$0xff]  }
 0x21b   :  { %5557 = vmatpush1.bf16.msra.mxu1 %v8148_v39  ;;  %v8232_v39 = vld [vmem:[%s11342_s1 + $0x940] ss:$8 sps:$4 sm:$0xff]  }
 0x21c   :  { %6049 = vmatpush1.bf16.msra.mxu0 %v8151_v57  ;;  %5558 = vmatprep.subr.bf16.mxu1 %v8156_v60  ;;  %v8235_v57 = vld [vmem:[%s11342_s1 + $0x1540] ss:$8 sps:$4 sm:$0xff]   ;;  %v8240_v60 = vld [vmem:[%s11342_s1 + $0x954] ss:$8 sps:$4 sm:$0xff]  }
 0x21d   :  { %6050 = vmatprep.subr.bf16.mxu0 %v8159_v61  ;;  %v8243_v61 = vld [vmem:[%s11342_s1 + $0x1554] ss:$8 sps:$4 sm:$0xff]  }
 0x21f   :  { %5559 = vmatpush1.bf16.msra.mxu1 %v8154_v40  ;;  %v8238_v40 = vld [vmem:[%s11342_s1 + $0x950] ss:$8 sps:$4 sm:$0xff]  }
 0x220   :  { %6051 = vmatpush1.bf16.msra.mxu0 %v8157_v41  ;;  %5560 = vmatprep.subr.bf16.mxu1 %v8162_v62  ;;  %v8241_v41 = vld [vmem:[%s11342_s1 + $0x1550] ss:$8 sps:$4 sm:$0xff]   ;;  %v8246_v62 = vld [vmem:[%s11342_s1 + $0x964] ss:$8 sps:$4 sm:$0xff]  }
 0x221   :  { %6052 = vmatprep.subr.bf16.mxu0 %v8165_v63  ;;  %v8249_v63 = vld [vmem:[%s11342_s1 + $0x1564] ss:$8 sps:$4 sm:$0xff]  }
 0x223   :  { %5561 = vmatpush1.bf16.msra.mxu1 %v8160_v55  ;;  %v8244_v55 = vld [vmem:[%s11342_s1 + $0x960] ss:$8 sps:$4 sm:$0xff]  }
 0x224   :  { %6053 = vmatpush1.bf16.msra.mxu0 %v8163_v38  ;;  %5562 = vmatprep.subr.bf16.mxu1 %v8168_v2  ;;  %v8247_v38 = vld [vmem:[%s11342_s1 + $0x1560] ss:$8 sps:$4 sm:$0xff]   ;;  %v8252_v2 = vld [vmem:[%s11342_s1 + $0x974] ss:$8 sps:$4 sm:$0xff]  }
 0x225   :  { %6054 = vmatprep.subr.bf16.mxu0 %v8171_v3  ;;  %v8255_v3 = vld [vmem:[%s11342_s1 + $0x1574] ss:$8 sps:$4 sm:$0xff]  }
 0x227   :  { %5563 = vmatpush1.bf16.msra.mxu1 %v8166_v4  ;;  %v8250_v4 = vld [vmem:[%s11342_s1 + $0x970] ss:$8 sps:$4 sm:$0xff]  }
 0x228   :  { %6055 = vmatpush1.bf16.msra.mxu0 %v8169_v5  ;;  %5564 = vmatprep.subr.bf16.mxu1 %v8174_v6  ;;  %v8253_v5 = vld [vmem:[%s11342_s1 + $0x1570] ss:$8 sps:$4 sm:$0xff]   ;;  %v8258_v6 = vld [vmem:[%s11342_s1 + $0x984] ss:$8 sps:$4 sm:$0xff]  }
 0x229   :  { %6056 = vmatprep.subr.bf16.mxu0 %v8177_v7  ;;  %v8261_v7 = vld [vmem:[%s11342_s1 + $0x1584] ss:$8 sps:$4 sm:$0xff]  }
 0x22b   :  { %5565 = vmatpush1.bf16.msra.mxu1 %v8172_v8  ;;  %v8256_v8 = vld [vmem:[%s11342_s1 + $0x980] ss:$8 sps:$4 sm:$0xff]  }
 0x22c   :  { %6057 = vmatpush1.bf16.msra.mxu0 %v8175_v9  ;;  %5566 = vmatprep.subr.bf16.mxu1 %v8180_v10  ;;  %v8259_v9 = vld [vmem:[%s11342_s1 + $0x1580] ss:$8 sps:$4 sm:$0xff]   ;;  %v8264_v10 = vld [vmem:[%s11342_s1 + $0x994] ss:$8 sps:$4 sm:$0xff]  }
 0x22d   :  { %6058 = vmatprep.subr.bf16.mxu0 %v8183_v58  ;;  %v8267_v58 = vld [vmem:[%s11342_s1 + $0x1594] ss:$8 sps:$4 sm:$0xff]  }
 0x22f   :  { %5567 = vmatpush1.bf16.msra.mxu1 %v8178_v18  ;;  %v8262_v18 = vld [vmem:[%s11342_s1 + $0x990] ss:$8 sps:$4 sm:$0xff]  }
 0x230   :  { %6059 = vmatpush1.bf16.msra.mxu0 %v8181_v19  ;;  %5568 = vmatprep.subr.bf16.mxu1 %v8186_v0  ;;  %v8265_v19 = vld [vmem:[%s11342_s1 + $0x1590] ss:$8 sps:$4 sm:$0xff]   ;;  %v8270_v0 = vld [vmem:[%s11342_s1 + $0x9a4] ss:$8 sps:$4 sm:$0xff]  }
 0x231   :  { %6060 = vmatprep.subr.bf16.mxu0 %v8189_v1  ;;  %v8273_v1 = vld [vmem:[%s11342_s1 + $0x15a4] ss:$8 sps:$4 sm:$0xff]  }
 0x233   :  { %5569 = vmatpush1.bf16.msra.mxu1 %v8184_v22  ;;  %v8268_v22 = vld [vmem:[%s11342_s1 + $0x9a0] ss:$8 sps:$4 sm:$0xff]  }
 0x234   :  { %6061 = vmatpush1.bf16.msra.mxu0 %v8187_v52  ;;  %5570 = vmatprep.subr.bf16.mxu1 %v8192_v59  ;;  %v8271_v52 = vld [vmem:[%s11342_s1 + $0x15a0] ss:$8 sps:$4 sm:$0xff]   ;;  %v8276_v59 = vld [vmem:[%s11342_s1 + $0x9b4] ss:$8 sps:$4 sm:$0xff]  }
 0x235   :  { %6062 = vmatprep.subr.bf16.mxu0 %v8195_v11  ;;  %v8279_v11 = vld [vmem:[%s11342_s1 + $0x15b4] ss:$8 sps:$4 sm:$0xff]  }
 0x237   :  { %5571 = vmatpush1.bf16.msra.mxu1 %v8190_v24  ;;  %v8274_v24 = vld [vmem:[%s11342_s1 + $0x9b0] ss:$8 sps:$4 sm:$0xff]  }
 0x238   :  { %6063 = vmatpush1.bf16.msra.mxu0 %v8193_v25  ;;  %5572 = vmatprep.subr.bf16.mxu1 %v8198_v26  ;;  %v8277_v25 = vld [vmem:[%s11342_s1 + $0x15b0] ss:$8 sps:$4 sm:$0xff]   ;;  %v8282_v26 = vld [vmem:[%s11342_s1 + $0x9c4] ss:$8 sps:$4 sm:$0xff]  }
 0x239   :  { %6064 = vmatprep.subr.bf16.mxu0 %v8201_v27  ;;  %v8285_v27 = vld [vmem:[%s11342_s1 + $0x15c4] ss:$8 sps:$4 sm:$0xff]  }
 0x23b   :  { %5573 = vmatpush1.bf16.msra.mxu1 %v8196_v28  ;;  %v8280_v28 = vld [vmem:[%s11342_s1 + $0x9c0] ss:$8 sps:$4 sm:$0xff]  }
 0x23c   :  { %6065 = vmatpush1.bf16.msra.mxu0 %v8199_v29  ;;  %5574 = vmatprep.subr.bf16.mxu1 %v8204_v30  ;;  %v8283_v29 = vld [vmem:[%s11342_s1 + $0x15c0] ss:$8 sps:$4 sm:$0xff]   ;;  %v8288_v30 = vld [vmem:[%s11342_s1 + $0x9d4] ss:$8 sps:$4 sm:$0xff]  }
 0x23d   :  { %6066 = vmatprep.subr.bf16.mxu0 %v8207_v14  ;;  %v8291_v14 = vld [vmem:[%s11342_s1 + $0x15d4] ss:$8 sps:$4 sm:$0xff]  }
 0x23f   :  { %5575 = vmatpush1.bf16.msra.mxu1 %v8202_v32  ;;  %v8286_v32 = vld [vmem:[%s11342_s1 + $0x9d0] ss:$8 sps:$4 sm:$0xff]  }
 0x240   :  { %6067 = vmatpush1.bf16.msra.mxu0 %v8205_v33  ;;  %5585 = vmatprep.subr.bf16.mxu1 %v8210_v34  ;;  %v8289_v33 = vld [vmem:[%s11342_s1 + $0x15d0] ss:$8 sps:$4 sm:$0xff]   ;;  %v8294_v34 = vld [vmem:[%s11342_s1 + $0x9e4] ss:$8 sps:$4 sm:$0xff]  }
 0x241   :  { %6077 = vmatprep.subr.bf16.mxu0 %v8213_v16  ;;  %v8297_v16 = vld [vmem:[%s11342_s1 + $0x15e4] ss:$8 sps:$4 sm:$0xff]  }
 0x242   :  { %5577 = vmatmul.mubr.bf16.vlgmr.msra.gmra.mrb[0].mxu1 %v10547_v36 }
 0x243   :  { %6069 = vmatmul.mubr.bf16.vlgmr.msra.gmra.mrb[0].mxu0 %v10551_v37  ;;  %5586 = vmatpush1.bf16.msra.mxu1 %v8208_v56  ;;  %v948_v56 = vcombine.high %v10298_v12, %v10298_v12  ;;  %v8303_v12 = vld [vmem:[%s11342_s1 + $0x15f4] ss:$8 sps:$4 sm:$0xff]  }
 0x244   :  { %6078 = vmatpush1.bf16.msra.mxu0 %v8211_v23  ;;  %5587 = vmatprep.subr.bf16.mxu1 %v8216_v20  ;;  %v1095_v23 = vcombine.high %v10303_v13, %v10303_v13  ;;  %v8292_v20 = vld [vmem:[%s11342_s1 + $0x9e0] ss:$8 sps:$4 sm:$0xff]  }
 0x245   :  { %6079 = vmatprep.subr.bf16.mxu0 %v8219_v21  ;;  %5617 = vmatprep.mubr.bf16.mxu1 %v995_v43  ;;  %v8295_v21 = vld [vmem:[%s11342_s1 + $0x15e0] ss:$8 sps:$4 sm:$0xff]   ;;  %v8300_v43 = vld [vmem:[%s11342_s1 + $0x9f4] ss:$8 sps:$4 sm:$0xff]   ;;  %v10744_v13 = vrot.slane %v948_v56, %v8761_v49  ;;  %v8370_v56 = vld [vmem:[%s11342_s1 + $0xab0] ss:$8 sps:$4 sm:$0xff]  }
 0x246   :  { %6109 = vmatprep.mubr.bf16.mxu0 %v1142_v44  ;;  %v10747_v44 = vrot.slane %v1095_v23, %v8761_v49  ;;  %v8373_v23 = vld [vmem:[%s11342_s1 + $0x16b0] ss:$8 sps:$4 sm:$0xff]  }
 0x247   :  { %5588 = vmatpush1.bf16.msra.mxu1 %v8214_v45  ;;  %v8298_v45 = vld [vmem:[%s11342_s1 + $0x9f0] ss:$8 sps:$4 sm:$0xff]  }
 0x248   :  { %6080 = vmatpush1.bf16.msra.mxu0 %v8217_v46  ;;  %5589 = vmatprep.subr.bf16.mxu1 %v8222_v15  ;;  %v8301_v46 = vld [vmem:[%s11342_s1 + $0x15f0] ss:$8 sps:$4 sm:$0xff]   ;;  %v8306_v15 = vld [vmem:[%s11342_s1 + $0xa04] ss:$8 sps:$4 sm:$0xff]  }
 0x249   :  { %6081 = vmatprep.subr.bf16.mxu0 %v8225_v31  ;;  %v8309_v31 = vld [vmem:[%s11342_s1 + $0x1604] ss:$8 sps:$4 sm:$0xff]  }
 0x24b   :  { %5590 = vmatpush1.bf16.msra.mxu1 %v8220_v17  ;;  %v964_v17 = vcombine.high %v10744_v13, %v10744_v13 }
 0x24c   :  { %6082 = vmatpush1.bf16.msra.mxu0 %v8223_v35  ;;  %5591 = vmatprep.subr.bf16.mxu1 %v8228_v47  ;;  %v1111_v35 = vcombine.high %v10747_v44, %v10747_v44  ;;  %v993_v47 = vcombine.high %v10547_v36, %v10547_v36  ;;  %v8315_v36 = vld [vmem:[%s11342_s1 + $0x1614] ss:$8 sps:$4 sm:$0xff]  }
 0x24d   :  { %6083 = vmatprep.subr.bf16.mxu0 %v8231_v48  ;;  %v1140_v48 = vcombine.high %v10551_v37, %v10551_v37  ;;  %v10782_v37 = vrot.slane %v964_v17, %v8761_v49  ;;  %v8390_v17 = vld [vmem:[%s11342_s1 + $0xae4] ss:$8 sps:$4 sm:$0xff]  }
 0x24f   :  { %5592 = vmatpush1.bf16.msra.mxu1 %v8226_v50  ;;  %v8304_v50 = vld [vmem:[%s11342_s1 + $0xa00] ss:$8 sps:$4 sm:$0xff]  }
 0x250   :  { %6084 = vmatpush1.bf16.msra.mxu0 %v8229_v51  ;;  %5593 = vmatprep.subr.bf16.mxu1 %v8234_v53  ;;  %v8307_v51 = vld [vmem:[%s11342_s1 + $0x1600] ss:$8 sps:$4 sm:$0xff]   ;;  %v8312_v53 = vld [vmem:[%s11342_s1 + $0xa14] ss:$8 sps:$4 sm:$0xff]  }
 0x251   :  { %6085 = vmatprep.subr.bf16.mxu0 %v8237_v54  ;;  %v10785_v54 = vrot.slane %v1111_v35, %v8761_v49  ;;  %v8393_v35 = vld [vmem:[%s11342_s1 + $0x16e4] ss:$8 sps:$4 sm:$0xff]  }
 0x253   :  { %5594 = vmatpush1.bf16.msra.mxu1 %v8232_v39  ;;  %v8310_v39 = vld [vmem:[%s11342_s1 + $0xa10] ss:$8 sps:$4 sm:$0xff]  }
 0x254   :  { %6086 = vmatpush1.bf16.msra.mxu0 %v8235_v57  ;;  %5595 = vmatprep.subr.bf16.mxu1 %v8240_v60  ;;  %v8313_v57 = vld [vmem:[%s11342_s1 + $0x1610] ss:$8 sps:$4 sm:$0xff]   ;;  %v8318_v60 = vld [vmem:[%s11342_s1 + $0xa24] ss:$8 sps:$4 sm:$0xff]  }
 0x255   :  { %6087 = vmatprep.subr.bf16.mxu0 %v8243_v61  ;;  %v8321_v61 = vld [vmem:[%s11342_s1 + $0x1624] ss:$8 sps:$4 sm:$0xff]  }
 0x257   :  { %5596 = vmatpush1.bf16.msra.mxu1 %v8238_v40  ;;  %v8316_v40 = vld [vmem:[%s11342_s1 + $0xa20] ss:$8 sps:$4 sm:$0xff]  }
 0x258   :  { %6088 = vmatpush1.bf16.msra.mxu0 %v8241_v41  ;;  %5597 = vmatprep.subr.bf16.mxu1 %v8246_v62  ;;  %v8319_v41 = vld [vmem:[%s11342_s1 + $0x1620] ss:$8 sps:$4 sm:$0xff]   ;;  %v8324_v62 = vld [vmem:[%s11342_s1 + $0xa34] ss:$8 sps:$4 sm:$0xff]  }
 0x259   :  { %6089 = vmatprep.subr.bf16.mxu0 %v8249_v63  ;;  %v8327_v63 = vld [vmem:[%s11342_s1 + $0x1634] ss:$8 sps:$4 sm:$0xff]  }
 0x25b   :  { %5598 = vmatpush1.bf16.msra.mxu1 %v8244_v55  ;;  %v8322_v55 = vld [vmem:[%s11342_s1 + $0xa30] ss:$8 sps:$4 sm:$0xff]  }
 0x25c   :  { %6090 = vmatpush1.bf16.msra.mxu0 %v8247_v38  ;;  %5599 = vmatprep.subr.bf16.mxu1 %v8252_v2  ;;  %v8325_v38 = vld [vmem:[%s11342_s1 + $0x1630] ss:$8 sps:$4 sm:$0xff]   ;;  %v8330_v2 = vld [vmem:[%s11342_s1 + $0xa44] ss:$8 sps:$4 sm:$0xff]  }
 0x25d   :  { %6091 = vmatprep.subr.bf16.mxu0 %v8255_v3  ;;  %v8333_v3 = vld [vmem:[%s11342_s1 + $0x1644] ss:$8 sps:$4 sm:$0xff]  }
 0x25f   :  { %5600 = vmatpush1.bf16.msra.mxu1 %v8250_v4  ;;  %v8328_v4 = vld [vmem:[%s11342_s1 + $0xa40] ss:$8 sps:$4 sm:$0xff]  }
 0x260   :  { %6092 = vmatpush1.bf16.msra.mxu0 %v8253_v5  ;;  %5601 = vmatprep.subr.bf16.mxu1 %v8258_v6  ;;  %v8331_v5 = vld [vmem:[%s11342_s1 + $0x1640] ss:$8 sps:$4 sm:$0xff]   ;;  %v8336_v6 = vld [vmem:[%s11342_s1 + $0xa54] ss:$8 sps:$4 sm:$0xff]  }
 0x261   :  { %6093 = vmatprep.subr.bf16.mxu0 %v8261_v7  ;;  %v8339_v7 = vld [vmem:[%s11342_s1 + $0x1654] ss:$8 sps:$4 sm:$0xff]  }
 0x263   :  { %5602 = vmatpush1.bf16.msra.mxu1 %v8256_v8  ;;  %v8334_v8 = vld [vmem:[%s11342_s1 + $0xa50] ss:$8 sps:$4 sm:$0xff]  }
 0x264   :  { %6094 = vmatpush1.bf16.msra.mxu0 %v8259_v9  ;;  %5603 = vmatprep.subr.bf16.mxu1 %v8264_v10  ;;  %v8337_v9 = vld [vmem:[%s11342_s1 + $0x1650] ss:$8 sps:$4 sm:$0xff]   ;;  %v8342_v10 = vld [vmem:[%s11342_s1 + $0xa64] ss:$8 sps:$4 sm:$0xff]  }
 0x265   :  { %6095 = vmatprep.subr.bf16.mxu0 %v8267_v58  ;;  %v8345_v58 = vld [vmem:[%s11342_s1 + $0x1664] ss:$8 sps:$4 sm:$0xff]  }
 0x267   :  { %5604 = vmatpush1.bf16.msra.mxu1 %v8262_v18  ;;  %v8340_v18 = vld [vmem:[%s11342_s1 + $0xa60] ss:$8 sps:$4 sm:$0xff]  }
 0x268   :  { %6096 = vmatpush1.bf16.msra.mxu0 %v8265_v19  ;;  %5605 = vmatprep.subr.bf16.mxu1 %v8270_v0  ;;  %v8343_v19 = vld [vmem:[%s11342_s1 + $0x1660] ss:$8 sps:$4 sm:$0xff]   ;;  %v8348_v0 = vld [vmem:[%s11342_s1 + $0xa74] ss:$8 sps:$4 sm:$0xff]  }
 0x269   :  { %6097 = vmatprep.subr.bf16.mxu0 %v8273_v1  ;;  %v8351_v1 = vld [vmem:[%s11342_s1 + $0x1674] ss:$8 sps:$4 sm:$0xff]  }
 0x26b   :  { %5606 = vmatpush1.bf16.msra.mxu1 %v8268_v22  ;;  %v8346_v22 = vld [vmem:[%s11342_s1 + $0xa70] ss:$8 sps:$4 sm:$0xff]  }
 0x26c   :  { %6098 = vmatpush1.bf16.msra.mxu0 %v8271_v52  ;;  %5607 = vmatprep.subr.bf16.mxu1 %v8276_v59  ;;  %v8349_v52 = vld [vmem:[%s11342_s1 + $0x1670] ss:$8 sps:$4 sm:$0xff]   ;;  %v8354_v59 = vld [vmem:[%s11342_s1 + $0xa84] ss:$8 sps:$4 sm:$0xff]  }
 0x26d   :  { %6099 = vmatprep.subr.bf16.mxu0 %v8279_v11  ;;  %v8357_v11 = vld [vmem:[%s11342_s1 + $0x1684] ss:$8 sps:$4 sm:$0xff]  }
 0x26f   :  { %5608 = vmatpush1.bf16.msra.mxu1 %v8274_v24  ;;  %v8352_v24 = vld [vmem:[%s11342_s1 + $0xa80] ss:$8 sps:$4 sm:$0xff]  }
 0x270   :  { %6100 = vmatpush1.bf16.msra.mxu0 %v8277_v25  ;;  %5609 = vmatprep.subr.bf16.mxu1 %v8282_v26  ;;  %v8355_v25 = vld [vmem:[%s11342_s1 + $0x1680] ss:$8 sps:$4 sm:$0xff]   ;;  %v8360_v26 = vld [vmem:[%s11342_s1 + $0xa94] ss:$8 sps:$4 sm:$0xff]  }
 0x271   :  { %6101 = vmatprep.subr.bf16.mxu0 %v8285_v27  ;;  %v8363_v27 = vld [vmem:[%s11342_s1 + $0x1694] ss:$8 sps:$4 sm:$0xff]  }
 0x273   :  { %5610 = vmatpush1.bf16.msra.mxu1 %v8280_v28  ;;  %v8358_v28 = vld [vmem:[%s11342_s1 + $0xa90] ss:$8 sps:$4 sm:$0xff]  }
 0x274   :  { %6102 = vmatpush1.bf16.msra.mxu0 %v8283_v29  ;;  %5611 = vmatprep.subr.bf16.mxu1 %v8288_v30  ;;  %v8361_v29 = vld [vmem:[%s11342_s1 + $0x1690] ss:$8 sps:$4 sm:$0xff]   ;;  %v8366_v30 = vld [vmem:[%s11342_s1 + $0xaa4] ss:$8 sps:$4 sm:$0xff]  }
 0x275   :  { %6103 = vmatprep.subr.bf16.mxu0 %v8291_v14  ;;  %v8369_v14 = vld [vmem:[%s11342_s1 + $0x16a4] ss:$8 sps:$4 sm:$0xff]  }
 0x277   :  { %5612 = vmatpush1.bf16.msra.mxu1 %v8286_v32  ;;  %v8364_v32 = vld [vmem:[%s11342_s1 + $0xaa0] ss:$8 sps:$4 sm:$0xff]  }
 0x278   :  { %6104 = vmatpush1.bf16.msra.mxu0 %v8289_v33  ;;  %5613 = vmatprep.subr.bf16.mxu1 %v8294_v34  ;;  %v8367_v33 = vld [vmem:[%s11342_s1 + $0x16a0] ss:$8 sps:$4 sm:$0xff]   ;;  %v8372_v34 = vld [vmem:[%s11342_s1 + $0xab4] ss:$8 sps:$4 sm:$0xff]  }
 0x279   :  { %6105 = vmatprep.subr.bf16.mxu0 %v8297_v16  ;;  %v8375_v16 = vld [vmem:[%s11342_s1 + $0x16b4] ss:$8 sps:$4 sm:$0xff]  }
 0x27b   :  { %5614 = vmatpush1.bf16.msra.mxu1 %v8292_v20  ;;  %v8378_v20 = vld [vmem:[%s11342_s1 + $0xac4] ss:$8 sps:$4 sm:$0xff]  }
 0x27c   :  { %6106 = vmatpush1.bf16.msra.mxu0 %v8295_v21  ;;  %5615 = vmatprep.subr.bf16.mxu1 %v8300_v43  ;;  %v8381_v21 = vld [vmem:[%s11342_s1 + $0x16c4] ss:$8 sps:$4 sm:$0xff]   ;;  %v8376_v43 = vld [vmem:[%s11342_s1 + $0xac0] ss:$8 sps:$4 sm:$0xff]  }
 0x27d   :  { %6107 = vmatprep.subr.bf16.mxu0 %v8303_v12  ;;  %v8379_v12 = vld [vmem:[%s11342_s1 + $0x16c0] ss:$8 sps:$4 sm:$0xff]  }
 0x27f   :  { %5616 = vmatpush1.bf16.msra.mxu1 %v8298_v45  ;;  %v8384_v45 = vld [vmem:[%s11342_s1 + $0xad4] ss:$8 sps:$4 sm:$0xff]  }
 0x280   :  { %6108 = vmatpush1.bf16.msra.mxu0 %v8301_v46  ;;  %5626 = vmatprep.subr.bf16.mxu1 %v8306_v15  ;;  %v8387_v46 = vld [vmem:[%s11342_s1 + $0x16d4] ss:$8 sps:$4 sm:$0xff]   ;;  %v8382_v15 = vld [vmem:[%s11342_s1 + $0xad0] ss:$8 sps:$4 sm:$0xff]  }
 0x281   :  { %6118 = vmatprep.subr.bf16.mxu0 %v8309_v31  ;;  %v8385_v31 = vld [vmem:[%s11342_s1 + $0x16d0] ss:$8 sps:$4 sm:$0xff]  }
 0x282   :  { %5618 = vmatmul.mubr.bf16.vlgmr.msra.gmra.mrb[0].mxu1 %v993_v47  ;;  %v8388_v47 = vld [vmem:[%s11342_s1 + $0xae0] ss:$8 sps:$4 sm:$0xff]  }
 0x283   :  { %6110 = vmatmul.mubr.bf16.vlgmr.msra.gmra.mrb[0].mxu0 %v1140_v48  ;;  %5627 = vmatpush1.bf16.msra.mxu1 %v8304_v50  ;;  %v8391_v48 = vld [vmem:[%s11342_s1 + $0x16e0] ss:$8 sps:$4 sm:$0xff]   ;;  %v8396_v50 = vld [vmem:[%s11342_s1 + $0xaf4] ss:$8 sps:$4 sm:$0xff]  }
 0x284   :  { %6119 = vmatpush1.bf16.msra.mxu0 %v8307_v51  ;;  %5628 = vmatprep.subr.bf16.mxu1 %v8312_v53  ;;  %v8399_v51 = vld [vmem:[%s11342_s1 + $0x16f4] ss:$8 sps:$4 sm:$0xff]   ;;  %v8394_v53 = vld [vmem:[%s11342_s1 + $0xaf0] ss:$8 sps:$4 sm:$0xff]  }
 0x285   :  { %6120 = vmatprep.subr.bf16.mxu0 %v8315_v36  ;;  %5658 = vmatprep.mubr.bf16.mxu1 %v10782_v37  ;;  %v8397_v36 = vld [vmem:[%s11342_s1 + $0x16f0] ss:$8 sps:$4 sm:$0xff]  }
 0x286   :  { %6150 = vmatprep.mubr.bf16.mxu0 %v10785_v54 }
 0x287   :  { %5629 = vmatpush1.bf16.msra.mxu1 %v8310_v39  ;;  %v8403_v39 = vld [vmem:[%s11342_s1 + $0xb04] ss:$8 sps:$4 sm:$0xff]  }
 0x288   :  { %6121 = vmatpush1.bf16.msra.mxu0 %v8313_v57  ;;  %5630 = vmatprep.subr.bf16.mxu1 %v8318_v60  ;;  %v8407_v57 = vld [vmem:[%s11342_s1 + $0x1704] ss:$8 sps:$4 sm:$0xff]   ;;  %v10971_v60 = vrot.slane %v10744_v13, %v8761_v49  ;;  %v8410_v13 = vld [vmem:[%s11342_s1 + $0xb14] ss:$8 sps:$4 sm:$0xff]  }
 0x289   :  { %6122 = vmatprep.subr.bf16.mxu0 %v8321_v61  ;;  %v10975_v61 = vrot.slane %v10747_v44, %v8761_v49  ;;  %v8413_v44 = vld [vmem:[%s11342_s1 + $0x1714] ss:$8 sps:$4 sm:$0xff]  }
 0x28b   :  { %5631 = vmatpush1.bf16.msra.mxu1 %v8316_v40  ;;  %v8401_v40 = vld [vmem:[%s11342_s1 + $0xb00] ss:$8 sps:$4 sm:$0xff]  }
 0x28c   :  { %6123 = vmatpush1.bf16.msra.mxu0 %v8319_v41  ;;  %5632 = vmatprep.subr.bf16.mxu1 %v8324_v62  ;;  %v8405_v41 = vld [vmem:[%s11342_s1 + $0x1700] ss:$8 sps:$4 sm:$0xff]   ;;  %v996_v62 = vcombine.high %v10782_v37, %v10782_v37  ;;  %v8416_v37 = vld [vmem:[%s11342_s1 + $0xb24] ss:$8 sps:$4 sm:$0xff]  }
 0x28d   :  { %6124 = vmatprep.subr.bf16.mxu0 %v8327_v63  ;;  %v1143_v63 = vcombine.high %v10785_v54, %v10785_v54  ;;  %v8419_v54 = vld [vmem:[%s11342_s1 + $0x1724] ss:$8 sps:$4 sm:$0xff]  }
 0x28f   :  { %5633 = vmatpush1.bf16.msra.mxu1 %v8322_v55  ;;  %v8408_v55 = vld [vmem:[%s11342_s1 + $0xb10] ss:$8 sps:$4 sm:$0xff]  }
 0x290   :  { %6125 = vmatpush1.bf16.msra.mxu0 %v8325_v38  ;;  %5634 = vmatprep.subr.bf16.mxu1 %v8330_v2  ;;  %v8411_v38 = vld [vmem:[%s11342_s1 + $0x1710] ss:$8 sps:$4 sm:$0xff]   ;;  %v8414_v2 = vld [vmem:[%s11342_s1 + $0xb20] ss:$8 sps:$4 sm:$0xff]  }
 0x291   :  { %6126 = vmatprep.subr.bf16.mxu0 %v8333_v3  ;;  %v8417_v3 = vld [vmem:[%s11342_s1 + $0x1720] ss:$8 sps:$4 sm:$0xff]  }
 0x293   :  { %5635 = vmatpush1.bf16.msra.mxu1 %v8328_v4  ;;  %v8422_v4 = vld [vmem:[%s11342_s1 + $0xb34] ss:$8 sps:$4 sm:$0xff]  }
 0x294   :  { %6127 = vmatpush1.bf16.msra.mxu0 %v8331_v5  ;;  %5636 = vmatprep.subr.bf16.mxu1 %v8336_v6  ;;  %v8425_v5 = vld [vmem:[%s11342_s1 + $0x1734] ss:$8 sps:$4 sm:$0xff]   ;;  %v8420_v6 = vld [vmem:[%s11342_s1 + $0xb30] ss:$8 sps:$4 sm:$0xff]  }
 0x295   :  { %6128 = vmatprep.subr.bf16.mxu0 %v8339_v7  ;;  %v8423_v7 = vld [vmem:[%s11342_s1 + $0x1730] ss:$8 sps:$4 sm:$0xff]  }
 0x297   :  { %5637 = vmatpush1.bf16.msra.mxu1 %v8334_v8  ;;  %v8428_v8 = vld [vmem:[%s11342_s1 + $0xb44] ss:$8 sps:$4 sm:$0xff]  }
 0x298   :  { %6129 = vmatpush1.bf16.msra.mxu0 %v8337_v9  ;;  %5638 = vmatprep.subr.bf16.mxu1 %v8342_v10  ;;  %v8431_v9 = vld [vmem:[%s11342_s1 + $0x1744] ss:$8 sps:$4 sm:$0xff]   ;;  %v8426_v10 = vld [vmem:[%s11342_s1 + $0xb40] ss:$8 sps:$4 sm:$0xff]  }
 0x299   :  { %6130 = vmatprep.subr.bf16.mxu0 %v8345_v58  ;;  %v8429_v58 = vld [vmem:[%s11342_s1 + $0x1740] ss:$8 sps:$4 sm:$0xff]  }
 0x29b   :  { %5639 = vmatpush1.bf16.msra.mxu1 %v8340_v18  ;;  %v8434_v18 = vld [vmem:[%s11342_s1 + $0xb54] ss:$8 sps:$4 sm:$0xff]  }
 0x29c   :  { %6131 = vmatpush1.bf16.msra.mxu0 %v8343_v19  ;;  %5640 = vmatprep.subr.bf16.mxu1 %v8348_v0  ;;  %v8437_v19 = vld [vmem:[%s11342_s1 + $0x1754] ss:$8 sps:$4 sm:$0xff]   ;;  %v8432_v0 = vld [vmem:[%s11342_s1 + $0xb50] ss:$8 sps:$4 sm:$0xff]  }
 0x29d   :  { %6132 = vmatprep.subr.bf16.mxu0 %v8351_v1  ;;  %v8435_v1 = vld [vmem:[%s11342_s1 + $0x1750] ss:$8 sps:$4 sm:$0xff]  }
 0x29f   :  { %5641 = vmatpush1.bf16.msra.mxu1 %v8346_v22  ;;  %v8440_v22 = vld [vmem:[%s11342_s1 + $0xb64] ss:$8 sps:$4 sm:$0xff]  }
 0x2a0   :  { %6133 = vmatpush1.bf16.msra.mxu0 %v8349_v52  ;;  %5642 = vmatprep.subr.bf16.mxu1 %v8354_v59  ;;  %v8443_v52 = vld [vmem:[%s11342_s1 + $0x1764] ss:$8 sps:$4 sm:$0xff]   ;;  %v8438_v59 = vld [vmem:[%s11342_s1 + $0xb60] ss:$8 sps:$4 sm:$0xff]  }
 0x2a1   :  { %6134 = vmatprep.subr.bf16.mxu0 %v8357_v11  ;;  %v8441_v11 = vld [vmem:[%s11342_s1 + $0x1760] ss:$8 sps:$4 sm:$0xff]  }
 0x2a3   :  { %5643 = vmatpush1.bf16.msra.mxu1 %v8352_v24  ;;  %v8446_v24 = vld [vmem:[%s11342_s1 + $0xb74] ss:$8 sps:$4 sm:$0xff]  }
 0x2a4   :  { %6135 = vmatpush1.bf16.msra.mxu0 %v8355_v25  ;;  %5644 = vmatprep.subr.bf16.mxu1 %v8360_v26  ;;  %v8449_v25 = vld [vmem:[%s11342_s1 + $0x1774] ss:$8 sps:$4 sm:$0xff]   ;;  %v8444_v26 = vld [vmem:[%s11342_s1 + $0xb70] ss:$8 sps:$4 sm:$0xff]  }
 0x2a5   :  { %6136 = vmatprep.subr.bf16.mxu0 %v8363_v27  ;;  %v8447_v27 = vld [vmem:[%s11342_s1 + $0x1770] ss:$8 sps:$4 sm:$0xff]  }
 0x2a7   :  { %5645 = vmatpush1.bf16.msra.mxu1 %v8358_v28  ;;  %v8452_v28 = vld [vmem:[%s11342_s1 + $0xb84] ss:$8 sps:$4 sm:$0xff]  }
 0x2a8   :  { %6137 = vmatpush1.bf16.msra.mxu0 %v8361_v29  ;;  %5646 = vmatprep.subr.bf16.mxu1 %v8366_v30  ;;  %v8455_v29 = vld [vmem:[%s11342_s1 + $0x1784] ss:$8 sps:$4 sm:$0xff]   ;;  %v8450_v30 = vld [vmem:[%s11342_s1 + $0xb80] ss:$8 sps:$4 sm:$0xff]  }
 0x2a9   :  { %6138 = vmatprep.subr.bf16.mxu0 %v8369_v14  ;;  %v8453_v14 = vld [vmem:[%s11342_s1 + $0x1780] ss:$8 sps:$4 sm:$0xff]  }
 0x2ab   :  { %5647 = vmatpush1.bf16.msra.mxu1 %v8364_v32  ;;  %v8458_v32 = vld [vmem:[%s11342_s1 + $0xb94] ss:$8 sps:$4 sm:$0xff]  }
 0x2ac   :  { %6139 = vmatpush1.bf16.msra.mxu0 %v8367_v33  ;;  %5648 = vmatprep.subr.bf16.mxu1 %v8372_v34  ;;  %v8461_v33 = vld [vmem:[%s11342_s1 + $0x1794] ss:$8 sps:$4 sm:$0xff]   ;;  %v8456_v34 = vld [vmem:[%s11342_s1 + $0xb90] ss:$8 sps:$4 sm:$0xff]  }
 0x2ad   :  { %6140 = vmatprep.subr.bf16.mxu0 %v8375_v16  ;;  %v8459_v16 = vld [vmem:[%s11342_s1 + $0x1790] ss:$8 sps:$4 sm:$0xff]  }
 0x2af   :  { %5649 = vmatpush1.bf16.msra.mxu1 %v8370_v56  ;;  %v8464_v56 = vld [vmem:[%s11342_s1 + $0xba4] ss:$8 sps:$4 sm:$0xff]  }
 0x2b0   :  { %6141 = vmatpush1.bf16.msra.mxu0 %v8373_v23  ;;  %5650 = vmatprep.subr.bf16.mxu1 %v8378_v20  ;;  %v8467_v23 = vld [vmem:[%s11342_s1 + $0x17a4] ss:$8 sps:$4 sm:$0xff]   ;;  %v8462_v20 = vld [vmem:[%s11342_s1 + $0xba0] ss:$8 sps:$4 sm:$0xff]  }
 0x2b1   :  { %6142 = vmatprep.subr.bf16.mxu0 %v8381_v21  ;;  %v8465_v21 = vld [vmem:[%s11342_s1 + $0x17a0] ss:$8 sps:$4 sm:$0xff]  }
 0x2b3   :  { %5651 = vmatpush1.bf16.msra.mxu1 %v8376_v43  ;;  %v8470_v43 = vld [vmem:[%s11342_s1 + $0xbb4] ss:$8 sps:$4 sm:$0xff]  }
 0x2b4   :  { %6143 = vmatpush1.bf16.msra.mxu0 %v8379_v12  ;;  %5652 = vmatprep.subr.bf16.mxu1 %v8384_v45  ;;  %v8473_v12 = vld [vmem:[%s11342_s1 + $0x17b4] ss:$8 sps:$4 sm:$0xff]   ;;  %v8468_v45 = vld [vmem:[%s11342_s1 + $0xbb0] ss:$8 sps:$4 sm:$0xff]  }
 0x2b5   :  { %6144 = vmatprep.subr.bf16.mxu0 %v8387_v46  ;;  %v8471_v46 = vld [vmem:[%s11342_s1 + $0x17b0] ss:$8 sps:$4 sm:$0xff]  }
 0x2b7   :  { %5653 = vmatpush1.bf16.msra.mxu1 %v8382_v15  ;;  %v8476_v15 = vld [vmem:[%s11342_s1 + $0xbc4] ss:$8 sps:$4 sm:$0xff]  }
 0x2b8   :  { %6145 = vmatpush1.bf16.msra.mxu0 %v8385_v31  ;;  %5654 = vmatprep.subr.bf16.mxu1 %v8390_v17  ;;  %v8479_v31 = vld [vmem:[%s11342_s1 + $0x17c4] ss:$8 sps:$4 sm:$0xff]   ;;  %v8474_v17 = vld [vmem:[%s11342_s1 + $0xbc0] ss:$8 sps:$4 sm:$0xff]  }
 0x2b9   :  { %6146 = vmatprep.subr.bf16.mxu0 %v8393_v35  ;;  %v8477_v35 = vld [vmem:[%s11342_s1 + $0x17c0] ss:$8 sps:$4 sm:$0xff]  }
 0x2bb   :  { %5655 = vmatpush1.bf16.msra.mxu1 %v8388_v47  ;;  %v8482_v47 = vld [vmem:[%s11342_s1 + $0xbd4] ss:$8 sps:$4 sm:$0xff]  }
 0x2bc   :  { %6147 = vmatpush1.bf16.msra.mxu0 %v8391_v48  ;;  %5656 = vmatprep.subr.bf16.mxu1 %v8396_v50  ;;  %v8485_v48 = vld [vmem:[%s11342_s1 + $0x17d4] ss:$8 sps:$4 sm:$0xff]   ;;  %v8480_v50 = vld [vmem:[%s11342_s1 + $0xbd0] ss:$8 sps:$4 sm:$0xff]  }
 0x2bd   :  { %6148 = vmatprep.subr.bf16.mxu0 %v8399_v51  ;;  %v8483_v51 = vld [vmem:[%s11342_s1 + $0x17d0] ss:$8 sps:$4 sm:$0xff]  }
 0x2bf   :  { %5657 = vmatpush1.bf16.msra.mxu1 %v8394_v53  ;;  %v8488_v53 = vld [vmem:[%s11342_s1 + $0xbe4] ss:$8 sps:$4 sm:$0xff]  }
 0x2c0   :  { %6149 = vmatpush1.bf16.msra.mxu0 %v8397_v36  ;;  %5667 = vmatprep.subr.bf16.mxu1 %v8403_v39  ;;  %v8491_v36 = vld [vmem:[%s11342_s1 + $0x17e4] ss:$8 sps:$4 sm:$0xff]   ;;  %v8486_v39 = vld [vmem:[%s11342_s1 + $0xbe0] ss:$8 sps:$4 sm:$0xff]  }
 0x2c1   :  { %6159 = vmatprep.subr.bf16.mxu0 %v8407_v57  ;;  %v8489_v57 = vld [vmem:[%s11342_s1 + $0x17e0] ss:$8 sps:$4 sm:$0xff]  }
 0x2c2   :  { %5659 = vmatmul.mubr.bf16.vlgmr.msra.gmra.mrb[0].mxu1 %v10971_v60 }
 0x2c3   :  { %6151 = vmatmul.mubr.bf16.vlgmr.msra.gmra.mrb[0].mxu0 %v10975_v61  ;;  %5668 = vmatpush1.bf16.msra.mxu1 %v8401_v40  ;;  %v8494_v40 = vld [vmem:[%s11342_s1 + $0xbf4] ss:$8 sps:$4 sm:$0xff]  }
 0x2c4   :  { %6160 = vmatpush1.bf16.msra.mxu0 %v8405_v41  ;;  %5669 = vmatprep.subr.bf16.mxu1 %v8410_v13  ;;  %v8497_v41 = vld [vmem:[%s11342_s1 + $0x17f4] ss:$8 sps:$4 sm:$0xff]   ;;  %v11166_v13 = vld.sshfl [vmem:[%s11341_s0 + $0x30] sm:$0x11 pattern:$0x75316420] }
 0x2c5   :  { %6161 = vmatprep.subr.bf16.mxu0 %v8413_v44  ;;  %5699 = vmatprep.mubr.bf16.mxu1 %v996_v62  ;;  %v8492_v44 = vld [vmem:[%s11342_s1 + $0xbf0] ss:$8 sps:$4 sm:$0xff]  }
 0x2c6   :  { %6191 = vmatprep.mubr.bf16.mxu0 %v1143_v63  ;;  %v8495_v62 = vld [vmem:[%s11342_s1 + $0x17f0] ss:$8 sps:$4 sm:$0xff]   ;;  %v1151_v63 = vcombine.high %v11166_v13, %v11166_v13 }
 0x2c7   :  { %5670 = vmatpush1.bf16.msra.mxu1 %v8408_v55  ;;  %v8500_v55 = vld [vmem:[%s11342_s1 + $0x1804] ss:$8 sps:$4 sm:$0xff]  }
 0x2c8   :  { %6162 = vmatpush1.bf16.msra.mxu0 %v8411_v38  ;;  %5671 = vmatprep.subr.bf16.mxu1 %v8416_v37  ;;  %v994_v38 = vcombine.high %v10971_v60, %v10971_v60  ;;  %v1141_v37 = vcombine.high %v10975_v61, %v10975_v61  ;;  %v8501_v60 = vld [vmem:[%s11342_s1 + $0x1810] ss:$8 sps:$4 sm:$0xff]   ;;  %v8506_v61 = vld [vmem:[%s11342_s1 + $0x1824] ss:$8 sps:$4 sm:$0xff]  }
 0x2c9   :  { %6163 = vmatprep.subr.bf16.mxu0 %v8419_v54  ;;  %v8498_v54 = vld [vmem:[%s11342_s1 + $0x1800] ss:$8 sps:$4 sm:$0xff]  }
 0x2cb   :  { %5672 = vmatpush1.bf16.msra.mxu1 %v8414_v2  ;;  %v1165_v2 = vrot.slane %v1151_v63, %v8761_v49 }
 0x2cc   :  { %6164 = vmatpush1.bf16.msra.mxu0 %v8417_v3  ;;  %5673 = vmatprep.subr.bf16.mxu1 %v8422_v4  ;;  %v8503_v3 = vld [vmem:[%s11342_s1 + $0x1814] ss:$8 sps:$4 sm:$0xff]   ;;  %v8504_v4 = vld [vmem:[%s11342_s1 + $0x1820] ss:$8 sps:$4 sm:$0xff]  }
 0x2cd   :  { %6165 = vmatprep.subr.bf16.mxu0 %v8425_v5  ;;  %v8509_v5 = vld [vmem:[%s11342_s1 + $0x1834] ss:$8 sps:$4 sm:$0xff]  }
 0x2cf   :  { %5674 = vmatpush1.bf16.msra.mxu1 %v8420_v6  ;;  %v8507_v6 = vld [vmem:[%s11342_s1 + $0x1830] ss:$8 sps:$4 sm:$0xff]  }
 0x2d0   :  { %6166 = vmatpush1.bf16.msra.mxu0 %v8423_v7  ;;  %5675 = vmatprep.subr.bf16.mxu1 %v8428_v8  ;;  %v8512_v7 = vld [vmem:[%s11342_s1 + $0x1844] ss:$8 sps:$4 sm:$0xff]   ;;  %v8510_v8 = vld [vmem:[%s11342_s1 + $0x1840] ss:$8 sps:$4 sm:$0xff]  }
 0x2d1   :  { %6167 = vmatprep.subr.bf16.mxu0 %v8431_v9  ;;  %v8515_v9 = vld [vmem:[%s11342_s1 + $0x1854] ss:$8 sps:$4 sm:$0xff]  }
 0x2d3   :  { %5676 = vmatpush1.bf16.msra.mxu1 %v8426_v10  ;;  %v8513_v10 = vld [vmem:[%s11342_s1 + $0x1850] ss:$8 sps:$4 sm:$0xff]  }
 0x2d4   :  { %6168 = vmatpush1.bf16.msra.mxu0 %v8429_v58  ;;  %5677 = vmatprep.subr.bf16.mxu1 %v8434_v18  ;;  %v8518_v58 = vld [vmem:[%s11342_s1 + $0x1864] ss:$8 sps:$4 sm:$0xff]   ;;  %v8516_v18 = vld [vmem:[%s11342_s1 + $0x1860] ss:$8 sps:$4 sm:$0xff]  }
 0x2d5   :  { %6169 = vmatprep.subr.bf16.mxu0 %v8437_v19  ;;  %v8521_v19 = vld [vmem:[%s11342_s1 + $0x1874] ss:$8 sps:$4 sm:$0xff]  }
 0x2d7   :  { %5678 = vmatpush1.bf16.msra.mxu1 %v8432_v0  ;;  %v8519_v0 = vld [vmem:[%s11342_s1 + $0x1870] ss:$8 sps:$4 sm:$0xff]  }
 0x2d8   :  { %6170 = vmatpush1.bf16.msra.mxu0 %v8435_v1  ;;  %5679 = vmatprep.subr.bf16.mxu1 %v8440_v22  ;;  %v8524_v1 = vld [vmem:[%s11342_s1 + $0x1884] ss:$8 sps:$4 sm:$0xff]   ;;  %v8522_v22 = vld [vmem:[%s11342_s1 + $0x1880] ss:$8 sps:$4 sm:$0xff]  }
 0x2d9   :  { %6171 = vmatprep.subr.bf16.mxu0 %v8443_v52  ;;  %v8527_v52 = vld [vmem:[%s11342_s1 + $0x1894] ss:$8 sps:$4 sm:$0xff]  }
 0x2db   :  { %5680 = vmatpush1.bf16.msra.mxu1 %v8438_v59  ;;  %v8525_v59 = vld [vmem:[%s11342_s1 + $0x1890] ss:$8 sps:$4 sm:$0xff]  }
 0x2dc   :  { %6172 = vmatpush1.bf16.msra.mxu0 %v8441_v11  ;;  %5681 = vmatprep.subr.bf16.mxu1 %v8446_v24  ;;  %v8530_v11 = vld [vmem:[%s11342_s1 + $0x18a4] ss:$8 sps:$4 sm:$0xff]   ;;  %v8528_v24 = vld [vmem:[%s11342_s1 + $0x18a0] ss:$8 sps:$4 sm:$0xff]  }
 0x2dd   :  { %6173 = vmatprep.subr.bf16.mxu0 %v8449_v25  ;;  %v8533_v25 = vld [vmem:[%s11342_s1 + $0x18b4] ss:$8 sps:$4 sm:$0xff]  }
 0x2df   :  { %5682 = vmatpush1.bf16.msra.mxu1 %v8444_v26  ;;  %v8531_v26 = vld [vmem:[%s11342_s1 + $0x18b0] ss:$8 sps:$4 sm:$0xff]  }
 0x2e0   :  { %6174 = vmatpush1.bf16.msra.mxu0 %v8447_v27  ;;  %5683 = vmatprep.subr.bf16.mxu1 %v8452_v28  ;;  %v8536_v27 = vld [vmem:[%s11342_s1 + $0x18c4] ss:$8 sps:$4 sm:$0xff]   ;;  %v8534_v28 = vld [vmem:[%s11342_s1 + $0x18c0] ss:$8 sps:$4 sm:$0xff]  }
 0x2e1   :  { %6175 = vmatprep.subr.bf16.mxu0 %v8455_v29  ;;  %v8539_v29 = vld [vmem:[%s11342_s1 + $0x18d4] ss:$8 sps:$4 sm:$0xff]  }
 0x2e3   :  { %5684 = vmatpush1.bf16.msra.mxu1 %v8450_v30  ;;  %v8537_v30 = vld [vmem:[%s11342_s1 + $0x18d0] ss:$8 sps:$4 sm:$0xff]  }
 0x2e4   :  { %6176 = vmatpush1.bf16.msra.mxu0 %v8453_v14  ;;  %5685 = vmatprep.subr.bf16.mxu1 %v8458_v32  ;;  %v8542_v14 = vld [vmem:[%s11342_s1 + $0x18e4] ss:$8 sps:$4 sm:$0xff]   ;;  %v8540_v32 = vld [vmem:[%s11342_s1 + $0x18e0] ss:$8 sps:$4 sm:$0xff]  }
 0x2e5   :  { %6177 = vmatprep.subr.bf16.mxu0 %v8461_v33  ;;  %v8545_v33 = vld [vmem:[%s11342_s1 + $0x18f4] ss:$8 sps:$4 sm:$0xff]  }
 0x2e7   :  { %5686 = vmatpush1.bf16.msra.mxu1 %v8456_v34  ;;  %v8543_v34 = vld [vmem:[%s11342_s1 + $0x18f0] ss:$8 sps:$4 sm:$0xff]   ;;  %s8590_s1 = smov 122  }
 0x2e8   :  { %6178 = vmatpush1.bf16.msra.mxu0 %v8459_v16  ;;  %5687 = vmatprep.subr.bf16.mxu1 %v8464_v56  ;;  %v1158_v16 = vrot.slane %v11166_v13, %v8761_v49  ;;  %v8546_v56 = vld [vmem:[%s11344_s3] sm:$0xff]   ;;  %v8549_v49 = vld [vmem:[%s11344_s3 + $0x18] sm:$0xff]  }
 0x2e9   :  { %6179 = vmatprep.subr.bf16.mxu0 %v8467_v23  ;;  %v8588_v23 = vmov 0  }
 0x2eb   :  { %5688 = vmatpush1.bf16.msra.mxu1 %v8462_v20  ;;  %v8547_v20 = vld [vmem:[%s11344_s3 + $0x8] sm:$0xff]  }
 0x2ec   :  { %6180 = vmatpush1.bf16.msra.mxu0 %v8465_v21  ;;  %5689 = vmatprep.subr.bf16.mxu1 %v8470_v43  ;;  %v8548_v21 = vld [vmem:[%s11344_s3 + $0x10] sm:$0xff]   ;;  %v8550_v43 = vld [vmem:[%s11344_s3 + $0x20] sm:$0xff]  }
 0x2ed   :  { %6181 = vmatprep.subr.bf16.mxu0 %v8473_v12  ;;  %v8551_v12 = vld [vmem:[%s11344_s3 + $0x28] sm:$0xff]  }
 0x2ef   :  { %5690 = vmatpush1.bf16.msra.mxu1 %v8468_v45  ;;  %v8552_v45 = vld [vmem:[%s11344_s3 + $0x30] sm:$0xff]  }
 0x2f0   :  { %6182 = vmatpush1.bf16.msra.mxu0 %v8471_v46  ;;  %5691 = vmatprep.subr.bf16.mxu1 %v8476_v15  ;;  %v8553_v46 = vld [vmem:[%s11344_s3 + $0x38] sm:$0xff]   ;;  %v8554_v15 = vld [vmem:[%s11344_s3 + $0x40] sm:$0xff]  }
 0x2f1   :  { %6183 = vmatprep.subr.bf16.mxu0 %v8479_v31  ;;  %v8555_v31 = vld [vmem:[%s11344_s3 + $0x48] sm:$0xff]  }
 0x2f3   :  { %5692 = vmatpush1.bf16.msra.mxu1 %v8474_v17  ;;  %v8556_v17 = vld [vmem:[%s11344_s3 + $0x50] sm:$0xff]  }
 0x2f4   :  { %6184 = vmatpush1.bf16.msra.mxu0 %v8477_v35  ;;  %5693 = vmatprep.subr.bf16.mxu1 %v8482_v47  ;;  %v8557_v35 = vld [vmem:[%s11344_s3 + $0x58] sm:$0xff]   ;;  %v8558_v47 = vld [vmem:[%s11344_s3 + $0x60] ss:$0 sps:$4 sm:$0xff]  }
 0x2f5   :  { %6185 = vmatprep.subr.bf16.mxu0 %v8485_v48  ;;  %v6356_v48 = vsel %vm6354_vm0, %v8558_v47, 0 }
 0x2f7   :  { %5694 = vmatpush1.bf16.msra.mxu1 %v8480_v50 }
 0x2f8   :  { %6186 = vmatpush1.bf16.msra.mxu0 %v8483_v51  ;;  %5695 = vmatprep.subr.bf16.mxu1 %v8488_v53 }
 0x2f9   :  { %6187 = vmatprep.subr.bf16.mxu0 %v8491_v36 }
 0x2fb   :  { %5696 = vmatpush1.bf16.msra.mxu1 %v8486_v39  ;;  %v835_v39 = vsub.s32 0, %v8743_v42 }
 0x2fc   :  { %6188 = vmatpush1.bf16.msra.mxu0 %v8489_v57  ;;  %5697 = vmatprep.subr.bf16.mxu1 %v8494_v40  ;;  %v831_v57 = vld [vmem:[%s11343_s2] sm:$0x3]  ;;  %v839_v40 = vsub.s32 1, %v8743_v42  ;;  %s8589_s2 = smov [#allocation2]  }
 0x2fd   :  { %6189 = vmatprep.subr.bf16.mxu0 %v8497_v41  ;;  %v836_v41 = vrot.slane %v831_v57, %v835_v39  ;;  %s6412_s7 = sshll.u32 %s8589_s2, 4  ;;  %s6413_s7 = int_to_ptr.vmem [resolvable:$true] %s6412_s7 }
 0x2fe   :  { %v840_v13 = vrot.slane %v831_v57, %v839_v40  ;;  %s8563_s8 = scalar_lea.vmem %s6413_s7, 32  ;;  %p8568_p1 = scmp.lt.s32.totalorder %s6413_s7, %s6413_s7 }
 0x2ff   :  { %5698 = vmatpush1.bf16.msra.mxu1 %v8492_v44  ;;  %p8564_p0 = scmp.ne.s32.totalorder %s6413_s7, %s8563_s8  ;;  %p8569_p2 = scmp.lt.s32.totalorder %s8563_s8, %s8563_s8 }
 0x300   :  { %6190 = vmatpush1.bf16.msra.mxu0 %v8495_v62  ;;  %6358 = vmatprep.subr.bf16.mxu1 %v8588_v23 }
 0x301   :  { %6200 = vmatprep.subr.bf16.mxu0 %v8500_v55  ;;  %p8570_p3 = por %p8569_p2, %p8568_p1 }
 0x302   :  { %5700 = vmatmul.mubr.bf16.vlgmr.msra.gmra.mrb[0].mxu1 %v994_v38 }
 0x303   :  { %6192 = vmatmul.mubr.bf16.vlgmr.msra.gmra.mrb[0].mxu0 %v1141_v37  ;;  %6359 = vmatpush1.bf16.msra.mxu1 %v8546_v56  ;;  %p8571_p4 = pnand %p8570_p3, %p8564_p0 }
 0x304   :  { %6201 = vmatpush1.bf16.msra.mxu0 %v8498_v54  ;;  %6232 = vmatprep.mubr.bf16.mxu0 %v1165_v2 }
 0x305   :  { %6202 = vmatprep.subr.bf16.mxu0 %v8503_v3  ;;  %6360 = vmatprep.subr.bf16.mxu1 %v8588_v23 }
 0x307   :  { %6361 = vmatpush1.bf16.msra.mxu1 %v8547_v20 }
 0x308   :  { %6203 = vmatpush1.bf16.msra.mxu0 %v8501_v60  ;;  %6362 = vmatprep.subr.bf16.mxu1 %v8588_v23 }
 0x309   :  { %6204 = vmatprep.subr.bf16.mxu0 %v8506_v61  ;;  %v7225_v61 = vld [vmem:[%s11345_s4] ss:$0 sm:$0xff] }
 0x30b   :  { %6363 = vmatpush1.bf16.msra.mxu1 %v8548_v21 }
 0x30c   :  { %6205 = vmatpush1.bf16.msra.mxu0 %v8504_v4  ;;  %6364 = vmatprep.subr.bf16.mxu1 %v8588_v23 }
 0x30d   :  { %6206 = vmatprep.subr.bf16.mxu0 %v8509_v5 }
 0x30f   :  { %6365 = vmatpush1.bf16.msra.mxu1 %v8549_v49 }
 0x310   :  { %6207 = vmatpush1.bf16.msra.mxu0 %v8507_v6  ;;  %6366 = vmatprep.subr.bf16.mxu1 %v8588_v23 }
 0x311   :  { %6208 = vmatprep.subr.bf16.mxu0 %v8512_v7 }
 0x313   :  { %6367 = vmatpush1.bf16.msra.mxu1 %v8550_v43 }
 0x314   :  { %6209 = vmatpush1.bf16.msra.mxu0 %v8510_v8  ;;  %6368 = vmatprep.subr.bf16.mxu1 %v8588_v23 }
 0x315   :  { %6210 = vmatprep.subr.bf16.mxu0 %v8515_v9 }
 0x317   :  { %6369 = vmatpush1.bf16.msra.mxu1 %v8551_v12 }
 0x318   :  { %6211 = vmatpush1.bf16.msra.mxu0 %v8513_v10  ;;  %6370 = vmatprep.subr.bf16.mxu1 %v8588_v23 }
 0x319   :  { %6212 = vmatprep.subr.bf16.mxu0 %v8518_v58 }
 0x31b   :  { %6371 = vmatpush1.bf16.msra.mxu1 %v8552_v45 }
 0x31c   :  { %6213 = vmatpush1.bf16.msra.mxu0 %v8516_v18  ;;  %6372 = vmatprep.subr.bf16.mxu1 %v8588_v23 }
 0x31d   :  { %6214 = vmatprep.subr.bf16.mxu0 %v8521_v19 }
 0x31f   :  { %6373 = vmatpush1.bf16.msra.mxu1 %v8553_v46 }
 0x320   :  { %6215 = vmatpush1.bf16.msra.mxu0 %v8519_v0  ;;  %6374 = vmatprep.subr.bf16.mxu1 %v8588_v23 }
 0x321   :  { %6216 = vmatprep.subr.bf16.mxu0 %v8524_v1 }
 0x323   :  { %6375 = vmatpush1.bf16.msra.mxu1 %v8554_v15 }
 0x324   :  { %6217 = vmatpush1.bf16.msra.mxu0 %v8522_v22  ;;  %6376 = vmatprep.subr.bf16.mxu1 %v8588_v23 }
 0x325   :  { %6218 = vmatprep.subr.bf16.mxu0 %v8527_v52 }
 0x327   :  { %6377 = vmatpush1.bf16.msra.mxu1 %v8555_v31 }
 0x328   :  { %6219 = vmatpush1.bf16.msra.mxu0 %v8525_v59  ;;  %6378 = vmatprep.subr.bf16.mxu1 %v8588_v23 }
 0x329   :  { %6220 = vmatprep.subr.bf16.mxu0 %v8530_v11 }
 0x32b   :  { %6379 = vmatpush1.bf16.msra.mxu1 %v8556_v17 }
 0x32c   :  { %6221 = vmatpush1.bf16.msra.mxu0 %v8528_v24  ;;  %6380 = vmatprep.subr.bf16.mxu1 %v8588_v23 }
 0x32d   :  { %6222 = vmatprep.subr.bf16.mxu0 %v8533_v25 }
 0x32f   :  { %6381 = vmatpush1.bf16.msra.mxu1 %v8557_v35 }
 0x330   :  { %6223 = vmatpush1.bf16.msra.mxu0 %v8531_v26  ;;  %6382 = vmatprep.subr.bf16.mxu1 %v8588_v23 }
 0x331   :  { %6224 = vmatprep.subr.bf16.mxu0 %v8536_v27 }
 0x333   :  { %6383 = vmatpush1.bf16.msra.mxu1 %v6356_v48 }
 0x334   :  { %6225 = vmatpush1.bf16.msra.mxu0 %v8534_v28 }
 0x335   :  { %6226 = vmatprep.subr.bf16.mxu0 %v8539_v29 }
 0x338   :  { %6227 = vmatpush1.bf16.msra.mxu0 %v8537_v30 }
 0x339   :  { %6228 = vmatprep.subr.bf16.mxu0 %v8542_v14 }
 0x33c   :  { %6229 = vmatpush1.bf16.msra.mxu0 %v8540_v32 }
 0x33d   :  { %6230 = vmatprep.subr.bf16.mxu0 %v8545_v33 }
 0x340   :  { %6231 = vmatpush1.bf16.msra.mxu0 %v8543_v34 }
 0x343   :  { %6233 = vmatmul.mubr.bf16.vlgmr.msra.gmra.mrb[0].mxu0 %v1158_v16 }
 0x3d5   :  { %v5701_v50 = vpop.f32.mrb[0].mxu1 }
 0x3d6   :  { %v5703_v51 = vpop.f32.mrb[1].mxu1  ;;  %v7240_v44 = vadd.f32 %v5701_v50, %v836_v41 }
 0x3d7   :  { %v5705_v53 = vpop.f32.mrb[2].mxu1  ;;  %v7242_v62 = vadd.f32 %v5703_v51, %v840_v13 }
 0x3d8   :  { %v5706_v36 = vpop.f32.mrb[3].mxu1 }
 0x416   :  { %v6234_v63 = vpop.f32.mrb[0].mxu0 }
 0x417   :  { %v7241_v55 = vadd.f32 %v7240_v44, %v6234_v63  ;;  %v6236_v38 = vpop.f32.mrb[1].mxu0 }
 0x418   :  { %v7243_v37 = vadd.f32 %v7242_v62, %v6236_v38  ;;  %v6238_v54 = vpop.f32.mrb[2].mxu0 }
 0x419   :  { %v6239_v2 = vpop.f32.mrb[3].mxu0  ;;  %v6241_v60 = vpack.c.bf16 %v7241_v55, %v7241_v55 }
 0x41a   :  { %v6242_v3 = vpack.c.bf16 %v7243_v37, %v7243_v37 }
 0x41c   :  { %7239 = vmatprep.mubr.msk.bf16.mxu1 %vm6350_vm1, %v6242_v3 }
 0x41d   :  { %6391 = vmatmul.mubr.bf16.vlgmr.msra.gmra.mrb[4].mxu1 %v6241_v60 }
 0x4f0   :  { %v6392_v42 = vpop.f32.mrb[4].mxu1 }
 0x4f1   :  { %v6393_v4 = vadd.f32 %v7225_v61, %v6392_v42  ;;  %v6394_v5 = vpop.f32.mrb[5].mxu1 }
 0x4f2   :  { %v6395_v6 = vpop.f32.mrb[6].mxu1 }
 0x4f3   :  { %v6396_v7 = vpop.f32.mrb[7].mxu1  ;;  %6401 = vrot.lane.b32.xlu0 %v6393_v4, %s8590_s1  ;;  %6399 = vst.msk [vmem:[#allocation2] sm:$0x3] %vm6398_vm2, %v6393_v4 }
 0x4f4   :  { %8574 = shalt.err (!%p8571_p4)
}
 0x4f5   :  { %s8575_s10 = scalar_lea.hbm %s11346_s5, 32 }
 0x4f6   :  { %p8576_p5 = scmp.ne.s32.totalorder %s11346_s5, %s8575_s10  ;;  %p8579_p6 = scmp.lt.u32.totalorder %s8575_s10, %s11346_s5 }
 0x4f8   :  { %p8581_p7 = pnand %p8579_p6, %p8576_p5 }
 0x4fa   :  { %8584 = shalt.err (!%p8581_p7)
}
 0x4fb   :  { %6415 = dma.vmem_to_hbm [thread:$0]  %s6413_s7, 32, %s11346_s5, [#allocation3]   ;;  %vm6404_vm3 = vcmask 1024  }
 0x565   :  { %v6402_v8 = vpop.permute.xlu0 %6401 }
 0x566   :  { %6405 = vst.msk [vmem:[%s11347_s6] sm:$0x3] %vm6404_vm3, %v6402_v8 }
 0x567   :  { %8585 = dma.done.wait [#allocation3], 32  }
 0x568   :  { %8586 = vsyncadd [#allocation3], 4294967264 }
 0x569   :  { %6423 = vsyncpa [#allocation3], 1 }

</bundles_post_ra>
